<compile_context>
chip_gen: v7x
topology: tpu7x:2x2x1
jax: 0.10.0
libtpu: 0.0.40
codegen_flags: <defaults>
</compile_context>

<pallas_src>
import functools

import jax
import jax.numpy as jnp
from jax.experimental import pallas as pl
from jax.experimental.pallas import tpu as pltpu

LANE = 128
IN_CHANNELS = 200                       # conv1 = Conv2d(200, 64, 7, 2, 3)
LAYER_PLANES = (64, 128, 256, 512)
LAYER_STRIDES = (1, 2, 2, 2)


def _round_up(x, m):
    return ((x + m - 1) // m) * m


def _cpad(c):
    return max(LANE, _round_up(c, LANE))


# --------------------- fused tiled matmul (conv + bn + relu) ---------------------

def _mm_kernel(x_ref, w_ref, b_ref, o_ref, acc_ref, *, relu):
    @pl.when(pl.program_id(2) == 0)
    def _():
        acc_ref[...] = jnp.zeros_like(acc_ref)

    acc_ref[...] += jnp.dot(x_ref[...], w_ref[...],
                            preferred_element_type=jnp.float32)

    @pl.when(pl.program_id(2) == pl.num_programs(2) - 1)
    def _():
        y = acc_ref[...] + b_ref[...]
        if relu:
            y = jnp.maximum(y, 0.0)
        o_ref[...] = y.astype(o_ref.dtype)


def _mm_res_kernel(x_ref, w_ref, b_ref, r_ref, o_ref, acc_ref, *, relu):
    @pl.when(pl.program_id(2) == 0)
    def _():
        acc_ref[...] = jnp.zeros_like(acc_ref)

    acc_ref[...] += jnp.dot(x_ref[...], w_ref[...],
                            preferred_element_type=jnp.float32)

    @pl.when(pl.program_id(2) == pl.num_programs(2) - 1)
    def _():
        y = acc_ref[...] + b_ref[...] + r_ref[...].astype(jnp.float32)
        if relu:
            y = jnp.maximum(y, 0.0)
        o_ref[...] = y.astype(o_ref.dtype)


def fused_matmul(x, w, bias, residual=None, relu=True, out_dtype=jnp.bfloat16):
    """(M,K)bf16 @ (K,N)bf16 -> f32 acc, + bias [+ residual], [ReLU], cast."""
    M, K = x.shape
    Kw, N = w.shape
    assert K == Kw and K % LANE == 0 and N % LANE == 0, (M, K, N)

    tm = 256 if M % 256 == 0 else (128 if M % 128 == 0 else M)
    tn = 256 if N % 256 == 0 else 128
    tk = 512 if K % 512 == 0 else (256 if K % 256 == 0 else 128)
    grid = (M // tm, N // tn, K // tk)

    x_spec = pl.BlockSpec((tm, tk), lambda i, j, k: (i, k))
    w_spec = pl.BlockSpec((tk, tn), lambda i, j, k: (k, j))
    b_spec = pl.BlockSpec((1, tn), lambda i, j, k: (0, j))
    o_spec = pl.BlockSpec((tm, tn), lambda i, j, k: (i, j))
    scratch = [pltpu.VMEM((tm, tn), jnp.float32)]
    cparams = pltpu.CompilerParams(
        dimension_semantics=("parallel", "parallel", "arbitrary"),
        vmem_limit_bytes=32 * 1024 * 1024)
    out_shape = jax.ShapeDtypeStruct((M, N), out_dtype)

    if residual is None:
        kern = functools.partial(_mm_kernel, relu=relu)
        return pl.pallas_call(
            kern, out_shape=out_shape, grid=grid,
            in_specs=[x_spec, w_spec, b_spec], out_specs=o_spec,
            scratch_shapes=scratch, compiler_params=cparams)(x, w, bias)

    r_spec = pl.BlockSpec((tm, tn), lambda i, j, k: (i, j))
    kern = functools.partial(_mm_res_kernel, relu=relu)
    return pl.pallas_call(
        kern, out_shape=out_shape, grid=grid,
        in_specs=[x_spec, w_spec, b_spec, r_spec], out_specs=o_spec,
        scratch_shapes=scratch, compiler_params=cparams)(x, w, bias, residual)


# ------------------------------- maxpool 3x3 s2 p1 -------------------------------

def _maxpool_kernel(ee_ref, eo_ref, oe_ref, oo_ref, o_ref, *, oh, ow):
    m = ee_ref[:, 0:oh, 0:ow, :]
    m = jnp.maximum(m, ee_ref[:, 0:oh, 1:ow + 1, :])
    m = jnp.maximum(m, ee_ref[:, 1:oh + 1, 0:ow, :])
    m = jnp.maximum(m, ee_ref[:, 1:oh + 1, 1:ow + 1, :])
    m = jnp.maximum(m, eo_ref[:, 0:oh, 0:ow, :])
    m = jnp.maximum(m, eo_ref[:, 1:oh + 1, 0:ow, :])
    m = jnp.maximum(m, oe_ref[:, 0:oh, 0:ow, :])
    m = jnp.maximum(m, oe_ref[:, 0:oh, 1:ow + 1, :])
    m = jnp.maximum(m, oo_ref[:, 0:oh, 0:ow, :])
    o_ref[...] = m


def maxpool3x3_s2_p1(x):
    """nn.MaxPool2d(3, 2, 1) on NHWC via row/col parity planes (1x copy, not 9x)."""
    N, H, W, C = x.shape
    oh = (H + 2 - 3) // 2 + 1
    ow = (W + 2 - 3) // 2 + 1
    xp = jnp.pad(x, ((0, 0), (1, 1), (1, 1), (0, 0)), constant_values=-jnp.inf)
    ee = xp[:, 0::2, 0::2, :]
    eo = xp[:, 0::2, 1::2, :]
    oe = xp[:, 1::2, 0::2, :]
    oo = xp[:, 1::2, 1::2, :]
    kern = functools.partial(_maxpool_kernel, oh=oh, ow=ow)
    return pl.pallas_call(
        kern, out_shape=jax.ShapeDtypeStruct((N, oh, ow, C), x.dtype))(ee, eo, oe, oo)


# ------------------------- fused global avgpool + Linear -------------------------

def _avgpool_fc_kernel(x_ref, w_ref, b_ref, o_ref):
    x = x_ref[...].astype(jnp.float32)                 # (N, H*W, C)
    pooled = jnp.mean(x, axis=1)                       # (N, C)
    o_ref[...] = jnp.dot(pooled, w_ref[...],
                         preferred_element_type=jnp.float32) + b_ref[...]


def avgpool_fc(x, fc_w, fc_b):
    """AdaptiveAvgPool2d((1,1)) + flatten + Linear fused in one kernel."""
    N, H, W, C = x.shape
    xr = x.reshape(N, H * W, C)
    nc = fc_w.shape[1]
    return pl.pallas_call(
        _avgpool_fc_kernel,
        out_shape=jax.ShapeDtypeStruct((N, nc), jnp.float32),
    )(xr, fc_w, fc_b.reshape(1, nc))


# ---------------------------------- JAX glue --------------------------------------

def im2col(x, kh, kw, stride, pad):
    """NHWC (bf16, channel-padded) -> (N*oh*ow, kh*kw*Cpad) patch matrix."""
    if pad > 0:
        x = jnp.pad(x, ((0, 0), (pad, pad), (pad, pad), (0, 0)))
    N, H, W, C = x.shape
    oh = (H - kh) // stride + 1
    ow = (W - kw) // stride + 1
    cols = []
    for i in range(kh):
        for j in range(kw):
            cols.append(x[:, i:i + stride * (oh - 1) + 1:stride,
                          j:j + stride * (ow - 1) + 1:stride, :])
    patches = jnp.stack(cols, axis=3)                  # (N, oh, ow, kh*kw, C)
    return patches.reshape(N * oh * ow, kh * kw * C), oh, ow


def conv_bn(x_nhwc, wp, kh, kw, stride, pad, residual=None, relu=True):
    """Conv2d(bias=False)+BN(+residual)(+ReLU) as one Pallas fused matmul."""
    N = x_nhwc.shape[0]
    patches, oh, ow = im2col(x_nhwc, kh, kw, stride, pad)
    ocp = wp['w'].shape[1]
    res = residual.reshape(-1, ocp) if residual is not None else None
    out = fused_matmul(patches, wp['w'], wp['b'], res, relu)
    return out.reshape(N, oh, ow, ocp)


# --------------------------------- parameters -------------------------------------

def kaiming_conv(key, oc, ic, kh, kw):
    # kaiming_normal_(mode='fan_out', nonlinearity='relu')
    fan_out = oc * kh * kw
    std = (2.0 / fan_out) ** 0.5
    return jax.random.normal(key, (oc, ic, kh, kw), jnp.float32) * std


def make_bn_affine(c, eps=1e-5):
    gamma = jnp.ones((c,), jnp.float32)
    beta = jnp.zeros((c,), jnp.float32)
    mean = jnp.zeros((c,), jnp.float32)
    var = jnp.ones((c,), jnp.float32)
    scale = gamma / jnp.sqrt(var + eps)
    bias = beta - mean * scale
    return scale, bias


def make_conv_bn_params(key, oc, ic, kh, kw):
    """Conv weight in (KH*KW*ICpad, OCpad) matmul layout, BN scale folded, bf16."""
    icp, ocp = _cpad(ic), _cpad(oc)
    w = kaiming_conv(key, oc, ic, kh, kw)                    # OIHW f32
    scale, bias = make_bn_affine(oc)
    w_t = jnp.transpose(w, (2, 3, 1, 0))                     # (kh, kw, ic, oc)
    w_t = jnp.pad(w_t, ((0, 0), (0, 0), (0, icp - ic), (0, ocp - oc)))
    scale_p = jnp.pad(scale, (0, ocp - oc))
    bias_p = jnp.pad(bias, (0, ocp - oc))
    w_mat = (w_t.reshape(kh * kw * icp, ocp) * scale_p[None, :]).astype(jnp.bfloat16)
    return {'w': w_mat, 'b': bias_p.reshape(1, ocp).astype(jnp.float32)}


def make_basic_block_params(key, inplanes, planes, stride):
    k1, k2, k3 = jax.random.split(key, 3)
    p = {
        'conv1': make_conv_bn_params(k1, planes, inplanes, 3, 3),
        'conv2': make_conv_bn_params(k2, planes, planes, 3, 3),
        'downsample': None,
    }
    if stride != 1 or inplanes != planes:       # BasicBlock.expansion == 1
        p['downsample'] = make_conv_bn_params(k3, planes, inplanes, 1, 1)
    return p


def build_resnet_params(key, layers=(1, 1, 1, 1), num_classes=10):
    keys = jax.random.split(key, 6)
    params = {'conv1': make_conv_bn_params(keys[0], 64, IN_CHANNELS, 7, 7)}
    inplanes = 64
    all_layers = []
    for li, (planes, nblocks) in enumerate(zip(LAYER_PLANES, layers)):
        bkeys = jax.random.split(keys[1 + li], nblocks)
        layer = []
        for bi in range(nblocks):
            s = LAYER_STRIDES[li] if bi == 0 else 1
            layer.append(make_basic_block_params(bkeys[bi], inplanes, planes, s))
            inplanes = planes
        all_layers.append(layer)
    params['layers'] = all_layers
    fk1, fk2 = jax.random.split(keys[5])
    fan_in = 512                                 # 512 * BasicBlock.expansion
    bound = 1.0 / (fan_in ** 0.5)
    fc_w = jax.random.uniform(fk1, (num_classes, fan_in), jnp.float32, -bound, bound)
    fc_b = jax.random.uniform(fk2, (num_classes,), jnp.float32, -bound, bound)
    params['fc_w'] = fc_w.T                      # (512, num_classes)
    params['fc_b'] = fc_b
    return params


# --------------------------------- forward pass -----------------------------------

def basic_block_forward(p, x, stride):
    identity = x
    out = conv_bn(x, p['conv1'], 3, 3, stride, 1, relu=True)
    if p['downsample'] is not None:
        identity = conv_bn(x, p['downsample'], 1, 1, stride, 0, relu=False)
    # conv2 + bn2 + (+= identity) + relu fused in one tiled Pallas matmul
    return conv_bn(out, p['conv2'], 3, 3, 1, 1, residual=identity, relu=True)


def resnet_forward(params, x_nchw):
    x = jnp.transpose(x_nchw, (0, 2, 3, 1)).astype(jnp.float32)   # NCHW -> NHWC
    icp = _cpad(IN_CHANNELS)
    x = jnp.pad(x, ((0, 0), (0, 0), (0, 0), (0, icp - x.shape[-1])))
    x = x.astype(jnp.bfloat16)
    x = conv_bn(x, params['conv1'], 7, 7, 2, 3, relu=True)
    x = maxpool3x3_s2_p1(x)
    for li, layer in enumerate(params['layers']):
        for bi, block in enumerate(layer):
            stride = LAYER_STRIDES[li] if bi == 0 else 1   # static (not traced)
            x = basic_block_forward(block, x, stride)
    return avgpool_fc(x, params['fc_w'], params['fc_b'])          # (N, num_classes)


# ------------------------------------ main -----------------------------------------

if __name__ == "__main__":
    key = jax.random.PRNGKey(0)
    pkey, xkey = jax.random.split(key)

    params = build_resnet_params(pkey, layers=(1, 1, 1, 1), num_classes=10)

    # conv1 is hard-coded to 200 input channels in the reference module.
    x = jax.random.normal(xkey, (2, IN_CHANNELS, 16, 16), jnp.float32)   # NCHW

    fwd = jax.jit(resnet_forward)
    logits = fwd(params, x)
    jax.block_until_ready(logits)

    assert logits.shape == (2, 10), logits.shape
    assert bool(jnp.all(jnp.isfinite(logits)))
    print("KERNEL_OK")
</pallas_src>

<mosaic_0001>
module attributes {stable_mosaic.version = 11 : i64} {
  func.func @_mm_kernel(%arg0: i32, %arg1: i32, %arg2: i32, %arg3: memref<128x256xbf16, #tpu.memory_space<vmem>>, %arg4: memref<256x128xbf16, #tpu.memory_space<vmem>>, %arg5: memref<1x128xf32, #tpu.memory_space<vmem>>, %arg6: memref<128x128xbf16, #tpu.memory_space<vmem>>, %arg7: memref<128x128xf32, #tpu.memory_space<vmem>>) attributes {dimension_semantics = [#tpu.dimension_semantics<parallel>, #tpu.dimension_semantics<parallel>, #tpu.dimension_semantics<arbitrary>], iteration_bounds = array<i64: 1, 1, 49>, scalar_prefetch = 0 : i64, scratch_operands = 1 : i64, tpu.core_type = #tpu.core_type<tc>, window_params = [{transform_indices = @transform_0, window_bounds = array<i64: 128, 256>}, {transform_indices = @transform_1, window_bounds = array<i64: 256, 128>}, {transform_indices = @transform_2, window_bounds = array<i64: 1, 128>}, {transform_indices = @transform_3, window_bounds = array<i64: 128, 128>}]} {
    %c0_i32 = arith.constant 0 : i32
    %0 = arith.cmpi eq, %arg2, %c0_i32 : i32
    %1 = arith.extui %0 : i1 to i32
    %c0_i32_0 = arith.constant 0 : i32
    %2 = arith.cmpi ne, %1, %c0_i32_0 : i32
    scf.if %2 {
      %cst_9 = arith.constant 0.000000e+00 : f32
      %12 = vector.broadcast %cst_9 : f32 to vector<128x128xf32>
      %c0_10 = arith.constant 0 : index
      %c0_11 = arith.constant 0 : index
      %13 = vector.load %arg7[%c0_10, %c0_11] : memref<128x128xf32, #tpu.memory_space<vmem>>, vector<128x128xf32>
      tpu.vector_store %arg7[%c0_10, %c0_11], %12 {strides = array<i32>} : memref<128x128xf32, #tpu.memory_space<vmem>>, vector<128x128xf32>,
    } else {
    }
    %c0 = arith.constant 0 : index
    %c0_1 = arith.constant 0 : index
    %3 = vector.load %arg7[%c0, %c0_1] : memref<128x128xf32, #tpu.memory_space<vmem>>, vector<128x128xf32>
    %c0_2 = arith.constant 0 : index
    %c0_3 = arith.constant 0 : index
    %4 = vector.load %arg3[%c0_2, %c0_3] : memref<128x256xbf16, #tpu.memory_space<vmem>>, vector<128x256xbf16>
    %c0_4 = arith.constant 0 : index
    %c0_5 = arith.constant 0 : index
    %5 = vector.load %arg4[%c0_4, %c0_5] : memref<256x128xbf16, #tpu.memory_space<vmem>>, vector<256x128xbf16>
    %cst = arith.constant dense<0.000000e+00> : vector<128x128xf32>
    %6 = tpu.matmul %4, %5, %cst {dimension_numbers = #tpu.dot_dimension_numbers<[1], [0], [0], [1], [0, 0, 1, 1], [], []>} : vector<128x256xbf16>, vector<256x128xbf16>, vector<128x128xf32> -> vector<128x128xf32>
    %7 = arith.addf %3, %6 : vector<128x128xf32>
    %c0_6 = arith.constant 0 : index
    %c0_7 = arith.constant 0 : index
    %8 = vector.load %arg7[%c0_6, %c0_7] : memref<128x128xf32, #tpu.memory_space<vmem>>, vector<128x128xf32>
    tpu.vector_store %arg7[%c0_6, %c0_7], %7 {strides = array<i32>} : memref<128x128xf32, #tpu.memory_space<vmem>>, vector<128x128xf32>,
    %c48_i32 = arith.constant 48 : i32
    %9 = arith.cmpi eq, %arg2, %c48_i32 : i32
    %10 = arith.extui %9 : i1 to i32
    %c0_i32_8 = arith.constant 0 : i32
    %11 = arith.cmpi ne, %10, %c0_i32_8 : i32
    scf.if %11 {
      %c0_9 = arith.constant 0 : index
      %c0_10 = arith.constant 0 : index
      %12 = vector.load %arg7[%c0_9, %c0_10] : memref<128x128xf32, #tpu.memory_space<vmem>>, vector<128x128xf32>
      %c0_11 = arith.constant 0 : index
      %c0_12 = arith.constant 0 : index
      %13 = vector.load %arg5[%c0_11, %c0_12] : memref<1x128xf32, #tpu.memory_space<vmem>>, vector<1x128xf32>
      %14 = vector.broadcast %13 : vector<1x128xf32> to vector<128x128xf32>
      %15 = arith.addf %12, %14 : vector<128x128xf32>
      %cst_13 = arith.constant 0.000000e+00 : f32
      %16 = vector.broadcast %cst_13 : f32 to vector<128x128xf32>
      %17 = arith.maximumf %15, %16 : vector<128x128xf32>
      %18 = arith.truncf %17 : vector<128x128xf32> to vector<128x128xbf16>
      %c0_14 = arith.constant 0 : index
      %c0_15 = arith.constant 0 : index
      %19 = vector.load %arg6[%c0_14, %c0_15] : memref<128x128xbf16, #tpu.memory_space<vmem>>, vector<128x128xbf16>
      tpu.vector_store %arg6[%c0_14, %c0_15], %18 {strides = array<i32>} : memref<128x128xbf16, #tpu.memory_space<vmem>>, vector<128x128xbf16>,
    } else {
    }
    return
  }
  func.func @transform_0(%arg0: i32, %arg1: i32, %arg2: i32) -> (i32, i32) {
    %c0_i32 = arith.constant 0 : i32
    return %arg0, %arg2 : i32, i32
  }
  func.func @transform_1(%arg0: i32, %arg1: i32, %arg2: i32) -> (i32, i32) {
    %c0_i32 = arith.constant 0 : i32
    return %arg2, %arg1 : i32, i32
  }
  func.func @transform_2(%arg0: i32, %arg1: i32, %arg2: i32) -> (i32, i32) {
    %c0_i32 = arith.constant 0 : i32
    %c0_i32_0 = arith.constant 0 : i32
    return %c0_i32, %arg1 : i32, i32
  }
  func.func @transform_3(%arg0: i32, %arg1: i32, %arg2: i32) -> (i32, i32) {
    %c0_i32 = arith.constant 0 : i32
    return %arg0, %arg1 : i32, i32
  }
}

module attributes {stable_mosaic.version = 11 : i64} {
  func.func @_maxpool_kernel(%arg0: memref<2x5x5x128xbf16, #tpu.memory_space<vmem>>, %arg1: memref<2x5x5x128xbf16, #tpu.memory_space<vmem>>, %arg2: memref<2x5x5x128xbf16, #tpu.memory_space<vmem>>, %arg3: memref<2x5x5x128xbf16, #tpu.memory_space<vmem>>, %arg4: memref<2x4x4x128xbf16, #tpu.memory_space<vmem>>) attributes {dimension_semantics = [], scalar_prefetch = 0 : i64, scratch_operands = 0 : i64, tpu.core_type = #tpu.core_type<tc>} {
    %c0 = arith.constant 0 : index
    %c0_0 = arith.constant 0 : index
    %c0_1 = arith.constant 0 : index
    %c0_2 = arith.constant 0 : index
    %0 = vector.load %arg0[%c0, %c0_0, %c0_1, %c0_2] : memref<2x5x5x128xbf16, #tpu.memory_space<vmem>>, vector<2x4x4x128xbf16>
    %c0_3 = arith.constant 0 : index
    %c0_4 = arith.constant 0 : index
    %c1 = arith.constant 1 : index
    %c0_5 = arith.constant 0 : index
    %1 = vector.load %arg0[%c0_3, %c0_4, %c1, %c0_5] : memref<2x5x5x128xbf16, #tpu.memory_space<vmem>>, vector<2x4x4x128xbf16>
    %2 = arith.maximumf %0, %1 : vector<2x4x4x128xbf16>
    %c0_6 = arith.constant 0 : index
    %c1_7 = arith.constant 1 : index
    %c0_8 = arith.constant 0 : index
    %c0_9 = arith.constant 0 : index
    %3 = vector.load %arg0[%c0_6, %c1_7, %c0_8, %c0_9] : memref<2x5x5x128xbf16, #tpu.memory_space<vmem>>, vector<2x4x4x128xbf16>
    %4 = arith.maximumf %2, %3 : vector<2x4x4x128xbf16>
    %c0_10 = arith.constant 0 : index
    %c1_11 = arith.constant 1 : index
    %c1_12 = arith.constant 1 : index
    %c0_13 = arith.constant 0 : index
    %5 = vector.load %arg0[%c0_10, %c1_11, %c1_12, %c0_13] : memref<2x5x5x128xbf16, #tpu.memory_space<vmem>>, vector<2x4x4x128xbf16>
    %6 = arith.maximumf %4, %5 : vector<2x4x4x128xbf16>
    %c0_14 = arith.constant 0 : index
    %c0_15 = arith.constant 0 : index
    %c0_16 = arith.constant 0 : index
    %c0_17 = arith.constant 0 : index
    %7 = vector.load %arg1[%c0_14, %c0_15, %c0_16, %c0_17] : memref<2x5x5x128xbf16, #tpu.memory_space<vmem>>, vector<2x4x4x128xbf16>
    %8 = arith.maximumf %6, %7 : vector<2x4x4x128xbf16>
    %c0_18 = arith.constant 0 : index
    %c1_19 = arith.constant 1 : index
    %c0_20 = arith.constant 0 : index
    %c0_21 = arith.constant 0 : index
    %9 = vector.load %arg1[%c0_18, %c1_19, %c0_20, %c0_21] : memref<2x5x5x128xbf16, #tpu.memory_space<vmem>>, vector<2x4x4x128xbf16>
    %10 = arith.maximumf %8, %9 : vector<2x4x4x128xbf16>
    %c0_22 = arith.constant 0 : index
    %c0_23 = arith.constant 0 : index
    %c0_24 = arith.constant 0 : index
    %c0_25 = arith.constant 0 : index
    %11 = vector.load %arg2[%c0_22, %c0_23, %c0_24, %c0_25] : memref<2x5x5x128xbf16, #tpu.memory_space<vmem>>, vector<2x4x4x128xbf16>
    %12 = arith.maximumf %10, %11 : vector<2x4x4x128xbf16>
    %c0_26 = arith.constant 0 : index
    %c0_27 = arith.constant 0 : index
    %c1_28 = arith.constant 1 : index
    %c0_29 = arith.constant 0 : index
    %13 = vector.load %arg2[%c0_26, %c0_27, %c1_28, %c0_29] : memref<2x5x5x128xbf16, #tpu.memory_space<vmem>>, vector<2x4x4x128xbf16>
    %14 = arith.maximumf %12, %13 : vector<2x4x4x128xbf16>
    %c0_30 = arith.constant 0 : index
    %c0_31 = arith.constant 0 : index
    %c0_32 = arith.constant 0 : index
    %c0_33 = arith.constant 0 : index
    %15 = vector.load %arg3[%c0_30, %c0_31, %c0_32, %c0_33] : memref<2x5x5x128xbf16, #tpu.memory_space<vmem>>, vector<2x4x4x128xbf16>
    %16 = arith.maximumf %14, %15 : vector<2x4x4x128xbf16>
    %c0_34 = arith.constant 0 : index
    %c0_35 = arith.constant 0 : index
    %c0_36 = arith.constant 0 : index
    %c0_37 = arith.constant 0 : index
    %17 = vector.load %arg4[%c0_34, %c0_35, %c0_36, %c0_37] : memref<2x4x4x128xbf16, #tpu.memory_space<vmem>>, vector<2x4x4x128xbf16>
    tpu.vector_store %arg4[%c0_34, %c0_35, %c0_36, %c0_37], %16 {strides = array<i32>} : memref<2x4x4x128xbf16, #tpu.memory_space<vmem>>, vector<2x4x4x128xbf16>,
    return
  }
}

module attributes {stable_mosaic.version = 11 : i64} {
  func.func @_mm_kernel(%arg0: i32, %arg1: i32, %arg2: i32, %arg3: memref<32x128xbf16, #tpu.memory_space<vmem>>, %arg4: memref<128x128xbf16, #tpu.memory_space<vmem>>, %arg5: memref<1x128xf32, #tpu.memory_space<vmem>>, %arg6: memref<32x128xbf16, #tpu.memory_space<vmem>>, %arg7: memref<32x128xf32, #tpu.memory_space<vmem>>) attributes {dimension_semantics = [#tpu.dimension_semantics<parallel>, #tpu.dimension_semantics<parallel>, #tpu.dimension_semantics<arbitrary>], iteration_bounds = array<i64: 1, 1, 9>, scalar_prefetch = 0 : i64, scratch_operands = 1 : i64, tpu.core_type = #tpu.core_type<tc>, window_params = [{transform_indices = @transform_0, window_bounds = array<i64: 32, 128>}, {transform_indices = @transform_1, window_bounds = array<i64: 128, 128>}, {transform_indices = @transform_2, window_bounds = array<i64: 1, 128>}, {transform_indices = @transform_3, window_bounds = array<i64: 32, 128>}]} {
    %c0_i32 = arith.constant 0 : i32
    %0 = arith.cmpi eq, %arg2, %c0_i32 : i32
    %1 = arith.extui %0 : i1 to i32
    %c0_i32_0 = arith.constant 0 : i32
    %2 = arith.cmpi ne, %1, %c0_i32_0 : i32
    scf.if %2 {
      %cst_9 = arith.constant 0.000000e+00 : f32
      %12 = vector.broadcast %cst_9 : f32 to vector<32x128xf32>
      %c0_10 = arith.constant 0 : index
      %c0_11 = arith.constant 0 : index
      %13 = vector.load %arg7[%c0_10, %c0_11] : memref<32x128xf32, #tpu.memory_space<vmem>>, vector<32x128xf32>
      tpu.vector_store %arg7[%c0_10, %c0_11], %12 {strides = array<i32>} : memref<32x128xf32, #tpu.memory_space<vmem>>, vector<32x128xf32>,
    } else {
    }
    %c0 = arith.constant 0 : index
    %c0_1 = arith.constant 0 : index
    %3 = vector.load %arg7[%c0, %c0_1] : memref<32x128xf32, #tpu.memory_space<vmem>>, vector<32x128xf32>
    %c0_2 = arith.constant 0 : index
    %c0_3 = arith.constant 0 : index
    %4 = vector.load %arg3[%c0_2, %c0_3] : memref<32x128xbf16, #tpu.memory_space<vmem>>, vector<32x128xbf16>
    %c0_4 = arith.constant 0 : index
    %c0_5 = arith.constant 0 : index
    %5 = vector.load %arg4[%c0_4, %c0_5] : memref<128x128xbf16, #tpu.memory_space<vmem>>, vector<128x128xbf16>
    %cst = arith.constant dense<0.000000e+00> : vector<32x128xf32>
    %6 = tpu.matmul %4, %5, %cst {dimension_numbers = #tpu.dot_dimension_numbers<[1], [0], [0], [1], [0, 0, 1, 1], [], []>} : vector<32x128xbf16>, vector<128x128xbf16>, vector<32x128xf32> -> vector<32x128xf32>
    %7 = arith.addf %3, %6 : vector<32x128xf32>
    %c0_6 = arith.constant 0 : index
    %c0_7 = arith.constant 0 : index
    %8 = vector.load %arg7[%c0_6, %c0_7] : memref<32x128xf32, #tpu.memory_space<vmem>>, vector<32x128xf32>
    tpu.vector_store %arg7[%c0_6, %c0_7], %7 {strides = array<i32>} : memref<32x128xf32, #tpu.memory_space<vmem>>, vector<32x128xf32>,
    %c8_i32 = arith.constant 8 : i32
    %9 = arith.cmpi eq, %arg2, %c8_i32 : i32
    %10 = arith.extui %9 : i1 to i32
    %c0_i32_8 = arith.constant 0 : i32
    %11 = arith.cmpi ne, %10, %c0_i32_8 : i32
    scf.if %11 {
      %c0_9 = arith.constant 0 : index
      %c0_10 = arith.constant 0 : index
      %12 = vector.load %arg7[%c0_9, %c0_10] : memref<32x128xf32, #tpu.memory_space<vmem>>, vector<32x128xf32>
      %c0_11 = arith.constant 0 : index
      %c0_12 = arith.constant 0 : index
      %13 = vector.load %arg5[%c0_11, %c0_12] : memref<1x128xf32, #tpu.memory_space<vmem>>, vector<1x128xf32>
      %14 = vector.broadcast %13 : vector<1x128xf32> to vector<32x128xf32>
      %15 = arith.addf %12, %14 : vector<32x128xf32>
      %cst_13 = arith.constant 0.000000e+00 : f32
      %16 = vector.broadcast %cst_13 : f32 to vector<32x128xf32>
      %17 = arith.maximumf %15, %16 : vector<32x128xf32>
      %18 = arith.truncf %17 : vector<32x128xf32> to vector<32x128xbf16>
      %c0_14 = arith.constant 0 : index
      %c0_15 = arith.constant 0 : index
      %19 = vector.load %arg6[%c0_14, %c0_15] : memref<32x128xbf16, #tpu.memory_space<vmem>>, vector<32x128xbf16>
      tpu.vector_store %arg6[%c0_14, %c0_15], %18 {strides = array<i32>} : memref<32x128xbf16, #tpu.memory_space<vmem>>, vector<32x128xbf16>,
    } else {
    }
    return
  }
  func.func @transform_0(%arg0: i32, %arg1: i32, %arg2: i32) -> (i32, i32) {
    %c0_i32 = arith.constant 0 : i32
    return %arg0, %arg2 : i32, i32
  }
  func.func @transform_1(%arg0: i32, %arg1: i32, %arg2: i32) -> (i32, i32) {
    %c0_i32 = arith.constant 0 : i32
    return %arg2, %arg1 : i32, i32
  }
  func.func @transform_2(%arg0: i32, %arg1: i32, %arg2: i32) -> (i32, i32) {
    %c0_i32 = arith.constant 0 : i32
    %c0_i32_0 = arith.constant 0 : i32
    return %c0_i32, %arg1 : i32, i32
  }
  func.func @transform_3(%arg0: i32, %arg1: i32, %arg2: i32) -> (i32, i32) {
    %c0_i32 = arith.constant 0 : i32
    return %arg0, %arg1 : i32, i32
  }
}

module attributes {stable_mosaic.version = 11 : i64} {
  func.func @_mm_res_kernel(%arg0: i32, %arg1: i32, %arg2: i32, %arg3: memref<32x128xbf16, #tpu.memory_space<vmem>>, %arg4: memref<128x128xbf16, #tpu.memory_space<vmem>>, %arg5: memref<1x128xf32, #tpu.memory_space<vmem>>, %arg6: memref<32x128xbf16, #tpu.memory_space<vmem>>, %arg7: memref<32x128xbf16, #tpu.memory_space<vmem>>, %arg8: memref<32x128xf32, #tpu.memory_space<vmem>>) attributes {dimension_semantics = [#tpu.dimension_semantics<parallel>, #tpu.dimension_semantics<parallel>, #tpu.dimension_semantics<arbitrary>], iteration_bounds = array<i64: 1, 1, 9>, scalar_prefetch = 0 : i64, scratch_operands = 1 : i64, tpu.core_type = #tpu.core_type<tc>, window_params = [{transform_indices = @transform_0, window_bounds = array<i64: 32, 128>}, {transform_indices = @transform_1, window_bounds = array<i64: 128, 128>}, {transform_indices = @transform_2, window_bounds = array<i64: 1, 128>}, {transform_indices = @transform_3, window_bounds = array<i64: 32, 128>}, {transform_indices = @transform_4, window_bounds = array<i64: 32, 128>}]} {
    %c0_i32 = arith.constant 0 : i32
    %0 = arith.cmpi eq, %arg2, %c0_i32 : i32
    %1 = arith.extui %0 : i1 to i32
    %c0_i32_0 = arith.constant 0 : i32
    %2 = arith.cmpi ne, %1, %c0_i32_0 : i32
    scf.if %2 {
      %cst_9 = arith.constant 0.000000e+00 : f32
      %12 = vector.broadcast %cst_9 : f32 to vector<32x128xf32>
      %c0_10 = arith.constant 0 : index
      %c0_11 = arith.constant 0 : index
      %13 = vector.load %arg8[%c0_10, %c0_11] : memref<32x128xf32, #tpu.memory_space<vmem>>, vector<32x128xf32>
      tpu.vector_store %arg8[%c0_10, %c0_11], %12 {strides = array<i32>} : memref<32x128xf32, #tpu.memory_space<vmem>>, vector<32x128xf32>,
    } else {
    }
    %c0 = arith.constant 0 : index
    %c0_1 = arith.constant 0 : index
    %3 = vector.load %arg8[%c0, %c0_1] : memref<32x128xf32, #tpu.memory_space<vmem>>, vector<32x128xf32>
    %c0_2 = arith.constant 0 : index
    %c0_3 = arith.constant 0 : index
    %4 = vector.load %arg3[%c0_2, %c0_3] : memref<32x128xbf16, #tpu.memory_space<vmem>>, vector<32x128xbf16>
    %c0_4 = arith.constant 0 : index
    %c0_5 = arith.constant 0 : index
    %5 = vector.load %arg4[%c0_4, %c0_5] : memref<128x128xbf16, #tpu.memory_space<vmem>>, vector<128x128xbf16>
    %cst = arith.constant dense<0.000000e+00> : vector<32x128xf32>
    %6 = tpu.matmul %4, %5, %cst {dimension_numbers = #tpu.dot_dimension_numbers<[1], [0], [0], [1], [0, 0, 1, 1], [], []>} : vector<32x128xbf16>, vector<128x128xbf16>, vector<32x128xf32> -> vector<32x128xf32>
    %7 = arith.addf %3, %6 : vector<32x128xf32>
    %c0_6 = arith.constant 0 : index
    %c0_7 = arith.constant 0 : index
    %8 = vector.load %arg8[%c0_6, %c0_7] : memref<32x128xf32, #tpu.memory_space<vmem>>, vector<32x128xf32>
    tpu.vector_store %arg8[%c0_6, %c0_7], %7 {strides = array<i32>} : memref<32x128xf32, #tpu.memory_space<vmem>>, vector<32x128xf32>,
    %c8_i32 = arith.constant 8 : i32
    %9 = arith.cmpi eq, %arg2, %c8_i32 : i32
    %10 = arith.extui %9 : i1 to i32
    %c0_i32_8 = arith.constant 0 : i32
    %11 = arith.cmpi ne, %10, %c0_i32_8 : i32
    scf.if %11 {
      %c0_9 = arith.constant 0 : index
      %c0_10 = arith.constant 0 : index
      %12 = vector.load %arg8[%c0_9, %c0_10] : memref<32x128xf32, #tpu.memory_space<vmem>>, vector<32x128xf32>
      %c0_11 = arith.constant 0 : index
      %c0_12 = arith.constant 0 : index
      %13 = vector.load %arg5[%c0_11, %c0_12] : memref<1x128xf32, #tpu.memory_space<vmem>>, vector<1x128xf32>
      %14 = vector.broadcast %13 : vector<1x128xf32> to vector<32x128xf32>
      %15 = arith.addf %12, %14 : vector<32x128xf32>
      %c0_13 = arith.constant 0 : index
      %c0_14 = arith.constant 0 : index
      %16 = vector.load %arg6[%c0_13, %c0_14] : memref<32x128xbf16, #tpu.memory_space<vmem>>, vector<32x128xbf16>
      %17 = arith.extf %16 : vector<32x128xbf16> to vector<32x128xf32>
      %18 = arith.addf %15, %17 : vector<32x128xf32>
      %cst_15 = arith.constant 0.000000e+00 : f32
      %19 = vector.broadcast %cst_15 : f32 to vector<32x128xf32>
      %20 = arith.maximumf %18, %19 : vector<32x128xf32>
      %21 = arith.truncf %20 : vector<32x128xf32> to vector<32x128xbf16>
      %c0_16 = arith.constant 0 : index
      %c0_17 = arith.constant 0 : index
      %22 = vector.load %arg7[%c0_16, %c0_17] : memref<32x128xbf16, #tpu.memory_space<vmem>>, vector<32x128xbf16>
      tpu.vector_store %arg7[%c0_16, %c0_17], %21 {strides = array<i32>} : memref<32x128xbf16, #tpu.memory_space<vmem>>, vector<32x128xbf16>,
    } else {
    }
    return
  }
  func.func @transform_0(%arg0: i32, %arg1: i32, %arg2: i32) -> (i32, i32) {
    %c0_i32 = arith.constant 0 : i32
    return %arg0, %arg2 : i32, i32
  }
  func.func @transform_1(%arg0: i32, %arg1: i32, %arg2: i32) -> (i32, i32) {
    %c0_i32 = arith.constant 0 : i32
    return %arg2, %arg1 : i32, i32
  }
  func.func @transform_2(%arg0: i32, %arg1: i32, %arg2: i32) -> (i32, i32) {
    %c0_i32 = arith.constant 0 : i32
    %c0_i32_0 = arith.constant 0 : i32
    return %c0_i32, %arg1 : i32, i32
  }
  func.func @transform_3(%arg0: i32, %arg1: i32, %arg2: i32) -> (i32, i32) {
    %c0_i32 = arith.constant 0 : i32
    return %arg0, %arg1 : i32, i32
  }
  func.func @transform_4(%arg0: i32, %arg1: i32, %arg2: i32) -> (i32, i32) {
    %c0_i32 = arith.constant 0 : i32
    return %arg0, %arg1 : i32, i32
  }
}

module attributes {stable_mosaic.version = 11 : i64} {
  func.func @_mm_kernel(%arg0: i32, %arg1: i32, %arg2: i32, %arg3: memref<8x128xbf16, #tpu.memory_space<vmem>>, %arg4: memref<128x128xbf16, #tpu.memory_space<vmem>>, %arg5: memref<1x128xf32, #tpu.memory_space<vmem>>, %arg6: memref<8x128xbf16, #tpu.memory_space<vmem>>, %arg7: memref<8x128xf32, #tpu.memory_space<vmem>>) attributes {dimension_semantics = [#tpu.dimension_semantics<parallel>, #tpu.dimension_semantics<parallel>, #tpu.dimension_semantics<arbitrary>], iteration_bounds = array<i64: 1, 1, 9>, scalar_prefetch = 0 : i64, scratch_operands = 1 : i64, tpu.core_type = #tpu.core_type<tc>, window_params = [{transform_indices = @transform_0, window_bounds = array<i64: 8, 128>}, {transform_indices = @transform_1, window_bounds = array<i64: 128, 128>}, {transform_indices = @transform_2, window_bounds = array<i64: 1, 128>}, {transform_indices = @transform_3, window_bounds = array<i64: 8, 128>}]} {
    %c0_i32 = arith.constant 0 : i32
    %0 = arith.cmpi eq, %arg2, %c0_i32 : i32
    %1 = arith.extui %0 : i1 to i32
    %c0_i32_0 = arith.constant 0 : i32
    %2 = arith.cmpi ne, %1, %c0_i32_0 : i32
    scf.if %2 {
      %cst_9 = arith.constant 0.000000e+00 : f32
      %12 = vector.broadcast %cst_9 : f32 to vector<8x128xf32>
      %c0_10 = arith.constant 0 : index
      %c0_11 = arith.constant 0 : index
      %13 = vector.load %arg7[%c0_10, %c0_11] : memref<8x128xf32, #tpu.memory_space<vmem>>, vector<8x128xf32>
      tpu.vector_store %arg7[%c0_10, %c0_11], %12 {strides = array<i32>} : memref<8x128xf32, #tpu.memory_space<vmem>>, vector<8x128xf32>,
    } else {
    }
    %c0 = arith.constant 0 : index
    %c0_1 = arith.constant 0 : index
    %3 = vector.load %arg7[%c0, %c0_1] : memref<8x128xf32, #tpu.memory_space<vmem>>, vector<8x128xf32>
    %c0_2 = arith.constant 0 : index
    %c0_3 = arith.constant 0 : index
    %4 = vector.load %arg3[%c0_2, %c0_3] : memref<8x128xbf16, #tpu.memory_space<vmem>>, vector<8x128xbf16>
    %c0_4 = arith.constant 0 : index
    %c0_5 = arith.constant 0 : index
    %5 = vector.load %arg4[%c0_4, %c0_5] : memref<128x128xbf16, #tpu.memory_space<vmem>>, vector<128x128xbf16>
    %cst = arith.constant dense<0.000000e+00> : vector<8x128xf32>
    %6 = tpu.matmul %4, %5, %cst {dimension_numbers = #tpu.dot_dimension_numbers<[1], [0], [0], [1], [0, 0, 1, 1], [], []>} : vector<8x128xbf16>, vector<128x128xbf16>, vector<8x128xf32> -> vector<8x128xf32>
    %7 = arith.addf %3, %6 : vector<8x128xf32>
    %c0_6 = arith.constant 0 : index
    %c0_7 = arith.constant 0 : index
    %8 = vector.load %arg7[%c0_6, %c0_7] : memref<8x128xf32, #tpu.memory_space<vmem>>, vector<8x128xf32>
    tpu.vector_store %arg7[%c0_6, %c0_7], %7 {strides = array<i32>} : memref<8x128xf32, #tpu.memory_space<vmem>>, vector<8x128xf32>,
    %c8_i32 = arith.constant 8 : i32
    %9 = arith.cmpi eq, %arg2, %c8_i32 : i32
    %10 = arith.extui %9 : i1 to i32
    %c0_i32_8 = arith.constant 0 : i32
    %11 = arith.cmpi ne, %10, %c0_i32_8 : i32
    scf.if %11 {
      %c0_9 = arith.constant 0 : index
      %c0_10 = arith.constant 0 : index
      %12 = vector.load %arg7[%c0_9, %c0_10] : memref<8x128xf32, #tpu.memory_space<vmem>>, vector<8x128xf32>
      %c0_11 = arith.constant 0 : index
      %c0_12 = arith.constant 0 : index
      %13 = vector.load %arg5[%c0_11, %c0_12] : memref<1x128xf32, #tpu.memory_space<vmem>>, vector<1x128xf32>
      %14 = vector.broadcast %13 : vector<1x128xf32> to vector<8x128xf32>
      %15 = arith.addf %12, %14 : vector<8x128xf32>
      %cst_13 = arith.constant 0.000000e+00 : f32
      %16 = vector.broadcast %cst_13 : f32 to vector<8x128xf32>
      %17 = arith.maximumf %15, %16 : vector<8x128xf32>
      %18 = arith.truncf %17 : vector<8x128xf32> to vector<8x128xbf16>
      %c0_14 = arith.constant 0 : index
      %c0_15 = arith.constant 0 : index
      %19 = vector.load %arg6[%c0_14, %c0_15] : memref<8x128xbf16, #tpu.memory_space<vmem>>, vector<8x128xbf16>
      tpu.vector_store %arg6[%c0_14, %c0_15], %18 {strides = array<i32>} : memref<8x128xbf16, #tpu.memory_space<vmem>>, vector<8x128xbf16>,
    } else {
    }
    return
  }
  func.func @transform_0(%arg0: i32, %arg1: i32, %arg2: i32) -> (i32, i32) {
    %c0_i32 = arith.constant 0 : i32
    return %arg0, %arg2 : i32, i32
  }
  func.func @transform_1(%arg0: i32, %arg1: i32, %arg2: i32) -> (i32, i32) {
    %c0_i32 = arith.constant 0 : i32
    return %arg2, %arg1 : i32, i32
  }
  func.func @transform_2(%arg0: i32, %arg1: i32, %arg2: i32) -> (i32, i32) {
    %c0_i32 = arith.constant 0 : i32
    %c0_i32_0 = arith.constant 0 : i32
    return %c0_i32, %arg1 : i32, i32
  }
  func.func @transform_3(%arg0: i32, %arg1: i32, %arg2: i32) -> (i32, i32) {
    %c0_i32 = arith.constant 0 : i32
    return %arg0, %arg1 : i32, i32
  }
}

module attributes {stable_mosaic.version = 11 : i64} {
  func.func @_mm_res_kernel(%arg0: i32, %arg1: i32, %arg2: i32, %arg3: memref<8x128xbf16, #tpu.memory_space<vmem>>, %arg4: memref<128x128xbf16, #tpu.memory_space<vmem>>, %arg5: memref<1x128xf32, #tpu.memory_space<vmem>>, %arg6: memref<8x128xbf16, #tpu.memory_space<vmem>>, %arg7: memref<8x128xbf16, #tpu.memory_space<vmem>>, %arg8: memref<8x128xf32, #tpu.memory_space<vmem>>) attributes {dimension_semantics = [#tpu.dimension_semantics<parallel>, #tpu.dimension_semantics<parallel>, #tpu.dimension_semantics<arbitrary>], iteration_bounds = array<i64: 1, 1, 9>, scalar_prefetch = 0 : i64, scratch_operands = 1 : i64, tpu.core_type = #tpu.core_type<tc>, window_params = [{transform_indices = @transform_0, window_bounds = array<i64: 8, 128>}, {transform_indices = @transform_1, window_bounds = array<i64: 128, 128>}, {transform_indices = @transform_2, window_bounds = array<i64: 1, 128>}, {transform_indices = @transform_3, window_bounds = array<i64: 8, 128>}, {transform_indices = @transform_4, window_bounds = array<i64: 8, 128>}]} {
    %c0_i32 = arith.constant 0 : i32
    %0 = arith.cmpi eq, %arg2, %c0_i32 : i32
    %1 = arith.extui %0 : i1 to i32
    %c0_i32_0 = arith.constant 0 : i32
    %2 = arith.cmpi ne, %1, %c0_i32_0 : i32
    scf.if %2 {
      %cst_9 = arith.constant 0.000000e+00 : f32
      %12 = vector.broadcast %cst_9 : f32 to vector<8x128xf32>
      %c0_10 = arith.constant 0 : index
      %c0_11 = arith.constant 0 : index
      %13 = vector.load %arg8[%c0_10, %c0_11] : memref<8x128xf32, #tpu.memory_space<vmem>>, vector<8x128xf32>
      tpu.vector_store %arg8[%c0_10, %c0_11], %12 {strides = array<i32>} : memref<8x128xf32, #tpu.memory_space<vmem>>, vector<8x128xf32>,
    } else {
    }
    %c0 = arith.constant 0 : index
    %c0_1 = arith.constant 0 : index
    %3 = vector.load %arg8[%c0, %c0_1] : memref<8x128xf32, #tpu.memory_space<vmem>>, vector<8x128xf32>
    %c0_2 = arith.constant 0 : index
    %c0_3 = arith.constant 0 : index
    %4 = vector.load %arg3[%c0_2, %c0_3] : memref<8x128xbf16, #tpu.memory_space<vmem>>, vector<8x128xbf16>
    %c0_4 = arith.constant 0 : index
    %c0_5 = arith.constant 0 : index
    %5 = vector.load %arg4[%c0_4, %c0_5] : memref<128x128xbf16, #tpu.memory_space<vmem>>, vector<128x128xbf16>
    %cst = arith.constant dense<0.000000e+00> : vector<8x128xf32>
    %6 = tpu.matmul %4, %5, %cst {dimension_numbers = #tpu.dot_dimension_numbers<[1], [0], [0], [1], [0, 0, 1, 1], [], []>} : vector<8x128xbf16>, vector<128x128xbf16>, vector<8x128xf32> -> vector<8x128xf32>
    %7 = arith.addf %3, %6 : vector<8x128xf32>
    %c0_6 = arith.constant 0 : index
    %c0_7 = arith.constant 0 : index
    %8 = vector.load %arg8[%c0_6, %c0_7] : memref<8x128xf32, #tpu.memory_space<vmem>>, vector<8x128xf32>
    tpu.vector_store %arg8[%c0_6, %c0_7], %7 {strides = array<i32>} : memref<8x128xf32, #tpu.memory_space<vmem>>, vector<8x128xf32>,
    %c8_i32 = arith.constant 8 : i32
    %9 = arith.cmpi eq, %arg2, %c8_i32 : i32
    %10 = arith.extui %9 : i1 to i32
    %c0_i32_8 = arith.constant 0 : i32
    %11 = arith.cmpi ne, %10, %c0_i32_8 : i32
    scf.if %11 {
      %c0_9 = arith.constant 0 : index
      %c0_10 = arith.constant 0 : index
      %12 = vector.load %arg8[%c0_9, %c0_10] : memref<8x128xf32, #tpu.memory_space<vmem>>, vector<8x128xf32>
      %c0_11 = arith.constant 0 : index
      %c0_12 = arith.constant 0 : index
      %13 = vector.load %arg5[%c0_11, %c0_12] : memref<1x128xf32, #tpu.memory_space<vmem>>, vector<1x128xf32>
      %14 = vector.broadcast %13 : vector<1x128xf32> to vector<8x128xf32>
      %15 = arith.addf %12, %14 : vector<8x128xf32>
      %c0_13 = arith.constant 0 : index
      %c0_14 = arith.constant 0 : index
      %16 = vector.load %arg6[%c0_13, %c0_14] : memref<8x128xbf16, #tpu.memory_space<vmem>>, vector<8x128xbf16>
      %17 = arith.extf %16 : vector<8x128xbf16> to vector<8x128xf32>
      %18 = arith.addf %15, %17 : vector<8x128xf32>
      %cst_15 = arith.constant 0.000000e+00 : f32
      %19 = vector.broadcast %cst_15 : f32 to vector<8x128xf32>
      %20 = arith.maximumf %18, %19 : vector<8x128xf32>
      %21 = arith.truncf %20 : vector<8x128xf32> to vector<8x128xbf16>
      %c0_16 = arith.constant 0 : index
      %c0_17 = arith.constant 0 : index
      %22 = vector.load %arg7[%c0_16, %c0_17] : memref<8x128xbf16, #tpu.memory_space<vmem>>, vector<8x128xbf16>
      tpu.vector_store %arg7[%c0_16, %c0_17], %21 {strides = array<i32>} : memref<8x128xbf16, #tpu.memory_space<vmem>>, vector<8x128xbf16>,
    } else {
    }
    return
  }
  func.func @transform_0(%arg0: i32, %arg1: i32, %arg2: i32) -> (i32, i32) {
    %c0_i32 = arith.constant 0 : i32
    return %arg0, %arg2 : i32, i32
  }
  func.func @transform_1(%arg0: i32, %arg1: i32, %arg2: i32) -> (i32, i32) {
    %c0_i32 = arith.constant 0 : i32
    return %arg2, %arg1 : i32, i32
  }
  func.func @transform_2(%arg0: i32, %arg1: i32, %arg2: i32) -> (i32, i32) {
    %c0_i32 = arith.constant 0 : i32
    %c0_i32_0 = arith.constant 0 : i32
    return %c0_i32, %arg1 : i32, i32
  }
  func.func @transform_3(%arg0: i32, %arg1: i32, %arg2: i32) -> (i32, i32) {
    %c0_i32 = arith.constant 0 : i32
    return %arg0, %arg1 : i32, i32
  }
  func.func @transform_4(%arg0: i32, %arg1: i32, %arg2: i32) -> (i32, i32) {
    %c0_i32 = arith.constant 0 : i32
    return %arg0, %arg1 : i32, i32
  }
}

module attributes {stable_mosaic.version = 11 : i64} {
  func.func @_mm_kernel(%arg0: i32, %arg1: i32, %arg2: i32, %arg3: memref<8x128xbf16, #tpu.memory_space<vmem>>, %arg4: memref<128x128xbf16, #tpu.memory_space<vmem>>, %arg5: memref<1x128xf32, #tpu.memory_space<vmem>>, %arg6: memref<8x128xbf16, #tpu.memory_space<vmem>>, %arg7: memref<8x128xf32, #tpu.memory_space<vmem>>) attributes {dimension_semantics = [#tpu.dimension_semantics<parallel>, #tpu.dimension_semantics<parallel>, #tpu.dimension_semantics<arbitrary>], iteration_bounds = array<i64: 1, 1, 1>, scalar_prefetch = 0 : i64, scratch_operands = 1 : i64, tpu.core_type = #tpu.core_type<tc>, window_params = [{transform_indices = @transform_0, window_bounds = array<i64: 8, 128>}, {transform_indices = @transform_1, window_bounds = array<i64: 128, 128>}, {transform_indices = @transform_2, window_bounds = array<i64: 1, 128>}, {transform_indices = @transform_3, window_bounds = array<i64: 8, 128>}]} {
    %c0_i32 = arith.constant 0 : i32
    %0 = arith.cmpi eq, %arg2, %c0_i32 : i32
    %1 = arith.extui %0 : i1 to i32
    %c0_i32_0 = arith.constant 0 : i32
    %2 = arith.cmpi ne, %1, %c0_i32_0 : i32
    scf.if %2 {
      %cst_10 = arith.constant 0.000000e+00 : f32
      %12 = vector.broadcast %cst_10 : f32 to vector<8x128xf32>
      %c0_11 = arith.constant 0 : index
      %c0_12 = arith.constant 0 : index
      %13 = vector.load %arg7[%c0_11, %c0_12] : memref<8x128xf32, #tpu.memory_space<vmem>>, vector<8x128xf32>
      tpu.vector_store %arg7[%c0_11, %c0_12], %12 {strides = array<i32>} : memref<8x128xf32, #tpu.memory_space<vmem>>, vector<8x128xf32>,
    } else {
    }
    %c0 = arith.constant 0 : index
    %c0_1 = arith.constant 0 : index
    %3 = vector.load %arg7[%c0, %c0_1] : memref<8x128xf32, #tpu.memory_space<vmem>>, vector<8x128xf32>
    %c0_2 = arith.constant 0 : index
    %c0_3 = arith.constant 0 : index
    %4 = vector.load %arg3[%c0_2, %c0_3] : memref<8x128xbf16, #tpu.memory_space<vmem>>, vector<8x128xbf16>
    %c0_4 = arith.constant 0 : index
    %c0_5 = arith.constant 0 : index
    %5 = vector.load %arg4[%c0_4, %c0_5] : memref<128x128xbf16, #tpu.memory_space<vmem>>, vector<128x128xbf16>
    %cst = arith.constant dense<0.000000e+00> : vector<8x128xf32>
    %6 = tpu.matmul %4, %5, %cst {dimension_numbers = #tpu.dot_dimension_numbers<[1], [0], [0], [1], [0, 0, 1, 1], [], []>} : vector<8x128xbf16>, vector<128x128xbf16>, vector<8x128xf32> -> vector<8x128xf32>
    %7 = arith.addf %3, %6 : vector<8x128xf32>
    %c0_6 = arith.constant 0 : index
    %c0_7 = arith.constant 0 : index
    %8 = vector.load %arg7[%c0_6, %c0_7] : memref<8x128xf32, #tpu.memory_space<vmem>>, vector<8x128xf32>
    tpu.vector_store %arg7[%c0_6, %c0_7], %7 {strides = array<i32>} : memref<8x128xf32, #tpu.memory_space<vmem>>, vector<8x128xf32>,
    %c0_i32_8 = arith.constant 0 : i32
    %9 = arith.cmpi eq, %arg2, %c0_i32_8 : i32
    %10 = arith.extui %9 : i1 to i32
    %c0_i32_9 = arith.constant 0 : i32
    %11 = arith.cmpi ne, %10, %c0_i32_9 : i32
    scf.if %11 {
      %c0_10 = arith.constant 0 : index
      %c0_11 = arith.constant 0 : index
      %12 = vector.load %arg7[%c0_10, %c0_11] : memref<8x128xf32, #tpu.memory_space<vmem>>, vector<8x128xf32>
      %c0_12 = arith.constant 0 : index
      %c0_13 = arith.constant 0 : index
      %13 = vector.load %arg5[%c0_12, %c0_13] : memref<1x128xf32, #tpu.memory_space<vmem>>, vector<1x128xf32>
      %14 = vector.broadcast %13 : vector<1x128xf32> to vector<8x128xf32>
      %15 = arith.addf %12, %14 : vector<8x128xf32>
      %16 = arith.truncf %15 : vector<8x128xf32> to vector<8x128xbf16>
      %c0_14 = arith.constant 0 : index
      %c0_15 = arith.constant 0 : index
      %17 = vector.load %arg6[%c0_14, %c0_15] : memref<8x128xbf16, #tpu.memory_space<vmem>>, vector<8x128xbf16>
      tpu.vector_store %arg6[%c0_14, %c0_15], %16 {strides = array<i32>} : memref<8x128xbf16, #tpu.memory_space<vmem>>, vector<8x128xbf16>,
    } else {
    }
    return
  }
  func.func @transform_0(%arg0: i32, %arg1: i32, %arg2: i32) -> (i32, i32) {
    %c0_i32 = arith.constant 0 : i32
    return %arg0, %arg2 : i32, i32
  }
  func.func @transform_1(%arg0: i32, %arg1: i32, %arg2: i32) -> (i32, i32) {
    %c0_i32 = arith.constant 0 : i32
    return %arg2, %arg1 : i32, i32
  }
  func.func @transform_2(%arg0: i32, %arg1: i32, %arg2: i32) -> (i32, i32) {
    %c0_i32 = arith.constant 0 : i32
    %c0_i32_0 = arith.constant 0 : i32
    return %c0_i32, %arg1 : i32, i32
  }
  func.func @transform_3(%arg0: i32, %arg1: i32, %arg2: i32) -> (i32, i32) {
    %c0_i32 = arith.constant 0 : i32
    return %arg0, %arg1 : i32, i32
  }
}

module attributes {stable_mosaic.version = 11 : i64} {
  func.func @_mm_kernel(%arg0: i32, %arg1: i32, %arg2: i32, %arg3: memref<2x128xbf16, #tpu.memory_space<vmem>>, %arg4: memref<128x256xbf16, #tpu.memory_space<vmem>>, %arg5: memref<1x256xf32, #tpu.memory_space<vmem>>, %arg6: memref<2x256xbf16, #tpu.memory_space<vmem>>, %arg7: memref<2x256xf32, #tpu.memory_space<vmem>>) attributes {dimension_semantics = [#tpu.dimension_semantics<parallel>, #tpu.dimension_semantics<parallel>, #tpu.dimension_semantics<arbitrary>], iteration_bounds = array<i64: 1, 1, 9>, scalar_prefetch = 0 : i64, scratch_operands = 1 : i64, tpu.core_type = #tpu.core_type<tc>, window_params = [{transform_indices = @transform_0, window_bounds = array<i64: 2, 128>}, {transform_indices = @transform_1, window_bounds = array<i64: 128, 256>}, {transform_indices = @transform_2, window_bounds = array<i64: 1, 256>}, {transform_indices = @transform_3, window_bounds = array<i64: 2, 256>}]} {
    %c0_i32 = arith.constant 0 : i32
    %0 = arith.cmpi eq, %arg2, %c0_i32 : i32
    %1 = arith.extui %0 : i1 to i32
    %c0_i32_0 = arith.constant 0 : i32
    %2 = arith.cmpi ne, %1, %c0_i32_0 : i32
    scf.if %2 {
      %cst_9 = arith.constant 0.000000e+00 : f32
      %12 = vector.broadcast %cst_9 : f32 to vector<2x256xf32>
      %c0_10 = arith.constant 0 : index
      %c0_11 = arith.constant 0 : index
      %13 = vector.load %arg7[%c0_10, %c0_11] : memref<2x256xf32, #tpu.memory_space<vmem>>, vector<2x256xf32>
      tpu.vector_store %arg7[%c0_10, %c0_11], %12 {strides = array<i32>} : memref<2x256xf32, #tpu.memory_space<vmem>>, vector<2x256xf32>,
    } else {
    }
    %c0 = arith.constant 0 : index
    %c0_1 = arith.constant 0 : index
    %3 = vector.load %arg7[%c0, %c0_1] : memref<2x256xf32, #tpu.memory_space<vmem>>, vector<2x256xf32>
    %c0_2 = arith.constant 0 : index
    %c0_3 = arith.constant 0 : index
    %4 = vector.load %arg3[%c0_2, %c0_3] : memref<2x128xbf16, #tpu.memory_space<vmem>>, vector<2x128xbf16>
    %c0_4 = arith.constant 0 : index
    %c0_5 = arith.constant 0 : index
    %5 = vector.load %arg4[%c0_4, %c0_5] : memref<128x256xbf16, #tpu.memory_space<vmem>>, vector<128x256xbf16>
    %cst = arith.constant dense<0.000000e+00> : vector<2x256xf32>
    %6 = tpu.matmul %4, %5, %cst {dimension_numbers = #tpu.dot_dimension_numbers<[1], [0], [0], [1], [0, 0, 1, 1], [], []>} : vector<2x128xbf16>, vector<128x256xbf16>, vector<2x256xf32> -> vector<2x256xf32>
    %7 = arith.addf %3, %6 : vector<2x256xf32>
    %c0_6 = arith.constant 0 : index
    %c0_7 = arith.constant 0 : index
    %8 = vector.load %arg7[%c0_6, %c0_7] : memref<2x256xf32, #tpu.memory_space<vmem>>, vector<2x256xf32>
    tpu.vector_store %arg7[%c0_6, %c0_7], %7 {strides = array<i32>} : memref<2x256xf32, #tpu.memory_space<vmem>>, vector<2x256xf32>,
    %c8_i32 = arith.constant 8 : i32
    %9 = arith.cmpi eq, %arg2, %c8_i32 : i32
    %10 = arith.extui %9 : i1 to i32
    %c0_i32_8 = arith.constant 0 : i32
    %11 = arith.cmpi ne, %10, %c0_i32_8 : i32
    scf.if %11 {
      %c0_9 = arith.constant 0 : index
      %c0_10 = arith.constant 0 : index
      %12 = vector.load %arg7[%c0_9, %c0_10] : memref<2x256xf32, #tpu.memory_space<vmem>>, vector<2x256xf32>
      %c0_11 = arith.constant 0 : index
      %c0_12 = arith.constant 0 : index
      %13 = vector.load %arg5[%c0_11, %c0_12] : memref<1x256xf32, #tpu.memory_space<vmem>>, vector<1x256xf32>
      %14 = vector.broadcast %13 : vector<1x256xf32> to vector<2x256xf32>
      %15 = arith.addf %12, %14 : vector<2x256xf32>
      %cst_13 = arith.constant 0.000000e+00 : f32
      %16 = vector.broadcast %cst_13 : f32 to vector<2x256xf32>
      %17 = arith.maximumf %15, %16 : vector<2x256xf32>
      %18 = arith.truncf %17 : vector<2x256xf32> to vector<2x256xbf16>
      %c0_14 = arith.constant 0 : index
      %c0_15 = arith.constant 0 : index
      %19 = vector.load %arg6[%c0_14, %c0_15] : memref<2x256xbf16, #tpu.memory_space<vmem>>, vector<2x256xbf16>
      tpu.vector_store %arg6[%c0_14, %c0_15], %18 {strides = array<i32>} : memref<2x256xbf16, #tpu.memory_space<vmem>>, vector<2x256xbf16>,
    } else {
    }
    return
  }
  func.func @transform_0(%arg0: i32, %arg1: i32, %arg2: i32) -> (i32, i32) {
    %c0_i32 = arith.constant 0 : i32
    return %arg0, %arg2 : i32, i32
  }
  func.func @transform_1(%arg0: i32, %arg1: i32, %arg2: i32) -> (i32, i32) {
    %c0_i32 = arith.constant 0 : i32
    return %arg2, %arg1 : i32, i32
  }
  func.func @transform_2(%arg0: i32, %arg1: i32, %arg2: i32) -> (i32, i32) {
    %c0_i32 = arith.constant 0 : i32
    %c0_i32_0 = arith.constant 0 : i32
    return %c0_i32, %arg1 : i32, i32
  }
  func.func @transform_3(%arg0: i32, %arg1: i32, %arg2: i32) -> (i32, i32) {
    %c0_i32 = arith.constant 0 : i32
    return %arg0, %arg1 : i32, i32
  }
}

module attributes {stable_mosaic.version = 11 : i64} {
  func.func @_mm_res_kernel(%arg0: i32, %arg1: i32, %arg2: i32, %arg3: memref<2x256xbf16, #tpu.memory_space<vmem>>, %arg4: memref<256x256xbf16, #tpu.memory_space<vmem>>, %arg5: memref<1x256xf32, #tpu.memory_space<vmem>>, %arg6: memref<2x256xbf16, #tpu.memory_space<vmem>>, %arg7: memref<2x256xbf16, #tpu.memory_space<vmem>>, %arg8: memref<2x256xf32, #tpu.memory_space<vmem>>) attributes {dimension_semantics = [#tpu.dimension_semantics<parallel>, #tpu.dimension_semantics<parallel>, #tpu.dimension_semantics<arbitrary>], iteration_bounds = array<i64: 1, 1, 9>, scalar_prefetch = 0 : i64, scratch_operands = 1 : i64, tpu.core_type = #tpu.core_type<tc>, window_params = [{transform_indices = @transform_0, window_bounds = array<i64: 2, 256>}, {transform_indices = @transform_1, window_bounds = array<i64: 256, 256>}, {transform_indices = @transform_2, window_bounds = array<i64: 1, 256>}, {transform_indices = @transform_3, window_bounds = array<i64: 2, 256>}, {transform_indices = @transform_4, window_bounds = array<i64: 2, 256>}]} {
    %c0_i32 = arith.constant 0 : i32
    %0 = arith.cmpi eq, %arg2, %c0_i32 : i32
    %1 = arith.extui %0 : i1 to i32
    %c0_i32_0 = arith.constant 0 : i32
    %2 = arith.cmpi ne, %1, %c0_i32_0 : i32
    scf.if %2 {
      %cst_9 = arith.constant 0.000000e+00 : f32
      %12 = vector.broadcast %cst_9 : f32 to vector<2x256xf32>
      %c0_10 = arith.constant 0 : index
      %c0_11 = arith.constant 0 : index
      %13 = vector.load %arg8[%c0_10, %c0_11] : memref<2x256xf32, #tpu.memory_space<vmem>>, vector<2x256xf32>
      tpu.vector_store %arg8[%c0_10, %c0_11], %12 {strides = array<i32>} : memref<2x256xf32, #tpu.memory_space<vmem>>, vector<2x256xf32>,
    } else {
    }
    %c0 = arith.constant 0 : index
    %c0_1 = arith.constant 0 : index
    %3 = vector.load %arg8[%c0, %c0_1] : memref<2x256xf32, #tpu.memory_space<vmem>>, vector<2x256xf32>
    %c0_2 = arith.constant 0 : index
    %c0_3 = arith.constant 0 : index
    %4 = vector.load %arg3[%c0_2, %c0_3] : memref<2x256xbf16, #tpu.memory_space<vmem>>, vector<2x256xbf16>
    %c0_4 = arith.constant 0 : index
    %c0_5 = arith.constant 0 : index
    %5 = vector.load %arg4[%c0_4, %c0_5] : memref<256x256xbf16, #tpu.memory_space<vmem>>, vector<256x256xbf16>
    %cst = arith.constant dense<0.000000e+00> : vector<2x256xf32>
    %6 = tpu.matmul %4, %5, %cst {dimension_numbers = #tpu.dot_dimension_numbers<[1], [0], [0], [1], [0, 0, 1, 1], [], []>} : vector<2x256xbf16>, vector<256x256xbf16>, vector<2x256xf32> -> vector<2x256xf32>
    %7 = arith.addf %3, %6 : vector<2x256xf32>
    %c0_6 = arith.constant 0 : index
    %c0_7 = arith.constant 0 : index
    %8 = vector.load %arg8[%c0_6, %c0_7] : memref<2x256xf32, #tpu.memory_space<vmem>>, vector<2x256xf32>
    tpu.vector_store %arg8[%c0_6, %c0_7], %7 {strides = array<i32>} : memref<2x256xf32, #tpu.memory_space<vmem>>, vector<2x256xf32>,
    %c8_i32 = arith.constant 8 : i32
    %9 = arith.cmpi eq, %arg2, %c8_i32 : i32
    %10 = arith.extui %9 : i1 to i32
    %c0_i32_8 = arith.constant 0 : i32
    %11 = arith.cmpi ne, %10, %c0_i32_8 : i32
    scf.if %11 {
      %c0_9 = arith.constant 0 : index
      %c0_10 = arith.constant 0 : index
      %12 = vector.load %arg8[%c0_9, %c0_10] : memref<2x256xf32, #tpu.memory_space<vmem>>, vector<2x256xf32>
      %c0_11 = arith.constant 0 : index
      %c0_12 = arith.constant 0 : index
      %13 = vector.load %arg5[%c0_11, %c0_12] : memref<1x256xf32, #tpu.memory_space<vmem>>, vector<1x256xf32>
      %14 = vector.broadcast %13 : vector<1x256xf32> to vector<2x256xf32>
      %15 = arith.addf %12, %14 : vector<2x256xf32>
      %c0_13 = arith.constant 0 : index
      %c0_14 = arith.constant 0 : index
      %16 = vector.load %arg6[%c0_13, %c0_14] : memref<2x256xbf16, #tpu.memory_space<vmem>>, vector<2x256xbf16>
      %17 = arith.extf %16 : vector<2x256xbf16> to vector<2x256xf32>
      %18 = arith.addf %15, %17 : vector<2x256xf32>
      %cst_15 = arith.constant 0.000000e+00 : f32
      %19 = vector.broadcast %cst_15 : f32 to vector<2x256xf32>
      %20 = arith.maximumf %18, %19 : vector<2x256xf32>
      %21 = arith.truncf %20 : vector<2x256xf32> to vector<2x256xbf16>
      %c0_16 = arith.constant 0 : index
      %c0_17 = arith.constant 0 : index
      %22 = vector.load %arg7[%c0_16, %c0_17] : memref<2x256xbf16, #tpu.memory_space<vmem>>, vector<2x256xbf16>
      tpu.vector_store %arg7[%c0_16, %c0_17], %21 {strides = array<i32>} : memref<2x256xbf16, #tpu.memory_space<vmem>>, vector<2x256xbf16>,
    } else {
    }
    return
  }
  func.func @transform_0(%arg0: i32, %arg1: i32, %arg2: i32) -> (i32, i32) {
    %c0_i32 = arith.constant 0 : i32
    return %arg0, %arg2 : i32, i32
  }
  func.func @transform_1(%arg0: i32, %arg1: i32, %arg2: i32) -> (i32, i32) {
    %c0_i32 = arith.constant 0 : i32
    return %arg2, %arg1 : i32, i32
  }
  func.func @transform_2(%arg0: i32, %arg1: i32, %arg2: i32) -> (i32, i32) {
    %c0_i32 = arith.constant 0 : i32
    %c0_i32_0 = arith.constant 0 : i32
    return %c0_i32, %arg1 : i32, i32
  }
  func.func @transform_3(%arg0: i32, %arg1: i32, %arg2: i32) -> (i32, i32) {
    %c0_i32 = arith.constant 0 : i32
    return %arg0, %arg1 : i32, i32
  }
  func.func @transform_4(%arg0: i32, %arg1: i32, %arg2: i32) -> (i32, i32) {
    %c0_i32 = arith.constant 0 : i32
    return %arg0, %arg1 : i32, i32
  }
}

module attributes {stable_mosaic.version = 11 : i64} {
  func.func @_mm_kernel(%arg0: i32, %arg1: i32, %arg2: i32, %arg3: memref<2x128xbf16, #tpu.memory_space<vmem>>, %arg4: memref<128x256xbf16, #tpu.memory_space<vmem>>, %arg5: memref<1x256xf32, #tpu.memory_space<vmem>>, %arg6: memref<2x256xbf16, #tpu.memory_space<vmem>>, %arg7: memref<2x256xf32, #tpu.memory_space<vmem>>) attributes {dimension_semantics = [#tpu.dimension_semantics<parallel>, #tpu.dimension_semantics<parallel>, #tpu.dimension_semantics<arbitrary>], iteration_bounds = array<i64: 1, 1, 1>, scalar_prefetch = 0 : i64, scratch_operands = 1 : i64, tpu.core_type = #tpu.core_type<tc>, window_params = [{transform_indices = @transform_0, window_bounds = array<i64: 2, 128>}, {transform_indices = @transform_1, window_bounds = array<i64: 128, 256>}, {transform_indices = @transform_2, window_bounds = array<i64: 1, 256>}, {transform_indices = @transform_3, window_bounds = array<i64: 2, 256>}]} {
    %c0_i32 = arith.constant 0 : i32
    %0 = arith.cmpi eq, %arg2, %c0_i32 : i32
    %1 = arith.extui %0 : i1 to i32
    %c0_i32_0 = arith.constant 0 : i32
    %2 = arith.cmpi ne, %1, %c0_i32_0 : i32
    scf.if %2 {
      %cst_10 = arith.constant 0.000000e+00 : f32
      %12 = vector.broadcast %cst_10 : f32 to vector<2x256xf32>
      %c0_11 = arith.constant 0 : index
      %c0_12 = arith.constant 0 : index
      %13 = vector.load %arg7[%c0_11, %c0_12] : memref<2x256xf32, #tpu.memory_space<vmem>>, vector<2x256xf32>
      tpu.vector_store %arg7[%c0_11, %c0_12], %12 {strides = array<i32>} : memref<2x256xf32, #tpu.memory_space<vmem>>, vector<2x256xf32>,
    } else {
    }
    %c0 = arith.constant 0 : index
    %c0_1 = arith.constant 0 : index
    %3 = vector.load %arg7[%c0, %c0_1] : memref<2x256xf32, #tpu.memory_space<vmem>>, vector<2x256xf32>
    %c0_2 = arith.constant 0 : index
    %c0_3 = arith.constant 0 : index
    %4 = vector.load %arg3[%c0_2, %c0_3] : memref<2x128xbf16, #tpu.memory_space<vmem>>, vector<2x128xbf16>
    %c0_4 = arith.constant 0 : index
    %c0_5 = arith.constant 0 : index
    %5 = vector.load %arg4[%c0_4, %c0_5] : memref<128x256xbf16, #tpu.memory_space<vmem>>, vector<128x256xbf16>
    %cst = arith.constant dense<0.000000e+00> : vector<2x256xf32>
    %6 = tpu.matmul %4, %5, %cst {dimension_numbers = #tpu.dot_dimension_numbers<[1], [0], [0], [1], [0, 0, 1, 1], [], []>} : vector<2x128xbf16>, vector<128x256xbf16>, vector<2x256xf32> -> vector<2x256xf32>
    %7 = arith.addf %3, %6 : vector<2x256xf32>
    %c0_6 = arith.constant 0 : index
    %c0_7 = arith.constant 0 : index
    %8 = vector.load %arg7[%c0_6, %c0_7] : memref<2x256xf32, #tpu.memory_space<vmem>>, vector<2x256xf32>
    tpu.vector_store %arg7[%c0_6, %c0_7], %7 {strides = array<i32>} : memref<2x256xf32, #tpu.memory_space<vmem>>, vector<2x256xf32>,
    %c0_i32_8 = arith.constant 0 : i32
    %9 = arith.cmpi eq, %arg2, %c0_i32_8 : i32
    %10 = arith.extui %9 : i1 to i32
    %c0_i32_9 = arith.constant 0 : i32
    %11 = arith.cmpi ne, %10, %c0_i32_9 : i32
    scf.if %11 {
      %c0_10 = arith.constant 0 : index
      %c0_11 = arith.constant 0 : index
      %12 = vector.load %arg7[%c0_10, %c0_11] : memref<2x256xf32, #tpu.memory_space<vmem>>, vector<2x256xf32>
      %c0_12 = arith.constant 0 : index
      %c0_13 = arith.constant 0 : index
      %13 = vector.load %arg5[%c0_12, %c0_13] : memref<1x256xf32, #tpu.memory_space<vmem>>, vector<1x256xf32>
      %14 = vector.broadcast %13 : vector<1x256xf32> to vector<2x256xf32>
      %15 = arith.addf %12, %14 : vector<2x256xf32>
      %16 = arith.truncf %15 : vector<2x256xf32> to vector<2x256xbf16>
      %c0_14 = arith.constant 0 : index
      %c0_15 = arith.constant 0 : index
      %17 = vector.load %arg6[%c0_14, %c0_15] : memref<2x256xbf16, #tpu.memory_space<vmem>>, vector<2x256xbf16>
      tpu.vector_store %arg6[%c0_14, %c0_15], %16 {strides = array<i32>} : memref<2x256xbf16, #tpu.memory_space<vmem>>, vector<2x256xbf16>,
    } else {
    }
    return
  }
  func.func @transform_0(%arg0: i32, %arg1: i32, %arg2: i32) -> (i32, i32) {
    %c0_i32 = arith.constant 0 : i32
    return %arg0, %arg2 : i32, i32
  }
  func.func @transform_1(%arg0: i32, %arg1: i32, %arg2: i32) -> (i32, i32) {
    %c0_i32 = arith.constant 0 : i32
    return %arg2, %arg1 : i32, i32
  }
  func.func @transform_2(%arg0: i32, %arg1: i32, %arg2: i32) -> (i32, i32) {
    %c0_i32 = arith.constant 0 : i32
    %c0_i32_0 = arith.constant 0 : i32
    return %c0_i32, %arg1 : i32, i32
  }
  func.func @transform_3(%arg0: i32, %arg1: i32, %arg2: i32) -> (i32, i32) {
    %c0_i32 = arith.constant 0 : i32
    return %arg0, %arg1 : i32, i32
  }
}

module attributes {stable_mosaic.version = 11 : i64} {
  func.func @_mm_kernel(%arg0: i32, %arg1: i32, %arg2: i32, %arg3: memref<2x256xbf16, #tpu.memory_space<vmem>>, %arg4: memref<256x256xbf16, #tpu.memory_space<vmem>>, %arg5: memref<1x256xf32, #tpu.memory_space<vmem>>, %arg6: memref<2x256xbf16, #tpu.memory_space<vmem>>, %arg7: memref<2x256xf32, #tpu.memory_space<vmem>>) attributes {dimension_semantics = [#tpu.dimension_semantics<parallel>, #tpu.dimension_semantics<parallel>, #tpu.dimension_semantics<arbitrary>], iteration_bounds = array<i64: 1, 2, 9>, scalar_prefetch = 0 : i64, scratch_operands = 1 : i64, tpu.core_type = #tpu.core_type<tc>, window_params = [{transform_indices = @transform_0, window_bounds = array<i64: 2, 256>}, {transform_indices = @transform_1, window_bounds = array<i64: 256, 256>}, {transform_indices = @transform_2, window_bounds = array<i64: 1, 256>}, {transform_indices = @transform_3, window_bounds = array<i64: 2, 256>}]} {
    %c0_i32 = arith.constant 0 : i32
    %0 = arith.cmpi eq, %arg2, %c0_i32 : i32
    %1 = arith.extui %0 : i1 to i32
    %c0_i32_0 = arith.constant 0 : i32
    %2 = arith.cmpi ne, %1, %c0_i32_0 : i32
    scf.if %2 {
      %cst_9 = arith.constant 0.000000e+00 : f32
      %12 = vector.broadcast %cst_9 : f32 to vector<2x256xf32>
      %c0_10 = arith.constant 0 : index
      %c0_11 = arith.constant 0 : index
      %13 = vector.load %arg7[%c0_10, %c0_11] : memref<2x256xf32, #tpu.memory_space<vmem>>, vector<2x256xf32>
      tpu.vector_store %arg7[%c0_10, %c0_11], %12 {strides = array<i32>} : memref<2x256xf32, #tpu.memory_space<vmem>>, vector<2x256xf32>,
    } else {
    }
    %c0 = arith.constant 0 : index
    %c0_1 = arith.constant 0 : index
    %3 = vector.load %arg7[%c0, %c0_1] : memref<2x256xf32, #tpu.memory_space<vmem>>, vector<2x256xf32>
    %c0_2 = arith.constant 0 : index
    %c0_3 = arith.constant 0 : index
    %4 = vector.load %arg3[%c0_2, %c0_3] : memref<2x256xbf16, #tpu.memory_space<vmem>>, vector<2x256xbf16>
    %c0_4 = arith.constant 0 : index
    %c0_5 = arith.constant 0 : index
    %5 = vector.load %arg4[%c0_4, %c0_5] : memref<256x256xbf16, #tpu.memory_space<vmem>>, vector<256x256xbf16>
    %cst = arith.constant dense<0.000000e+00> : vector<2x256xf32>
    %6 = tpu.matmul %4, %5, %cst {dimension_numbers = #tpu.dot_dimension_numbers<[1], [0], [0], [1], [0, 0, 1, 1], [], []>} : vector<2x256xbf16>, vector<256x256xbf16>, vector<2x256xf32> -> vector<2x256xf32>
    %7 = arith.addf %3, %6 : vector<2x256xf32>
    %c0_6 = arith.constant 0 : index
    %c0_7 = arith.constant 0 : index
    %8 = vector.load %arg7[%c0_6, %c0_7] : memref<2x256xf32, #tpu.memory_space<vmem>>, vector<2x256xf32>
    tpu.vector_store %arg7[%c0_6, %c0_7], %7 {strides = array<i32>} : memref<2x256xf32, #tpu.memory_space<vmem>>, vector<2x256xf32>,
    %c8_i32 = arith.constant 8 : i32
    %9 = arith.cmpi eq, %arg2, %c8_i32 : i32
    %10 = arith.extui %9 : i1 to i32
    %c0_i32_8 = arith.constant 0 : i32
    %11 = arith.cmpi ne, %10, %c0_i32_8 : i32
    scf.if %11 {
      %c0_9 = arith.constant 0 : index
      %c0_10 = arith.constant 0 : index
      %12 = vector.load %arg7[%c0_9, %c0_10] : memref<2x256xf32, #tpu.memory_space<vmem>>, vector<2x256xf32>
      %c0_11 = arith.constant 0 : index
      %c0_12 = arith.constant 0 : index
      %13 = vector.load %arg5[%c0_11, %c0_12] : memref<1x256xf32, #tpu.memory_space<vmem>>, vector<1x256xf32>
      %14 = vector.broadcast %13 : vector<1x256xf32> to vector<2x256xf32>
      %15 = arith.addf %12, %14 : vector<2x256xf32>
      %cst_13 = arith.constant 0.000000e+00 : f32
      %16 = vector.broadcast %cst_13 : f32 to vector<2x256xf32>
      %17 = arith.maximumf %15, %16 : vector<2x256xf32>
      %18 = arith.truncf %17 : vector<2x256xf32> to vector<2x256xbf16>
      %c0_14 = arith.constant 0 : index
      %c0_15 = arith.constant 0 : index
      %19 = vector.load %arg6[%c0_14, %c0_15] : memref<2x256xbf16, #tpu.memory_space<vmem>>, vector<2x256xbf16>
      tpu.vector_store %arg6[%c0_14, %c0_15], %18 {strides = array<i32>} : memref<2x256xbf16, #tpu.memory_space<vmem>>, vector<2x256xbf16>,
    } else {
    }
    return
  }
  func.func @transform_0(%arg0: i32, %arg1: i32, %arg2: i32) -> (i32, i32) {
    %c0_i32 = arith.constant 0 : i32
    return %arg0, %arg2 : i32, i32
  }
  func.func @transform_1(%arg0: i32, %arg1: i32, %arg2: i32) -> (i32, i32) {
    %c0_i32 = arith.constant 0 : i32
    return %arg2, %arg1 : i32, i32
  }
  func.func @transform_2(%arg0: i32, %arg1: i32, %arg2: i32) -> (i32, i32) {
    %c0_i32 = arith.constant 0 : i32
    %c0_i32_0 = arith.constant 0 : i32
    return %c0_i32, %arg1 : i32, i32
  }
  func.func @transform_3(%arg0: i32, %arg1: i32, %arg2: i32) -> (i32, i32) {
    %c0_i32 = arith.constant 0 : i32
    return %arg0, %arg1 : i32, i32
  }
}

module attributes {stable_mosaic.version = 11 : i64} {
  func.func @_mm_kernel(%arg0: i32, %arg1: i32, %arg2: i32, %arg3: memref<2x256xbf16, #tpu.memory_space<vmem>>, %arg4: memref<256x256xbf16, #tpu.memory_space<vmem>>, %arg5: memref<1x256xf32, #tpu.memory_space<vmem>>, %arg6: memref<2x256xbf16, #tpu.memory_space<vmem>>, %arg7: memref<2x256xf32, #tpu.memory_space<vmem>>) attributes {dimension_semantics = [#tpu.dimension_semantics<parallel>, #tpu.dimension_semantics<parallel>, #tpu.dimension_semantics<arbitrary>], iteration_bounds = array<i64: 1, 2, 1>, scalar_prefetch = 0 : i64, scratch_operands = 1 : i64, tpu.core_type = #tpu.core_type<tc>, window_params = [{transform_indices = @transform_0, window_bounds = array<i64: 2, 256>}, {transform_indices = @transform_1, window_bounds = array<i64: 256, 256>}, {transform_indices = @transform_2, window_bounds = array<i64: 1, 256>}, {transform_indices = @transform_3, window_bounds = array<i64: 2, 256>}]} {
    %c0_i32 = arith.constant 0 : i32
    %0 = arith.cmpi eq, %arg2, %c0_i32 : i32
    %1 = arith.extui %0 : i1 to i32
    %c0_i32_0 = arith.constant 0 : i32
    %2 = arith.cmpi ne, %1, %c0_i32_0 : i32
    scf.if %2 {
      %cst_10 = arith.constant 0.000000e+00 : f32
      %12 = vector.broadcast %cst_10 : f32 to vector<2x256xf32>
      %c0_11 = arith.constant 0 : index
      %c0_12 = arith.constant 0 : index
      %13 = vector.load %arg7[%c0_11, %c0_12] : memref<2x256xf32, #tpu.memory_space<vmem>>, vector<2x256xf32>
      tpu.vector_store %arg7[%c0_11, %c0_12], %12 {strides = array<i32>} : memref<2x256xf32, #tpu.memory_space<vmem>>, vector<2x256xf32>,
    } else {
    }
    %c0 = arith.constant 0 : index
    %c0_1 = arith.constant 0 : index
    %3 = vector.load %arg7[%c0, %c0_1] : memref<2x256xf32, #tpu.memory_space<vmem>>, vector<2x256xf32>
    %c0_2 = arith.constant 0 : index
    %c0_3 = arith.constant 0 : index
    %4 = vector.load %arg3[%c0_2, %c0_3] : memref<2x256xbf16, #tpu.memory_space<vmem>>, vector<2x256xbf16>
    %c0_4 = arith.constant 0 : index
    %c0_5 = arith.constant 0 : index
    %5 = vector.load %arg4[%c0_4, %c0_5] : memref<256x256xbf16, #tpu.memory_space<vmem>>, vector<256x256xbf16>
    %cst = arith.constant dense<0.000000e+00> : vector<2x256xf32>
    %6 = tpu.matmul %4, %5, %cst {dimension_numbers = #tpu.dot_dimension_numbers<[1], [0], [0], [1], [0, 0, 1, 1], [], []>} : vector<2x256xbf16>, vector<256x256xbf16>, vector<2x256xf32> -> vector<2x256xf32>
    %7 = arith.addf %3, %6 : vector<2x256xf32>
    %c0_6 = arith.constant 0 : index
    %c0_7 = arith.constant 0 : index
    %8 = vector.load %arg7[%c0_6, %c0_7] : memref<2x256xf32, #tpu.memory_space<vmem>>, vector<2x256xf32>
    tpu.vector_store %arg7[%c0_6, %c0_7], %7 {strides = array<i32>} : memref<2x256xf32, #tpu.memory_space<vmem>>, vector<2x256xf32>,
    %c0_i32_8 = arith.constant 0 : i32
    %9 = arith.cmpi eq, %arg2, %c0_i32_8 : i32
    %10 = arith.extui %9 : i1 to i32
    %c0_i32_9 = arith.constant 0 : i32
    %11 = arith.cmpi ne, %10, %c0_i32_9 : i32
    scf.if %11 {
      %c0_10 = arith.constant 0 : index
      %c0_11 = arith.constant 0 : index
      %12 = vector.load %arg7[%c0_10, %c0_11] : memref<2x256xf32, #tpu.memory_space<vmem>>, vector<2x256xf32>
      %c0_12 = arith.constant 0 : index
      %c0_13 = arith.constant 0 : index
      %13 = vector.load %arg5[%c0_12, %c0_13] : memref<1x256xf32, #tpu.memory_space<vmem>>, vector<1x256xf32>
      %14 = vector.broadcast %13 : vector<1x256xf32> to vector<2x256xf32>
      %15 = arith.addf %12, %14 : vector<2x256xf32>
      %16 = arith.truncf %15 : vector<2x256xf32> to vector<2x256xbf16>
      %c0_14 = arith.constant 0 : index
      %c0_15 = arith.constant 0 : index
      %17 = vector.load %arg6[%c0_14, %c0_15] : memref<2x256xbf16, #tpu.memory_space<vmem>>, vector<2x256xbf16>
      tpu.vector_store %arg6[%c0_14, %c0_15], %16 {strides = array<i32>} : memref<2x256xbf16, #tpu.memory_space<vmem>>, vector<2x256xbf16>,
    } else {
    }
    return
  }
  func.func @transform_0(%arg0: i32, %arg1: i32, %arg2: i32) -> (i32, i32) {
    %c0_i32 = arith.constant 0 : i32
    return %arg0, %arg2 : i32, i32
  }
  func.func @transform_1(%arg0: i32, %arg1: i32, %arg2: i32) -> (i32, i32) {
    %c0_i32 = arith.constant 0 : i32
    return %arg2, %arg1 : i32, i32
  }
  func.func @transform_2(%arg0: i32, %arg1: i32, %arg2: i32) -> (i32, i32) {
    %c0_i32 = arith.constant 0 : i32
    %c0_i32_0 = arith.constant 0 : i32
    return %c0_i32, %arg1 : i32, i32
  }
  func.func @transform_3(%arg0: i32, %arg1: i32, %arg2: i32) -> (i32, i32) {
    %c0_i32 = arith.constant 0 : i32
    return %arg0, %arg1 : i32, i32
  }
}

module attributes {stable_mosaic.version = 11 : i64} {
  func.func @_mm_res_kernel(%arg0: i32, %arg1: i32, %arg2: i32, %arg3: memref<2x512xbf16, #tpu.memory_space<vmem>>, %arg4: memref<512x256xbf16, #tpu.memory_space<vmem>>, %arg5: memref<1x256xf32, #tpu.memory_space<vmem>>, %arg6: memref<2x256xbf16, #tpu.memory_space<vmem>>, %arg7: memref<2x256xbf16, #tpu.memory_space<vmem>>, %arg8: memref<2x256xf32, #tpu.memory_space<vmem>>) attributes {dimension_semantics = [#tpu.dimension_semantics<parallel>, #tpu.dimension_semantics<parallel>, #tpu.dimension_semantics<arbitrary>], iteration_bounds = array<i64: 1, 2, 9>, scalar_prefetch = 0 : i64, scratch_operands = 1 : i64, tpu.core_type = #tpu.core_type<tc>, window_params = [{transform_indices = @transform_0, window_bounds = array<i64: 2, 512>}, {transform_indices = @transform_1, window_bounds = array<i64: 512, 256>}, {transform_indices = @transform_2, window_bounds = array<i64: 1, 256>}, {transform_indices = @transform_3, window_bounds = array<i64: 2, 256>}, {transform_indices = @transform_4, window_bounds = array<i64: 2, 256>}]} {
    %c0_i32 = arith.constant 0 : i32
    %0 = arith.cmpi eq, %arg2, %c0_i32 : i32
    %1 = arith.extui %0 : i1 to i32
    %c0_i32_0 = arith.constant 0 : i32
    %2 = arith.cmpi ne, %1, %c0_i32_0 : i32
    scf.if %2 {
      %cst_9 = arith.constant 0.000000e+00 : f32
      %12 = vector.broadcast %cst_9 : f32 to vector<2x256xf32>
      %c0_10 = arith.constant 0 : index
      %c0_11 = arith.constant 0 : index
      %13 = vector.load %arg8[%c0_10, %c0_11] : memref<2x256xf32, #tpu.memory_space<vmem>>, vector<2x256xf32>
      tpu.vector_store %arg8[%c0_10, %c0_11], %12 {strides = array<i32>} : memref<2x256xf32, #tpu.memory_space<vmem>>, vector<2x256xf32>,
    } else {
    }
    %c0 = arith.constant 0 : index
    %c0_1 = arith.constant 0 : index
    %3 = vector.load %arg8[%c0, %c0_1] : memref<2x256xf32, #tpu.memory_space<vmem>>, vector<2x256xf32>
    %c0_2 = arith.constant 0 : index
    %c0_3 = arith.constant 0 : index
    %4 = vector.load %arg3[%c0_2, %c0_3] : memref<2x512xbf16, #tpu.memory_space<vmem>>, vector<2x512xbf16>
    %c0_4 = arith.constant 0 : index
    %c0_5 = arith.constant 0 : index
    %5 = vector.load %arg4[%c0_4, %c0_5] : memref<512x256xbf16, #tpu.memory_space<vmem>>, vector<512x256xbf16>
    %cst = arith.constant dense<0.000000e+00> : vector<2x256xf32>
    %6 = tpu.matmul %4, %5, %cst {dimension_numbers = #tpu.dot_dimension_numbers<[1], [0], [0], [1], [0, 0, 1, 1], [], []>} : vector<2x512xbf16>, vector<512x256xbf16>, vector<2x256xf32> -> vector<2x256xf32>
    %7 = arith.addf %3, %6 : vector<2x256xf32>
    %c0_6 = arith.constant 0 : index
    %c0_7 = arith.constant 0 : index
    %8 = vector.load %arg8[%c0_6, %c0_7] : memref<2x256xf32, #tpu.memory_space<vmem>>, vector<2x256xf32>
    tpu.vector_store %arg8[%c0_6, %c0_7], %7 {strides = array<i32>} : memref<2x256xf32, #tpu.memory_space<vmem>>, vector<2x256xf32>,
    %c8_i32 = arith.constant 8 : i32
    %9 = arith.cmpi eq, %arg2, %c8_i32 : i32
    %10 = arith.extui %9 : i1 to i32
    %c0_i32_8 = arith.constant 0 : i32
    %11 = arith.cmpi ne, %10, %c0_i32_8 : i32
    scf.if %11 {
      %c0_9 = arith.constant 0 : index
      %c0_10 = arith.constant 0 : index
      %12 = vector.load %arg8[%c0_9, %c0_10] : memref<2x256xf32, #tpu.memory_space<vmem>>, vector<2x256xf32>
      %c0_11 = arith.constant 0 : index
      %c0_12 = arith.constant 0 : index
      %13 = vector.load %arg5[%c0_11, %c0_12] : memref<1x256xf32, #tpu.memory_space<vmem>>, vector<1x256xf32>
      %14 = vector.broadcast %13 : vector<1x256xf32> to vector<2x256xf32>
      %15 = arith.addf %12, %14 : vector<2x256xf32>
      %c0_13 = arith.constant 0 : index
      %c0_14 = arith.constant 0 : index
      %16 = vector.load %arg6[%c0_13, %c0_14] : memref<2x256xbf16, #tpu.memory_space<vmem>>, vector<2x256xbf16>
      %17 = arith.extf %16 : vector<2x256xbf16> to vector<2x256xf32>
      %18 = arith.addf %15, %17 : vector<2x256xf32>
      %cst_15 = arith.constant 0.000000e+00 : f32
      %19 = vector.broadcast %cst_15 : f32 to vector<2x256xf32>
      %20 = arith.maximumf %18, %19 : vector<2x256xf32>
      %21 = arith.truncf %20 : vector<2x256xf32> to vector<2x256xbf16>
      %c0_16 = arith.constant 0 : index
      %c0_17 = arith.constant 0 : index
      %22 = vector.load %arg7[%c0_16, %c0_17] : memref<2x256xbf16, #tpu.memory_space<vmem>>, vector<2x256xbf16>
      tpu.vector_store %arg7[%c0_16, %c0_17], %21 {strides = array<i32>} : memref<2x256xbf16, #tpu.memory_space<vmem>>, vector<2x256xbf16>,
    } else {
    }
    return
  }
  func.func @transform_0(%arg0: i32, %arg1: i32, %arg2: i32) -> (i32, i32) {
    %c0_i32 = arith.constant 0 : i32
    return %arg0, %arg2 : i32, i32
  }
  func.func @transform_1(%arg0: i32, %arg1: i32, %arg2: i32) -> (i32, i32) {
    %c0_i32 = arith.constant 0 : i32
    return %arg2, %arg1 : i32, i32
  }
  func.func @transform_2(%arg0: i32, %arg1: i32, %arg2: i32) -> (i32, i32) {
    %c0_i32 = arith.constant 0 : i32
    %c0_i32_0 = arith.constant 0 : i32
    return %c0_i32, %arg1 : i32, i32
  }
  func.func @transform_3(%arg0: i32, %arg1: i32, %arg2: i32) -> (i32, i32) {
    %c0_i32 = arith.constant 0 : i32
    return %arg0, %arg1 : i32, i32
  }
  func.func @transform_4(%arg0: i32, %arg1: i32, %arg2: i32) -> (i32, i32) {
    %c0_i32 = arith.constant 0 : i32
    return %arg0, %arg1 : i32, i32
  }
}

module attributes {stable_mosaic.version = 11 : i64} {
  func.func @_avgpool_fc_kernel(%arg0: memref<2x1x512xbf16, #tpu.memory_space<vmem>>, %arg1: memref<512x10xf32, #tpu.memory_space<vmem>>, %arg2: memref<1x10xf32, #tpu.memory_space<vmem>>, %arg3: memref<2x10xf32, #tpu.memory_space<vmem>>) attributes {dimension_semantics = [], scalar_prefetch = 0 : i64, scratch_operands = 0 : i64, tpu.core_type = #tpu.core_type<tc>} {
    %c0 = arith.constant 0 : index
    %c0_0 = arith.constant 0 : index
    %c0_1 = arith.constant 0 : index
    %0 = vector.load %arg0[%c0, %c0_0, %c0_1] : memref<2x1x512xbf16, #tpu.memory_space<vmem>>, vector<2x1x512xbf16>
    %1 = arith.extf %0 : vector<2x1x512xbf16> to vector<2x1x512xf32>
    %cst = arith.constant dense<0.000000e+00> : vector<2x512xf32>
    %2 = vector.multi_reduction <add>, %1, %cst [1] : vector<2x1x512xf32> to vector<2x512xf32>
    %cst_2 = arith.constant 1.000000e+00 : f32
    %3 = vector.broadcast %cst_2 : f32 to vector<2x512xf32>
    %4 = arith.divf %2, %3 : vector<2x512xf32>
    %c0_3 = arith.constant 0 : index
    %c0_4 = arith.constant 0 : index
    %5 = vector.load %arg1[%c0_3, %c0_4] : memref<512x10xf32, #tpu.memory_space<vmem>>, vector<512x10xf32>
    %cst_5 = arith.constant dense<0.000000e+00> : vector<2x10xf32>
    %6 = tpu.matmul %4, %5, %cst_5 {dimension_numbers = #tpu.dot_dimension_numbers<[1], [0], [0], [1], [0, 0, 1, 1], [], []>} : vector<2x512xf32>, vector<512x10xf32>, vector<2x10xf32> -> vector<2x10xf32>
    %c0_6 = arith.constant 0 : index
    %c0_7 = arith.constant 0 : index
    %7 = vector.load %arg2[%c0_6, %c0_7] : memref<1x10xf32, #tpu.memory_space<vmem>>, vector<1x10xf32>
    %8 = vector.broadcast %7 : vector<1x10xf32> to vector<2x10xf32>
    %9 = arith.addf %6, %8 : vector<2x10xf32>
    %c0_8 = arith.constant 0 : index
    %c0_9 = arith.constant 0 : index
    %10 = vector.load %arg3[%c0_8, %c0_9] : memref<2x10xf32, #tpu.memory_space<vmem>>, vector<2x10xf32>
    tpu.vector_store %arg3[%c0_8, %c0_9], %9 {strides = array<i32>} : memref<2x10xf32, #tpu.memory_space<vmem>>, vector<2x10xf32>,
    return
  }
}

</mosaic_0001>

<bundles_post_ra>
// kernel: resnet_forward.17
= control target key start
LH: loop header
LB: loop body
LE: loop exit
PB: predicated region body
PF: predicated region fallthrough
CT: control target
= control target key end

     0   :  { %s696_s0 = inlined_call_operand.vmem [shape: bf16[2,5,5,128], index: 0, kind: input, shape index: {}]   ;;  %s697_s2 = inlined_call_operand.vmem [shape: bf16[2,5,5,128], index: 2, kind: input, shape index: {}]   ;;  %s698_s1 = inlined_call_operand.vmem [shape: bf16[2,5,5,128], index: 1, kind: input, shape index: {}]   ;;  %s699_s3 = inlined_call_operand.vmem [shape: bf16[2,5,5,128], index: 3, kind: input, shape index: {}]   ;;  %s700_s4 = inlined_call_operand.vmem [shape: bf16[2,4,4,128], index: 4, kind: output, shape index: {}]  }
   0x1   :  { %v25_v0 = vld [vmem:[%s696_s0] sm:$0x7]  ;;  %v415_v3 = vld [vmem:[%s696_s0 + $0x4] sm:$0x7]  ;;  %v416_v15 = vld [vmem:[%s696_s0 + $0x8] sm:$0x7] }
   0x2   :  { %v34_v1 = vshrl.u32 %v25_v0, 16  ;;  %v37_v2 = vshll.u32 %v25_v0, 16  ;;  %v147_v4 = vshrl.u32 %v415_v3, 16  ;;  %v150_v5 = vshll.u32 %v415_v3, 16  ;;  %v283_v8 = vld [vmem:[%s697_s2] sm:$0x7] }
   0x3   :  { %v292_v11 = vshrl.u32 %v283_v8, 16  ;;  %v295_v12 = vshll.u32 %v283_v8, 16  ;;  %v26_v14 = vld [vmem:[%s696_s0 + $0x4] sm:$0x7]  ;;  %v17_v16 = vld [vmem:[%s696_s0] sm:$0x3] }
   0x4   :  { %v36_v6 = vrot.slane %v34_v1, 4  ;;  %v39_v7 = vrot.slane %v37_v2, 5  ;;  %v149_v9 = vrot.slane %v147_v4, 4  ;;  %v152_v10 = vrot.slane %v150_v5, 5  ;;  %v407_v20 = vld [vmem:[%s696_s0 + $0x4] sm:$0x3] }
   0x5   :  { %v43_v18 = vshrl.u32 %v26_v14, 16  ;;  %v46_v21 = vshll.u32 %v26_v14, 16  ;;  %v156_v22 = vshrl.u32 %v416_v15, 16  ;;  %v159_v23 = vshll.u32 %v416_v15, 16  ;;  %v284_v28 = vld [vmem:[%s697_s2 + $0x4] sm:$0x7] }
   0x6   :  { %v40_v13 = vor.u32 %v39_v7, %v36_v6  ;;  %v153_v17 = vor.u32 %v152_v10, %v149_v9  ;;  %v294_v25 = vrot.slane %v292_v11, 4  ;;  %v297_v26 = vrot.slane %v295_v12, 5  ;;  %v234_v36 = vld [vmem:[%s698_s1] sm:$0x3]  ;;  %v27_v39 = vld [vmem:[%s696_s0 + $0x8] sm:$0x7] }
   0x7   :  { %v45_v27 = vrot.slane %v43_v18, 4  ;;  %v48_v30 = vrot.slane %v46_v21, 5  ;;  %v158_v31 = vrot.slane %v156_v22, 4  ;;  %v161_v32 = vrot.slane %v159_v23, 5  ;;  %v417_v40 = vld [vmem:[%s696_s0 + $0xc] sm:$0x7] }
   0x8   :  { %v41_v19 = vrot.slane %v40_v13, 4  ;;  %v154_v24 = vrot.slane %v153_v17, 4  ;;  %v301_v33 = vshrl.u32 %v284_v28, 16  ;;  %v304_v34 = vshll.u32 %v284_v28, 16  ;;  %v18_v42 = vld [vmem:[%s696_s0 + $0x4] sm:$0x3] }
   0x9   :  { %v49_v37 = vor.u32 %v48_v30, %v45_v27  ;;  %v162_v38 = vor.u32 %v161_v32, %v158_v31  ;;  %v298_v41 = vor.u32 %v297_v26, %v294_v25  ;;  %v52_v44 = vshrl.u32 %v27_v39, 16  ;;  %v423_v47 = vld [vmem:[%s698_s1 + $0x4] sm:$0x3]  ;;  %v408_v51 = vld [vmem:[%s696_s0 + $0x8] sm:$0x3] }
   0xa   :  { %v113_v29 = vmax.bf16 %v41_v19, %v17_v16  ;;  %v303_v43 = vrot.slane %v301_v33, 4  ;;  %v55_v45 = vshll.u32 %v27_v39, 16  ;;  %v306_v49 = vrot.slane %v304_v34, 5  ;;  %v267_v56 = vld [vmem:[%s697_s2] sm:$0x3] }
   0xb   :  { %v50_v48 = vrot.slane %v49_v37, 4  ;;  %v165_v50 = vshrl.u32 %v417_v40, 16  ;;  %v54_v52 = vrot.slane %v52_v44, 4  ;;  %v168_v54 = vshll.u32 %v417_v40, 16  ;;  %v285_v60 = vld [vmem:[%s697_s2 + $0x8] sm:$0x7] }
   0xc   :  { %v130_v35 = vmax.bf16 %v407_v20, %v113_v29  ;;  %v57_v53 = vrot.slane %v55_v45, 5  ;;  %v163_v58 = vrot.slane %v162_v38, 4  ;;  %v299_v61 = vrot.slane %v298_v41, 4  ;;  %v235_v62 = vld [vmem:[%s698_s1 + $0x4] sm:$0x3] }
   0xd   :  { %v114_v57 = vmax.bf16 %v50_v48, %v18_v42  ;;  %v167_v59 = vrot.slane %v165_v50, 4  ;;  %v170_v0 = vrot.slane %v168_v54, 5  ;;  %v310_v1 = vshrl.u32 %v285_v60, 16  ;;  %v19_v5 = vld [vmem:[%s696_s0 + $0x8] sm:$0x3] }
   0xe   :  { %v226_v46 = vmax.bf16 %v154_v24, %v130_v35  ;;  %v58_v63 = vor.u32 %v57_v53, %v54_v52  ;;  %v307_v4 = vor.u32 %v306_v49, %v303_v43  ;;  %v313_v6 = vshll.u32 %v285_v60, 16  ;;  %v28_v7 = vld [vmem:[%s696_s0 + $0xc] sm:$0x7]  ;;  %v418_v12 = vld [vmem:[%s696_s0 + $0x10] sm:$0x7] }
   0xf   :  { %v131_v3 = vmax.bf16 %v408_v51, %v114_v57  ;;  %v171_v9 = vor.u32 %v170_v0, %v167_v59  ;;  %v312_v10 = vrot.slane %v310_v1, 4  ;;  %v61_v11 = vshrl.u32 %v28_v7, 16  ;;  %v379_v14 = vld [vmem:[%s699_s3] sm:$0x3]  ;;  %v409_v16 = vld [vmem:[%s696_s0 + $0xc] sm:$0x3] }
  0x10   :  { %v242_v55 = vmax.bf16 %v234_v36, %v226_v46  ;;  %v59_v8 = vrot.slane %v58_v63, 4  ;;  %v315_v17 = vrot.slane %v313_v6, 5  ;;  %v64_v18 = vshll.u32 %v28_v7, 16  ;;  %v424_v19 = vld [vmem:[%s698_s1 + $0x8] sm:$0x3] }
  0x11   :  { %v227_v15 = vmax.bf16 %v163_v58, %v131_v3  ;;  %v172_v21 = vrot.slane %v171_v9, 4  ;;  %v63_v22 = vrot.slane %v61_v11, 4  ;;  %v174_v23 = vshrl.u32 %v418_v12, 16  ;;  %v286_v28 = vld [vmem:[%s697_s2 + $0xc] sm:$0x7] }
  0x12   :  { %v259_v2 = vmax.bf16 %v423_v47, %v242_v55  ;;  %v115_v20 = vmax.bf16 %v59_v8, %v19_v5  ;;  %v308_v26 = vrot.slane %v307_v4, 4  ;;  %v66_v27 = vrot.slane %v64_v18, 5  ;;  %v268_v29 = vld [vmem:[%s697_s2 + $0x4] sm:$0x3]  ;;  %v236_v36 = vld [vmem:[%s698_s1 + $0x8] sm:$0x3] }
  0x13   :  { %v243_v25 = vmax.bf16 %v235_v62, %v227_v15  ;;  %v176_v31 = vrot.slane %v174_v23, 4  ;;  %v177_v32 = vshll.u32 %v418_v12, 16  ;;  %v319_v33 = vshrl.u32 %v286_v28, 16  ;;  %v20_v38 = vld [vmem:[%s696_s0 + $0xc] sm:$0x3] }
  0x14   :  { %v275_v13 = vmax.bf16 %v267_v56, %v259_v2  ;;  %v132_v30 = vmax.bf16 %v409_v16, %v115_v20  ;;  %v316_v37 = vor.u32 %v315_v17, %v312_v10  ;;  %v67_v39 = vor.u32 %v66_v27, %v63_v22  ;;  %v29_v40 = vld [vmem:[%s696_s0 + $0x14] sm:$0x7]  ;;  %v419_v45 = vld [vmem:[%s696_s0 + $0x18] sm:$0x7]  ;;  %v425_v47 = vld [vmem:[%s698_s1 + $0xc] sm:$0x3] }
  0x15   :  { %v260_v35 = vmax.bf16 %v424_v19, %v243_v25  ;;  %v179_v42 = vrot.slane %v177_v32, 5  ;;  %v321_v43 = vrot.slane %v319_v33, 4  ;;  %v322_v44 = vshll.u32 %v286_v28, 16  ;;  %v380_v51 = vld [vmem:[%s699_s3 + $0x4] sm:$0x3] }
  0x16   :  { %v371_v24 = vmax.bf16 %v299_v61, %v275_v13  ;;  %v228_v41 = vmax.bf16 %v172_v21, %v132_v30  ;;  %v68_v48 = vrot.slane %v67_v39, 4  ;;  %v70_v49 = vshrl.u32 %v29_v40, 16  ;;  %v410_v53 = vld [vmem:[%s696_s0 + $0x10] sm:$0x3]  ;;  %v269_v58 = vld [vmem:[%s697_s2 + $0x8] sm:$0x3] }
  0x17   :  { %v276_v46 = vmax.bf16 %v268_v29, %v260_v35  ;;  %v73_v50 = vshll.u32 %v29_v40, 16  ;;  %v180_v54 = vor.u32 %v179_v42, %v176_v31  ;;  %v324_v55 = vrot.slane %v322_v44, 5  ;;  %v287_v62 = vld [vmem:[%s697_s2 + $0x14] sm:$0x7]  ;;  %v30_v3 = vld [vmem:[%s696_s0 + $0x18] sm:$0x7] }
  0x18   :  { %v387_v34 = vmax.bf16 %v379_v14, %v371_v24  ;;  %v244_v52 = vmax.bf16 %v236_v36, %v228_v41  ;;  %v183_v56 = vshrl.u32 %v419_v45, 16  ;;  %v116_v59 = vmax.bf16 %v68_v48, %v20_v38  ;;  %v381_v5 = vld [vmem:[%s699_s3 + $0x8] sm:$0x3]  ;;  %v237_v7 = vld [vmem:[%s698_s1 + $0xc] sm:$0x3] }
  0x19   :  { %v372_v57 = vmax.bf16 %v308_v26, %v276_v46  ;;  %v72_v60 = vrot.slane %v70_v49, 4  ;;  %v75_v61 = vrot.slane %v73_v50, 5  ;;  %v317_v0 = vrot.slane %v316_v37, 4  ;;  %v426_v11 = vld [vmem:[%s698_s1 + $0x10] sm:$0x3] }
  0x1a   :  { %395 = vst [vmem:[%s700_s4] sm:$0x3] %v387_v34  ;;  %v261_v63 = vmax.bf16 %v425_v47, %v244_v52  ;;  %v181_v1 = vrot.slane %v180_v54, 4  ;;  %v185_v2 = vrot.slane %v183_v56, 4  ;;  %v133_v6 = vmax.bf16 %v410_v53, %v116_v59  ;;  %v21_v13 = vld [vmem:[%s696_s0 + $0x14] sm:$0x3] }
  0x1b   :  { %v388_v4 = vmax.bf16 %v380_v51, %v372_v57  ;;  %v76_v8 = vor.u32 %v75_v61, %v72_v60  ;;  %v186_v9 = vshll.u32 %v419_v45, 16  ;;  %v325_v12 = vor.u32 %v324_v55, %v321_v43  ;;  %v420_v20 = vld [vmem:[%s696_s0 + $0x1c] sm:$0x7]  ;;  %v411_v22 = vld [vmem:[%s696_s0 + $0x18] sm:$0x3] }
  0x1c   :  { %v277_v10 = vmax.bf16 %v269_v58, %v261_v63  ;;  %v328_v14 = vshrl.u32 %v287_v62, 16  ;;  %v331_v15 = vshll.u32 %v287_v62, 16  ;;  %v229_v16 = vmax.bf16 %v181_v1, %v133_v6  ;;  %v288_v30 = vld [vmem:[%s697_s2 + $0x18] sm:$0x7]  ;;  %v270_v32 = vld [vmem:[%s697_s2 + $0xc] sm:$0x3] }
  0x1d   :  { %396 = vst [vmem:[%s700_s4 + $0x2] sm:$0x3] %v388_v4  ;;  %v77_v17 = vrot.slane %v76_v8, 4  ;;  %v188_v18 = vrot.slane %v186_v9, 5  ;;  %v79_v19 = vshrl.u32 %v30_v3, 16  ;;  %v82_v25 = vshll.u32 %v30_v3, 16 }
  0x1e   :  { %v373_v21 = vmax.bf16 %v317_v0, %v277_v10  ;;  %v330_v23 = vrot.slane %v328_v14, 4  ;;  %v333_v24 = vrot.slane %v331_v15, 5  ;;  %v245_v26 = vmax.bf16 %v237_v7, %v229_v16  ;;  %v31_v40 = vld [vmem:[%s696_s0 + $0x1c] sm:$0x7]  ;;  %v382_v41 = vld [vmem:[%s699_s3 + $0xc] sm:$0x3] }
  0x1f   :  { %v117_v27 = vmax.bf16 %v77_v17, %v21_v13  ;;  %v189_v28 = vor.u32 %v188_v18, %v185_v2  ;;  %v81_v29 = vrot.slane %v79_v19, 4  ;;  %v326_v33 = vrot.slane %v325_v12, 4  ;;  %v238_v42 = vld [vmem:[%s698_s1 + $0x14] sm:$0x3]  ;;  %v22_v49 = vld [vmem:[%s696_s0 + $0x18] sm:$0x3] }
  0x20   :  { %v389_v31 = vmax.bf16 %v381_v5, %v373_v21  ;;  %v84_v34 = vrot.slane %v82_v25, 5  ;;  %v192_v35 = vshrl.u32 %v420_v20, 16  ;;  %v262_v36 = vmax.bf16 %v426_v11, %v245_v26  ;;  %v421_v52 = vld [vmem:[%s696_s0 + $0x20] sm:$0x7]  ;;  %v427_v53 = vld [vmem:[%s698_s1 + $0x18] sm:$0x3] }
  0x21   :  { %v134_v37 = vmax.bf16 %v411_v22, %v117_v27  ;;  %v190_v38 = vrot.slane %v189_v28, 4  ;;  %v195_v39 = vshll.u32 %v420_v20, 16  ;;  %v334_v43 = vor.u32 %v333_v24, %v330_v23  ;;  %v271_v60 = vld [vmem:[%s697_s2 + $0x14] sm:$0x3]  ;;  %v412_v61 = vld [vmem:[%s696_s0 + $0x1c] sm:$0x3] }
  0x22   :  { %397 = vst [vmem:[%s700_s4 + $0x4] sm:$0x3] %v389_v31  ;;  %v85_v44 = vor.u32 %v84_v34, %v81_v29  ;;  %v194_v45 = vrot.slane %v192_v35, 4  ;;  %v337_v46 = vshrl.u32 %v288_v30, 16  ;;  %v278_v47 = vmax.bf16 %v270_v32, %v262_v36  ;;  %v289_v4 = vld [vmem:[%s697_s2 + $0x1c] sm:$0x7] }
  0x23   :  { %v230_v48 = vmax.bf16 %v190_v38, %v134_v37  ;;  %v197_v50 = vrot.slane %v195_v39, 5  ;;  %v340_v51 = vshll.u32 %v288_v30, 16  ;;  %v88_v56 = vshrl.u32 %v31_v40, 16  ;;  %v32_v9 = vld [vmem:[%s696_s0 + $0x20] sm:$0x7] }
  0x24   :  { %v86_v54 = vrot.slane %v85_v44, 4  ;;  %v339_v55 = vrot.slane %v337_v46, 4  ;;  %v91_v57 = vshll.u32 %v31_v40, 16  ;;  %v374_v58 = vmax.bf16 %v326_v33, %v278_v47  ;;  %v383_v10 = vld [vmem:[%s699_s3 + $0x14] sm:$0x3] }
  0x25   :  { %v246_v59 = vmax.bf16 %v238_v42, %v230_v48  ;;  %v198_v62 = vor.u32 %v197_v50, %v194_v45  ;;  %v342_v63 = vrot.slane %v340_v51, 5  ;;  %v90_v1 = vrot.slane %v88_v56, 4  ;;  %v239_v12 = vld [vmem:[%s698_s1 + $0x18] sm:$0x3]  ;;  %v428_v17 = vld [vmem:[%s698_s1 + $0x1c] sm:$0x3] }
  0x26   :  { %v118_v0 = vmax.bf16 %v86_v54, %v22_v49  ;;  %v93_v2 = vrot.slane %v91_v57, 5  ;;  %v201_v3 = vshrl.u32 %v421_v52, 16  ;;  %v390_v5 = vmax.bf16 %v382_v41, %v374_v58  ;;  %v23_v19 = vld [vmem:[%s696_s0 + $0x1c] sm:$0x3]  ;;  %v422_v26 = vld [vmem:[%s696_s0 + $0x24] sm:$0x7] }
  0x27   :  { %v263_v6 = vmax.bf16 %v427_v53, %v246_v59  ;;  %v335_v7 = vrot.slane %v334_v43, 4  ;;  %v199_v8 = vrot.slane %v198_v62, 4  ;;  %v204_v15 = vshll.u32 %v421_v52, 16  ;;  %v413_v28 = vld [vmem:[%s696_s0 + $0x20] sm:$0x3] }
  0x28   :  { %v135_v11 = vmax.bf16 %v412_v61, %v118_v0  ;;  %v94_v13 = vor.u32 %v93_v2, %v90_v1  ;;  %v203_v14 = vrot.slane %v201_v3, 4  ;;  %398 = vst [vmem:[%s700_s4 + $0x6] sm:$0x3] %v390_v5  ;;  %v343_v18 = vor.u32 %v342_v63, %v339_v55  ;;  %v290_v36 = vld [vmem:[%s697_s2 + $0x20] sm:$0x7] }
  0x29   :  { %v279_v16 = vmax.bf16 %v271_v60, %v263_v6  ;;  %v346_v20 = vshrl.u32 %v289_v4, 16  ;;  %v349_v21 = vshll.u32 %v289_v4, 16  ;;  %v206_v24 = vrot.slane %v204_v15, 5  ;;  %v272_v38 = vld [vmem:[%s697_s2 + $0x18] sm:$0x3] }
  0x2a   :  { %v231_v22 = vmax.bf16 %v199_v8, %v135_v11  ;;  %v95_v23 = vrot.slane %v94_v13, 4  ;;  %v97_v25 = vshrl.u32 %v32_v9, 16  ;;  %v100_v31 = vshll.u32 %v32_v9, 16  ;;  %v240_v46 = vld [vmem:[%s698_s1 + $0x1c] sm:$0x3] }
  0x2b   :  { %v375_v27 = vmax.bf16 %v335_v7, %v279_v16  ;;  %v348_v29 = vrot.slane %v346_v20, 4  ;;  %v351_v30 = vrot.slane %v349_v21, 5  ;;  %v207_v34 = vor.u32 %v206_v24, %v203_v14  ;;  %v24_v53 = vld [vmem:[%s696_s0 + $0x20] sm:$0x3]  ;;  %v384_v56 = vld [vmem:[%s699_s3 + $0x18] sm:$0x3] }
  0x2c   :  { %v247_v32 = vmax.bf16 %v239_v12, %v231_v22  ;;  %v119_v33 = vmax.bf16 %v95_v23, %v23_v19  ;;  %v99_v35 = vrot.slane %v97_v25, 4  ;;  %v344_v39 = vrot.slane %v343_v18, 4  ;;  %v429_v57 = vld [vmem:[%s698_s1 + $0x20] sm:$0x3]  ;;  %v414_v61 = vld [vmem:[%s696_s0 + $0x24] sm:$0x3] }
  0x2d   :  { %v391_v37 = vmax.bf16 %v383_v10, %v375_v27  ;;  %v102_v40 = vrot.slane %v100_v31, 5  ;;  %v210_v41 = vshrl.u32 %v422_v26, 16  ;;  %v208_v44 = vrot.slane %v207_v34, 4  ;;  %v273_v63 = vld [vmem:[%s697_s2 + $0x1c] sm:$0x3] }
  0x2e   :  { %v264_v42 = vmax.bf16 %v428_v17, %v247_v32  ;;  %v136_v43 = vmax.bf16 %v413_v28, %v119_v33  ;;  %v213_v45 = vshll.u32 %v422_v26, 16  ;;  %v352_v47 = vor.u32 %v351_v30, %v348_v29  ;;  %v241_v9 = vld [vmem:[%s698_s1 + $0x20] sm:$0x3]  ;;  %v385_v10 = vld [vmem:[%s699_s3 + $0x1c] sm:$0x3] }
  0x2f   :  { %399 = vst [vmem:[%s700_s4 + $0x8] sm:$0x3] %v391_v37  ;;  %v103_v48 = vor.u32 %v102_v40, %v99_v35  ;;  %v212_v49 = vrot.slane %v210_v41, 4  ;;  %v355_v50 = vshrl.u32 %v290_v36, 16  ;;  %v358_v55 = vshll.u32 %v290_v36, 16 }
  0x30   :  { %v280_v51 = vmax.bf16 %v272_v38, %v264_v42  ;;  %v232_v52 = vmax.bf16 %v208_v44, %v136_v43  ;;  %v215_v54 = vrot.slane %v213_v45, 5  ;;  %v353_v5 = vrot.slane %v352_v47, 4  ;;  %v430_v14 = vld [vmem:[%s698_s1 + $0x24] sm:$0x3]  ;;  %v274_v17 = vld [vmem:[%s697_s2 + $0x20] sm:$0x3] }
  0x31   :  { %v104_v58 = vrot.slane %v103_v48, 4  ;;  %v357_v1 = vrot.slane %v355_v50, 4  ;;  %v360_v2 = vrot.slane %v358_v55, 5  ;;  %v386_v21 = vld [vmem:[%s699_s3 + $0x20] sm:$0x3] }
  0x32   :  { %v376_v59 = vmax.bf16 %v344_v39, %v280_v51  ;;  %v248_v60 = vmax.bf16 %v240_v46, %v232_v52  ;;  %v216_v62 = vor.u32 %v215_v54, %v212_v49 }
  0x33   :  { %v120_v0 = vmax.bf16 %v104_v58, %v24_v53  ;;  %v361_v12 = vor.u32 %v360_v2, %v357_v1 }
  0x34   :  { %v392_v3 = vmax.bf16 %v384_v56, %v376_v59  ;;  %v265_v4 = vmax.bf16 %v429_v57, %v248_v60  ;;  %v217_v6 = vrot.slane %v216_v62, 4 }
  0x35   :  { %v137_v7 = vmax.bf16 %v414_v61, %v120_v0  ;;  %v362_v19 = vrot.slane %v361_v12, 4 }
  0x36   :  { %400 = vst [vmem:[%s700_s4 + $0xa] sm:$0x3] %v392_v3  ;;  %v281_v8 = vmax.bf16 %v273_v63, %v265_v4 }
  0x37   :  { %v233_v11 = vmax.bf16 %v217_v6, %v137_v7 }
  0x38   :  { %v377_v13 = vmax.bf16 %v353_v5, %v281_v8 }
  0x39   :  { %v249_v15 = vmax.bf16 %v241_v9, %v233_v11 }
  0x3a   :  { %v393_v16 = vmax.bf16 %v385_v10, %v377_v13 }
  0x3b   :  { %v266_v18 = vmax.bf16 %v430_v14, %v249_v15 }
  0x3c   :  { %401 = vst [vmem:[%s700_s4 + $0xc] sm:$0x3] %v393_v16 }
  0x3d   :  { %v282_v20 = vmax.bf16 %v274_v17, %v266_v18 }
  0x3f   :  { %v378_v22 = vmax.bf16 %v362_v19, %v282_v20 }
  0x41   :  { %v394_v23 = vmax.bf16 %v386_v21, %v378_v22 }
  0x43   :  { %402 = vst [vmem:[%s700_s4 + $0xe] sm:$0x3] %v394_v23 }

// kernel: resnet_forward.16
= control target key start
LH: loop header
LB: loop body
LE: loop exit
PB: predicated region body
PF: predicated region fallthrough
CT: control target
= control target key end

     0   :  { %s1340_s12 = smov 0   ;;  %s1342_s13 = smov 0   ;;  %s1488_s0 = inlined_call_operand.vmem [shape: bf16[128,12544], index: 0, kind: input, shape index: {}]   ;;  %s1489_s1 = inlined_call_operand.vmem [shape: bf16[12544,128], index: 1, kind: input, shape index: {}]   ;;  %s1490_s2 = inlined_call_operand.vmem [shape: f32[1,128], index: 2, kind: input, shape index: {}]   ;;  %s1491_s3 = inlined_call_operand.vmem [shape: bf16[128,128], index: 3, kind: output, shape index: {}]  }
   0x1   :  { %s1344_s14 = smov 0   ;;  %s1346_s15 = smov 0  }
   0x2   :  { %s1348_s16 = smov 0  }
   0x3 LB: > { %s25_s17 = sadd.s32 1, %s1313_s15  ;;  %p48_p1 = scmp.ne.s32.totalorder %s1305_s13, %s1301_s12  ;;  %s1317_s16 = sphi %s1348_s16, %s13_s16   ;;  %s1313_s15 = sphi %s1346_s15, %s1495_s15   ;;  %s1309_s14 = sphi %s1344_s14, %s1494_s14   ;;  %s1305_s13 = sphi %s1342_s13, %s1493_s13   ;;  %s1301_s12 = sphi %s1340_s12, %s1492_s12  }
   0x4   : > { %p26_p0 = scmp.ge.s32.totalorder %s25_s17, 49  ;;  %p49_p2 = scmp.eq.s32.totalorder %s1317_s16, 0 }
   0x5   : > { %s41_s19 = sadd.s32 1, %s1305_s13  ;;  %p991_p5 = scmp.ge.s32.totalorder %s1317_s16, 49 }
   0x6   : > { %s1497_s17 = smov (%p26_p0, %s25_s17), 0  ;;  %p50_p3 = por %p49_p2, %p48_p1 }
   0x7   : > { %s37_s18 = ssub.s32 %s1313_s15, %s1497_s17  ;;  %162 = sbr.rel (%p991_p5) target bundleno = 26 (0x1a), region = 20 }
   0x8   : > { %p39_p4 = scmp.eq.s32.totalorder %s37_s18, 0 }
   0xa   : > { %s1375_s20 = scalar_select %p39_p4, %s1305_s13, %s41_s19  }
   0xe   : > { %165 = sbr.rel (!%p50_p3) target bundleno = 26 (0x1a), region = 24  ;;  %s167_s21 = sand.u32 (%p50_p3), 1, %s1305_s13  }
   0xf   : > { %s1054_s22 = sshll.u32 (%p50_p3), %s1313_s15, 3  ;;  %s992_s23 = sshll.u32 (%p50_p3), %s167_s21, 7 }
  0x10   : > { %s1383_s26 = scalar_lea.vmem (%p50_p3), %s1488_s0, %s1054_s22  ;;  %s169_s27 = scalar_lea.vmem (%p50_p3), [#allocation3], %s992_s23 }
  0x11   : > { %v233_v0 = vld [vmem:[%s1383_s26] sm:$0xff] (%p50_p3)  ;;  %v235_v1 = vld [vmem:[%s1383_s26 + $0x188] sm:$0xff] (%p50_p3)  ;;  %v237_v2 = vld [vmem:[%s1383_s26 + $0x310] sm:$0xff] (%p50_p3) }
  0x12   : > { %234 = vst [vmem:[%s169_s27] sm:$0xff] (%p50_p3), %v233_v0  ;;  %236 = vst [vmem:[%s169_s27 + $0x8] sm:$0xff] (%p50_p3), %v235_v1  ;;  %v239_v3 = vld [vmem:[%s1383_s26 + $0x498] sm:$0xff] (%p50_p3)  ;;  %v241_v4 = vld [vmem:[%s1383_s26 + $0x620] sm:$0xff] (%p50_p3) }
  0x13   : > { %238 = vst [vmem:[%s169_s27 + $0x10] sm:$0xff] (%p50_p3), %v237_v2  ;;  %v243_v5 = vld [vmem:[%s1383_s26 + $0x7a8] sm:$0xff] (%p50_p3)  ;;  %240 = vst [vmem:[%s169_s27 + $0x18] sm:$0xff] (%p50_p3), %v239_v3  ;;  %v245_v6 = vld [vmem:[%s1383_s26 + $0x930] sm:$0xff] (%p50_p3) }
  0x14   : > { %242 = vst [vmem:[%s169_s27 + $0x20] sm:$0xff] (%p50_p3), %v241_v4  ;;  %244 = vst [vmem:[%s169_s27 + $0x28] sm:$0xff] (%p50_p3), %v243_v5  ;;  %v247_v7 = vld [vmem:[%s1383_s26 + $0xab8] sm:$0xff] (%p50_p3)  ;;  %v249_v8 = vld [vmem:[%s1383_s26 + $0xc40] sm:$0xff] (%p50_p3) }
  0x15   : > { %246 = vst [vmem:[%s169_s27 + $0x30] sm:$0xff] %v245_v6  ;;  %248 = vst [vmem:[%s169_s27 + $0x38] sm:$0xff] %v247_v7  ;;  %v251_v9 = vld [vmem:[%s1383_s26 + $0xdc8] sm:$0xff]  ;;  %v253_v10 = vld [vmem:[%s1383_s26 + $0xf50] sm:$0xff] }
  0x16   : > { %250 = vst [vmem:[%s169_s27 + $0x40] sm:$0xff] %v249_v8  ;;  %v255_v11 = vld [vmem:[%s1383_s26 + $0x10d8] sm:$0xff]  ;;  %252 = vst [vmem:[%s169_s27 + $0x48] sm:$0xff] %v251_v9  ;;  %v257_v12 = vld [vmem:[%s1383_s26 + $0x1260] sm:$0xff] }
  0x17   : > { %254 = vst [vmem:[%s169_s27 + $0x50] sm:$0xff] %v253_v10  ;;  %256 = vst [vmem:[%s169_s27 + $0x58] sm:$0xff] %v255_v11  ;;  %v259_v13 = vld [vmem:[%s1383_s26 + $0x13e8] sm:$0xff]  ;;  %v261_v14 = vld [vmem:[%s1383_s26 + $0x1570] sm:$0xff] }
  0x18   : > { %258 = vst [vmem:[%s169_s27 + $0x60] sm:$0xff] %v257_v12  ;;  %260 = vst [vmem:[%s169_s27 + $0x68] sm:$0xff] %v259_v13  ;;  %v263_v15 = vld [vmem:[%s1383_s26 + $0x16f8] sm:$0xff] }
  0x19   : > { %262 = vst [vmem:[%s169_s27 + $0x70] sm:$0xff] %v261_v14  ;;  %264 = vst [vmem:[%s169_s27 + $0x78] sm:$0xff] %v263_v15 }
  0x1a PF: > { %p995_p6 = scmp.ge.s32.totalorder %s1317_s16, 1  ;;  %p281_p7 = scmp.lt.s32.totalorder %s1317_s16, 50 }
  0x1c   : > { %p282_p8 = pnand %p995_p6, %p281_p7 }
  0x1d   : > { %s288_s28 = sand.u32 (!%p282_p8), 1, %s1301_s12   ;;  %s997_s29 = sshll.u32 (!%p282_p8), %s1309_s14, 5 }
  0x1e   : > { %285 = sbr.rel (%p282_p8) target bundleno = 339 (0x153), region = 66  ;;  %s996_s30 = sshll.u32 (!%p282_p8), %s288_s28, 7 }
  0x1f   : > { %p328_p9 = scmp.lt.s32.totalorder (!%p282_p8), %s997_s29, 1567  ;;  %s1410_s8 = scalar_lea.vmem (!%p282_p8), [#allocation3], %s996_s30 }
  0x20   : > { %p999_p10 = scmp.ne.s32.totalorder (!%p282_p8), %s1309_s14, 0 }
  0x25   : > { %s1499_s29 = smov (!%p328_p9, %s997_s29), 1567  ;;  %352 = sbr.rel (%p999_p10) target bundleno = 47 (0x2f), region = 74 }
  0x26   : > { %s998_s4 = sshll.u32 %s1499_s29, 2  ;;  %v1319_v16 = vmov (!%p999_p10), 0.0  }
  0x27   : > { %s1408_s7 = scalar_lea.vmem %s1489_s1, %s998_s4  ;;  %353 = vst [vmem:[#allocation2] sm:$0xff] (!%p999_p10), %v1319_v16  ;;  %354 = vst [vmem:[#allocation2 + $0x8] sm:$0xff] (!%p999_p10), %v1319_v16 }
  0x28   : > { %355 = vst [vmem:[#allocation2 + $0x10] sm:$0xff] (!%p999_p10), %v1319_v16  ;;  %356 = vst [vmem:[#allocation2 + $0x18] sm:$0xff] (!%p999_p10), %v1319_v16 }
  0x29   : > { %357 = vst [vmem:[#allocation2 + $0x20] sm:$0xff] (!%p999_p10), %v1319_v16  ;;  %358 = vst [vmem:[#allocation2 + $0x28] sm:$0xff] (!%p999_p10), %v1319_v16 }
  0x2a   : > { %359 = vst [vmem:[#allocation2 + $0x30] sm:$0xff] (!%p999_p10), %v1319_v16  ;;  %360 = vst [vmem:[#allocation2 + $0x38] sm:$0xff] (!%p999_p10), %v1319_v16 }
  0x2b   : > { %361 = vst [vmem:[#allocation2 + $0x40] sm:$0xff] (!%p999_p10), %v1319_v16  ;;  %362 = vst [vmem:[#allocation2 + $0x48] sm:$0xff] (!%p999_p10), %v1319_v16 }
  0x2c   : > { %363 = vst [vmem:[#allocation2 + $0x50] sm:$0xff] %v1319_v16  ;;  %364 = vst [vmem:[#allocation2 + $0x58] sm:$0xff] %v1319_v16 }
  0x2d   : > { %365 = vst [vmem:[#allocation2 + $0x60] sm:$0xff] %v1319_v16  ;;  %366 = vst [vmem:[#allocation2 + $0x68] sm:$0xff] %v1319_v16 }
  0x2e   : > { %367 = vst [vmem:[#allocation2 + $0x70] sm:$0xff] %v1319_v16  ;;  %368 = vst [vmem:[#allocation2 + $0x78] sm:$0xff] %v1319_v16 }
  0x2f PF: > { %v1239_v17 = vld [vmem:[%s1408_s7 + $0x40] sm:$0xff]   ;;  %v1241_v19 = vld [vmem:[%s1408_s7 + $0x48] sm:$0xff]   ;;  %v1243_v21 = vld [vmem:[%s1408_s7 + $0x50] sm:$0xff]   ;;  %p1032_p11 = scmp.ne.s32.totalorder %s1309_s14, 48 }
  0x30   : > { %v1240_v18 = vld [vmem:[%s1408_s7] sm:$0xff]   ;;  %1118 = vmatprep.subr.bf16.mxu0 %v1239_v17  ;;  %1182 = vmatprep.subr.bf16.mxu1 %v1239_v17  ;;  %v1242_v20 = vld [vmem:[%s1408_s7 + $0x8] sm:$0xff]   ;;  %v1244_v22 = vld [vmem:[%s1408_s7 + $0x10] sm:$0xff]  }
  0x31   : > { %1119 = vmatpush3.bf16.msra.mxu0 %v1240_v18  ;;  %1190 = vmatpush3.bf16.msra.mxu1 %v1240_v18  ;;  %v1245_v23 = vld [vmem:[%s1408_s7 + $0x58] sm:$0xff]   ;;  %v1247_v25 = vld [vmem:[%s1408_s7 + $0x60] sm:$0xff]   ;;  %v1249_v27 = vld [vmem:[%s1408_s7 + $0x68] sm:$0xff]  }
  0x32   : > { %1120 = vmatprep.subr.bf16.mxu0 %v1241_v19  ;;  %1183 = vmatprep.subr.bf16.mxu1 %v1241_v19  ;;  %v1246_v24 = vld [vmem:[%s1408_s7 + $0x18] sm:$0xff]   ;;  %v1248_v26 = vld [vmem:[%s1408_s7 + $0x20] sm:$0xff]   ;;  %v1250_v30 = vld [vmem:[%s1408_s7 + $0x28] sm:$0xff]  }
  0x33   : > { %v1257_v28 = vld [vmem:[%s1410_s8 + $0x4] ss:$8 sps:$4 sm:$0xff]   ;;  %v1251_v31 = vld [vmem:[%s1408_s7 + $0x70] sm:$0xff]   ;;  %v1253_v33 = vld [vmem:[%s1408_s7 + $0x78] sm:$0xff]  }
  0x34   : > { %v1260_v29 = vld [vmem:[%s1410_s8 + $0x44] ss:$8 sps:$4 sm:$0xff]   ;;  %641 = vmatprep.mubr.bf16.mxu0 %v1257_v28  ;;  %v1252_v32 = vld [vmem:[%s1408_s7 + $0x30] sm:$0xff]   ;;  %v1254_v34 = vld [vmem:[%s1408_s7 + $0x38] sm:$0xff]  }
  0x35   : > { %1121 = vmatpush3.bf16.msra.mxu0 %v1242_v20  ;;  %1191 = vmatpush3.bf16.msra.mxu1 %v1242_v20  ;;  %v1255_v35 = vld [vmem:[%s1410_s8] ss:$8 sps:$4 sm:$0xff]   ;;  %v1261_v37 = vld [vmem:[%s1410_s8 + $0x14] ss:$8 sps:$4 sm:$0xff]   ;;  %v1265_v39 = vld [vmem:[%s1410_s8 + $0x10] ss:$8 sps:$4 sm:$0xff]  }
  0x36   : > { %1122 = vmatprep.subr.bf16.mxu0 %v1243_v21  ;;  %1184 = vmatprep.subr.bf16.mxu1 %v1243_v21  ;;  %v1258_v36 = vld [vmem:[%s1410_s8 + $0x40] ss:$8 sps:$4 sm:$0xff]   ;;  %v1263_v38 = vld [vmem:[%s1410_s8 + $0x54] ss:$8 sps:$4 sm:$0xff]   ;;  %v1266_v40 = vld [vmem:[%s1410_s8 + $0x50] ss:$8 sps:$4 sm:$0xff]  }
  0x37   : > { %673 = vmatprep.mubr.bf16.mxu1 %v1260_v29  ;;  %v1267_v41 = vld [vmem:[%s1410_s8 + $0x24] ss:$8 sps:$4 sm:$0xff]   ;;  %v1271_v43 = vld [vmem:[%s1410_s8 + $0x20] ss:$8 sps:$4 sm:$0xff]   ;;  %v1273_v45 = vld [vmem:[%s1410_s8 + $0x34] ss:$8 sps:$4 sm:$0xff]  }
  0x38   : > { %v1269_v42 = vld [vmem:[%s1410_s8 + $0x64] ss:$8 sps:$4 sm:$0xff]   ;;  %v1272_v44 = vld [vmem:[%s1410_s8 + $0x60] ss:$8 sps:$4 sm:$0xff]   ;;  %v1275_v46 = vld [vmem:[%s1410_s8 + $0x74] ss:$8 sps:$4 sm:$0xff]  }
  0x39   : > { %1123 = vmatpush3.bf16.msra.mxu0 %v1244_v22  ;;  %1192 = vmatpush3.bf16.msra.mxu1 %v1244_v22  ;;  %v1277_v47 = vld [vmem:[%s1410_s8 + $0x30] ss:$8 sps:$4 sm:$0xff]   ;;  %v369_v51 = vld [vmem:[#allocation2] sm:$0xff]  ;;  %v370_v59 = vld [vmem:[#allocation2 + $0x8] sm:$0xff] }
  0x3a   : > { %1124 = vmatprep.subr.bf16.mxu0 %v1245_v23  ;;  %1185 = vmatprep.subr.bf16.mxu1 %v1245_v23  ;;  %v1278_v48 = vld [vmem:[%s1410_s8 + $0x70] ss:$8 sps:$4 sm:$0xff]   ;;  %v377_v53 = vld [vmem:[#allocation2 + $0x40] sm:$0xff]  ;;  %v378_v61 = vld [vmem:[#allocation2 + $0x48] sm:$0xff] }
  0x3b   : > { %v371_v7 = vld [vmem:[#allocation2 + $0x10] sm:$0xff]  ;;  %v372_v15 = vld [vmem:[#allocation2 + $0x18] sm:$0xff]  ;;  %v381_v29 = vld [vmem:[#allocation2 + $0x60] sm:$0xff] }
  0x3c   : > { %v379_v9 = vld [vmem:[#allocation2 + $0x50] sm:$0xff]  ;;  %v380_v17 = vld [vmem:[#allocation2 + $0x58] sm:$0xff] }
  0x3d   : > { %1125 = vmatpush3.bf16.msra.mxu0 %v1246_v24  ;;  %1193 = vmatpush3.bf16.msra.mxu1 %v1246_v24 }
  0x3e   : > { %1126 = vmatprep.subr.bf16.mxu0 %v1247_v25  ;;  %1186 = vmatprep.subr.bf16.mxu1 %v1247_v25 }
  0x41   : > { %1127 = vmatpush3.bf16.msra.mxu0 %v1248_v26  ;;  %1194 = vmatpush3.bf16.msra.mxu1 %v1248_v26 }
  0x42   : > { %1128 = vmatprep.subr.bf16.mxu0 %v1249_v27  ;;  %1187 = vmatprep.subr.bf16.mxu1 %v1249_v27  ;;  %v373_v27 = vld [vmem:[#allocation2 + $0x20] sm:$0xff] }
  0x45   : > { %1129 = vmatpush3.bf16.msra.mxu0 %v1250_v30  ;;  %1195 = vmatpush3.bf16.msra.mxu1 %v1250_v30 }
  0x46   : > { %1130 = vmatprep.subr.bf16.mxu0 %v1251_v31  ;;  %1188 = vmatprep.subr.bf16.mxu1 %v1251_v31 }
  0x49   : > { %1131 = vmatpush3.bf16.msra.mxu0 %v1252_v32  ;;  %1196 = vmatpush3.bf16.msra.mxu1 %v1252_v32 }
  0x4a   : > { %1132 = vmatprep.subr.bf16.mxu0 %v1253_v33  ;;  %1189 = vmatprep.subr.bf16.mxu1 %v1253_v33 }
  0x4d   : > { %1133 = vmatpush3.bf16.msra.mxu0 %v1254_v34  ;;  %1197 = vmatpush3.bf16.msra.mxu1 %v1254_v34 }
  0x50   : > { %642 = vmatmul.mubr.bf16.vlgmr.msra.gmra.mrb[0].mxu0 %v1255_v35  ;;  %674 = vmatmul.mubr.bf16.vlgmr.msra.gmra.mrb[0].mxu1 %v1258_v36  ;;  %v374_v35 = vld [vmem:[#allocation2 + $0x28] sm:$0xff] }
  0x51   : > { %649 = vmatprep.mubr.bf16.mxu0 %v1261_v37  ;;  %681 = vmatprep.mubr.bf16.mxu1 %v1263_v38  ;;  %v382_v37 = vld [vmem:[#allocation2 + $0x68] sm:$0xff] }
  0x58   : > { %650 = vmatmul.mubr.bf16.gmra.mrb[4].mxu0 %v1265_v39  ;;  %682 = vmatmul.mubr.bf16.gmra.mrb[4].mxu1 %v1266_v40 }
  0x59   : > { %657 = vmatprep.mubr.bf16.mxu0 %v1267_v41  ;;  %689 = vmatprep.mubr.bf16.mxu1 %v1269_v42 }
  0x60   : > { %658 = vmatmul.mubr.bf16.gmra.mrb[8].mxu0 %v1271_v43  ;;  %690 = vmatmul.mubr.bf16.gmra.mrb[8].mxu1 %v1272_v44 }
  0x61   : > { %665 = vmatprep.mubr.bf16.mxu0 %v1273_v45  ;;  %697 = vmatprep.mubr.bf16.mxu1 %v1275_v46 }
  0x68   : > { %666 = vmatmul.mubr.bf16.gmra.mrb[12].mxu0 %v1277_v47  ;;  %698 = vmatmul.mubr.bf16.gmra.mrb[12].mxu1 %v1278_v48  ;;  %v375_v47 = vld [vmem:[#allocation2 + $0x30] sm:$0xff] }
 0x123   : > { %v1134_v49 = vpop.f32.mrb[0].mxu0  ;;  %v1158_v50 = vpop.f32.mrb[0].mxu1 }
 0x124   : > { %v1135_v52 = vpop.f32.mrb[1].mxu0  ;;  %v1159_v54 = vpop.f32.mrb[1].mxu1 }
 0x125   : > { %v1136_v55 = vadd.f32 %v1135_v52, %v1134_v49  ;;  %v1160_v56 = vadd.f32 %v1159_v54, %v1158_v50  ;;  %v1137_v57 = vpop.f32.mrb[2].mxu0  ;;  %v1161_v58 = vpop.f32.mrb[2].mxu1  ;;  %v383_v49 = vld [vmem:[#allocation2 + $0x70] sm:$0xff] }
 0x126   : > { %v1138_v60 = vpop.f32.mrb[3].mxu0  ;;  %v1162_v62 = vpop.f32.mrb[3].mxu1 }
 0x127   : > { %v706_v63 = vadd.f32 %v1136_v55, %v369_v51  ;;  %v714_v0 = vadd.f32 %v1160_v56, %v377_v53  ;;  %v1139_v1 = vadd.f32 %v1138_v60, %v1137_v57  ;;  %v1163_v2 = vadd.f32 %v1162_v62, %v1161_v58  ;;  %v376_v55 = vld [vmem:[#allocation2 + $0x38] sm:$0xff] }
 0x128   : > { %v384_v57 = vld [vmem:[#allocation2 + $0x78] sm:$0xff] }
 0x129   : > { %722 = vst [vmem:[#allocation2] sm:$0xff] %v706_v63  ;;  %730 = vst [vmem:[#allocation2 + $0x40] sm:$0xff] %v714_v0  ;;  %v707_v3 = vadd.f32 %v1139_v1, %v370_v59  ;;  %v715_v4 = vadd.f32 %v1163_v2, %v378_v61 }
 0x12b   : > { %723 = vst [vmem:[#allocation2 + $0x8] sm:$0xff] %v707_v3  ;;  %731 = vst [vmem:[#allocation2 + $0x48] sm:$0xff] %v715_v4  ;;  %v1140_v5 = vpop.f32.mrb[4].mxu0  ;;  %v1164_v6 = vpop.f32.mrb[4].mxu1  ;;  %v1033_v3 = vld [vmem:[%s1490_s2] ss:$0 sm:$0xff] (!%p1032_p11) }
 0x12c   : > { %v1141_v8 = vpop.f32.mrb[5].mxu0  ;;  %v1165_v10 = vpop.f32.mrb[5].mxu1 }
 0x12d   : > { %v1142_v11 = vadd.f32 %v1141_v8, %v1140_v5  ;;  %v1166_v12 = vadd.f32 %v1165_v10, %v1164_v6  ;;  %v1143_v13 = vpop.f32.mrb[6].mxu0  ;;  %v1167_v14 = vpop.f32.mrb[6].mxu1 }
 0x12e   : > { %v1144_v16 = vpop.f32.mrb[7].mxu0  ;;  %v1168_v18 = vpop.f32.mrb[7].mxu1 }
 0x12f   : > { %v708_v19 = vadd.f32 %v1142_v11, %v371_v7  ;;  %v716_v20 = vadd.f32 %v1166_v12, %v379_v9  ;;  %v1145_v21 = vadd.f32 %v1144_v16, %v1143_v13  ;;  %v1169_v22 = vadd.f32 %v1168_v18, %v1167_v14 }
 0x130   : > { %v742_v1 = vld [vmem:[#allocation2] sm:$0xff] (!%p1032_p11) }
 0x131   : > { %724 = vst [vmem:[#allocation2 + $0x10] sm:$0xff] %v708_v19  ;;  %732 = vst [vmem:[#allocation2 + $0x50] sm:$0xff] %v716_v20  ;;  %v709_v23 = vadd.f32 %v1145_v21, %v372_v15  ;;  %v717_v24 = vadd.f32 %v1169_v22, %v380_v17  ;;  %v765_v4 = vadd.f32 (!%p1032_p11), %v1033_v3, %v742_v1  ;;  %v750_v19 = vld [vmem:[#allocation2 + $0x40] sm:$0xff] (!%p1032_p11) }
 0x132   : > { %v743_v2 = vld [vmem:[#allocation2 + $0x8] sm:$0xff] (!%p1032_p11) }
 0x133   : > { %725 = vst [vmem:[#allocation2 + $0x18] sm:$0xff] %v709_v23  ;;  %733 = vst [vmem:[#allocation2 + $0x58] sm:$0xff] %v717_v24  ;;  %v1146_v25 = vpop.f32.mrb[8].mxu0  ;;  %v1170_v26 = vpop.f32.mrb[8].mxu1  ;;  %v766_v5 = vadd.f32 (!%p1032_p11), %v1033_v3, %v743_v2  ;;  %v781_v15 = vmax.f32 (!%p1032_p11), %v765_v4, 0.0  ;;  %v751_v20 = vld [vmem:[#allocation2 + $0x48] sm:$0xff] (!%p1032_p11) }
 0x134   : > { %v1147_v28 = vpop.f32.mrb[9].mxu0  ;;  %v1171_v30 = vpop.f32.mrb[9].mxu1 }
 0x135   : > { %v1148_v31 = vadd.f32 %v1147_v28, %v1146_v25  ;;  %v1172_v32 = vadd.f32 %v1171_v30, %v1170_v26  ;;  %v1149_v33 = vpop.f32.mrb[10].mxu0  ;;  %v1173_v34 = vpop.f32.mrb[10].mxu1  ;;  %v782_v16 = vmax.f32 (!%p1032_p11), %v766_v5, 0.0 }
 0x136   : > { %v1150_v36 = vpop.f32.mrb[11].mxu0  ;;  %v1174_v38 = vpop.f32.mrb[11].mxu1 }
 0x137   : > { %v710_v39 = vadd.f32 %v1148_v31, %v373_v27  ;;  %v718_v40 = vadd.f32 %v1172_v32, %v381_v29  ;;  %v1151_v41 = vadd.f32 %v1150_v36, %v1149_v33  ;;  %v1175_v42 = vadd.f32 %v1174_v38, %v1173_v34 }
 0x138   : > { %v744_v6 = vld [vmem:[#allocation2 + $0x10] sm:$0xff] (!%p1032_p11)  ;;  %v1074_v28 = vpack.c.bf16 (!%p1032_p11), %v782_v16, %v781_v15  ;;  %v773_v31 = vadd.f32 (!%p1032_p11), %v1033_v3, %v750_v19 }
 0x139   : > { %726 = vst [vmem:[#allocation2 + $0x20] sm:$0xff] %v710_v39  ;;  %734 = vst [vmem:[#allocation2 + $0x60] sm:$0xff] %v718_v40  ;;  %v711_v43 = vadd.f32 %v1151_v41, %v374_v35  ;;  %v719_v44 = vadd.f32 %v1175_v42, %v382_v37  ;;  %v767_v9 = vadd.f32 (!%p1032_p11), %v1033_v3, %v744_v6  ;;  %v752_v21 = vld [vmem:[#allocation2 + $0x50] sm:$0xff] (!%p1032_p11) }
 0x13a   : > { %v745_v7 = vld [vmem:[#allocation2 + $0x18] sm:$0xff] (!%p1032_p11)  ;;  %v774_v35 = vadd.f32 (!%p1032_p11), %v1033_v3, %v751_v20  ;;  %v775_v36 = vadd.f32 (!%p1032_p11), %v1033_v3, %v752_v21  ;;  %1075 = vst [vmem:[%s1491_s3] sm:$0xff] (!%p1032_p11), %v1074_v28   ;;  %v789_v40 = vmax.f32 (!%p1032_p11), %v773_v31, 0.0 }
 0x13b   : > { %727 = vst [vmem:[#allocation2 + $0x28] sm:$0xff] %v711_v43  ;;  %735 = vst [vmem:[#allocation2 + $0x68] sm:$0xff] %v719_v44  ;;  %v1152_v45 = vpop.f32.mrb[12].mxu0  ;;  %v1176_v46 = vpop.f32.mrb[12].mxu1  ;;  %v768_v10 = vadd.f32 (!%p1032_p11), %v1033_v3, %v745_v7  ;;  %v783_v22 = vmax.f32 (!%p1032_p11), %v767_v9, 0.0  ;;  %v753_v26 = vld [vmem:[#allocation2 + $0x58] sm:$0xff] (!%p1032_p11) }
 0x13c   : > { %v1153_v48 = vpop.f32.mrb[13].mxu0  ;;  %v1177_v50 = vpop.f32.mrb[13].mxu1  ;;  %v776_v41 = vadd.f32 (!%p1032_p11), %v1033_v3, %v753_v26  ;;  %v790_v44 = vmax.f32 (!%p1032_p11), %v774_v35, 0.0 }
 0x13d   : > { %v1154_v51 = vadd.f32 %v1153_v48, %v1152_v45  ;;  %v1178_v52 = vadd.f32 %v1177_v50, %v1176_v46  ;;  %v1155_v53 = vpop.f32.mrb[14].mxu0  ;;  %v1179_v54 = vpop.f32.mrb[14].mxu1  ;;  %741 = sbr.rel (%p1032_p11) target bundleno = 339 (0x153), region = 78  ;;  %v784_v23 = vmax.f32 (!%p1032_p11), %v768_v10, 0.0  ;;  %v791_v45 = vmax.f32 (!%p1032_p11), %v775_v36, 0.0 }
 0x13e   : > { %v1156_v56 = vpop.f32.mrb[15].mxu0  ;;  %v1180_v58 = vpop.f32.mrb[15].mxu1 }
 0x13f   : > { %v712_v59 = vadd.f32 %v1154_v51, %v375_v47  ;;  %v720_v60 = vadd.f32 %v1178_v52, %v383_v49  ;;  %v1157_v61 = vadd.f32 %v1156_v56, %v1155_v53  ;;  %v1181_v62 = vadd.f32 %v1180_v58, %v1179_v54 }
 0x140   : > { %v746_v8 = vld [vmem:[#allocation2 + $0x20] sm:$0xff] (!%p1032_p11)  ;;  %v1079_v33 = vpack.c.bf16 (!%p1032_p11), %v784_v23, %v783_v22  ;;  %v792_v47 = vmax.f32 (!%p1032_p11), %v776_v41, 0.0  ;;  %v1094_v51 = vpack.c.bf16 (!%p1032_p11), %v790_v44, %v789_v40 }
 0x141   : > { %728 = vst [vmem:[#allocation2 + $0x30] sm:$0xff] %v712_v59  ;;  %736 = vst [vmem:[#allocation2 + $0x70] sm:$0xff] %v720_v60  ;;  %v713_v63 = vadd.f32 %v1157_v61, %v376_v55  ;;  %v721_v0 = vadd.f32 %v1181_v62, %v384_v57  ;;  %v769_v12 = vadd.f32 (!%p1032_p11), %v1033_v3, %v746_v8  ;;  %v754_v27 = vld [vmem:[#allocation2 + $0x60] sm:$0xff] (!%p1032_p11) }
 0x142   : > { %v747_v11 = vld [vmem:[#allocation2 + $0x28] sm:$0xff] (!%p1032_p11)  ;;  %v777_v42 = vadd.f32 (!%p1032_p11), %v1033_v3, %v754_v27  ;;  %1111 = vst [vmem:[%s1491_s3 + $0x8] sm:$0xff] (!%p1032_p11), %v1079_v33   ;;  %v1099_v53 = vpack.c.bf16 (!%p1032_p11), %v792_v47, %v791_v45  ;;  %1114 = vst [vmem:[%s1491_s3 + $0x20] sm:$0xff] (!%p1032_p11), %v1094_v51  }
 0x143   : > { %729 = vst [vmem:[#allocation2 + $0x38] sm:$0xff] %v713_v63  ;;  %737 = vst [vmem:[#allocation2 + $0x78] sm:$0xff] %v721_v0  ;;  %v770_v17 = vadd.f32 (!%p1032_p11), %v1033_v3, %v747_v11  ;;  %v785_v24 = vmax.f32 (!%p1032_p11), %v769_v12, 0.0  ;;  %v755_v32 = vld [vmem:[#allocation2 + $0x68] sm:$0xff] (!%p1032_p11) }
 0x144   : > { %v778_v46 = vadd.f32 %v1033_v3, %v755_v32  ;;  %v793_v48 = vmax.f32 %v777_v42, 0.0  ;;  %1115 = vst [vmem:[%s1491_s3 + $0x28] sm:$0xff] %v1099_v53  }
 0x145   : > { %v786_v29 = vmax.f32 %v770_v17, 0.0 }
 0x146   : > { %v794_v52 = vmax.f32 %v778_v46, 0.0 }
 0x147   : > { %v1084_v39 = vpack.c.bf16 %v786_v29, %v785_v24 }
 0x148   : > { %v748_v13 = vld [vmem:[#allocation2 + $0x30] sm:$0xff]  ;;  %v1104_v56 = vpack.c.bf16 %v794_v52, %v793_v48 }
 0x149   : > { %v771_v18 = vadd.f32 %v1033_v3, %v748_v13  ;;  %v756_v37 = vld [vmem:[#allocation2 + $0x70] sm:$0xff]  ;;  %1112 = vst [vmem:[%s1491_s3 + $0x10] sm:$0xff] %v1084_v39  }
 0x14a   : > { %v749_v14 = vld [vmem:[#allocation2 + $0x38] sm:$0xff]  ;;  %v779_v49 = vadd.f32 %v1033_v3, %v756_v37  ;;  %1116 = vst [vmem:[%s1491_s3 + $0x30] sm:$0xff] %v1104_v56  }
 0x14b   : > { %v772_v25 = vadd.f32 %v1033_v3, %v749_v14  ;;  %v787_v30 = vmax.f32 %v771_v18, 0.0  ;;  %v757_v38 = vld [vmem:[#allocation2 + $0x78] sm:$0xff] }
 0x14c   : > { %v780_v50 = vadd.f32 %v1033_v3, %v757_v38  ;;  %v795_v54 = vmax.f32 %v779_v49, 0.0 }
 0x14d   : > { %v788_v34 = vmax.f32 %v772_v25, 0.0 }
 0x14e   : > { %v796_v55 = vmax.f32 %v780_v50, 0.0 }
 0x14f   : > { %v1089_v43 = vpack.c.bf16 %v788_v34, %v787_v30 }
 0x150   : > { %v1109_v57 = vpack.c.bf16 %v796_v55, %v795_v54 }
 0x151   : > { %1113 = vst [vmem:[%s1491_s3 + $0x18] sm:$0xff] %v1089_v43  }
 0x152   : > { %1117 = vst [vmem:[%s1491_s3 + $0x38] sm:$0xff] %v1109_v57  }
 0x153 PF: > { %s13_s16 = sadd.s32 1, %s1317_s16   ;;  %s1492_s12 = smov %s1305_s13 }
 0x154   : > { %p10_p12 = scmp.ge.s32.totalorder %s13_s16, 51   ;;  %s1493_s13 = smov %s1375_s20 }
 0x155   : > { %s1494_s14 = smov %s1313_s15  ;;  %s1495_s15 = smov %s1497_s17 }
 0x156   :  { %12 = sbr.rel (!%p10_p12) target bundleno = 3 (0x3), region = 119 }

// kernel: resnet_forward.18
= control target key start
LH: loop header
LB: loop body
LE: loop exit
PB: predicated region body
PF: predicated region fallthrough
CT: control target
= control target key end

     0   :  { %s796_s12 = smov 0   ;;  %s798_s13 = smov 0   ;;  %s889_s0 = inlined_call_operand.vmem [shape: bf16[32,1152], index: 0, kind: input, shape index: {}]   ;;  %s890_s1 = inlined_call_operand.vmem [shape: bf16[1152,128], index: 1, kind: input, shape index: {}]   ;;  %s891_s2 = inlined_call_operand.vmem [shape: f32[1,128], index: 2, kind: input, shape index: {}]   ;;  %s892_s3 = inlined_call_operand.vmem [shape: bf16[32,128], index: 3, kind: output, shape index: {}]  }
   0x1   :  { %s800_s14 = smov 0   ;;  %s802_s15 = smov 0  }
   0x2   :  { %s804_s16 = smov 0  }
   0x3 LB: > { %s25_s17 = sadd.s32 1, %s769_s15  ;;  %p48_p1 = scmp.ne.s32.totalorder %s761_s13, %s757_s12  ;;  %s773_s16 = sphi %s804_s16, %s13_s16   ;;  %s769_s15 = sphi %s802_s15, %s896_s15   ;;  %s765_s14 = sphi %s800_s14, %s895_s14   ;;  %s761_s13 = sphi %s798_s13, %s894_s13   ;;  %s757_s12 = sphi %s796_s12, %s893_s12  }
   0x4   : > { %p26_p0 = scmp.ge.s32.totalorder %s25_s17, 9  ;;  %p49_p2 = scmp.eq.s32.totalorder %s773_s16, 0 }
   0x5   : > { %s41_s19 = sadd.s32 1, %s761_s13  ;;  %p611_p5 = scmp.ge.s32.totalorder %s773_s16, 9 }
   0x6   : > { %s898_s17 = smov (%p26_p0, %s25_s17), 0  ;;  %p50_p3 = por %p49_p2, %p48_p1 }
   0x7   : > { %s37_s18 = ssub.s32 %s769_s15, %s898_s17  ;;  %162 = sbr.rel (%p611_p5) target bundleno = 21 (0x15), region = 20 }
   0x8   : > { %p39_p4 = scmp.eq.s32.totalorder %s37_s18, 0 }
   0xa   : > { %s831_s20 = scalar_select %p39_p4, %s761_s13, %s41_s19  }
   0xe   : > { %165 = sbr.rel (!%p50_p3) target bundleno = 21 (0x15), region = 24  ;;  %s167_s21 = sand.u32 (%p50_p3), 1, %s761_s13  }
   0xf   : > { %s613_s22 = sshll.u32 (%p50_p3), %s769_s15, 2  ;;  %s612_s23 = sshll.u32 (%p50_p3), %s167_s21, 4 }
  0x10   : > { %s174_s26 = scalar_lea.vmem (%p50_p3), %s889_s0, %s613_s22  ;;  %s169_s27 = scalar_lea.vmem (%p50_p3), [#allocation3], %s612_s23 }
  0x11   : > { %v190_v0 = vld [vmem:[%s174_s26] sm:$0xf] (%p50_p3)  ;;  %v192_v1 = vld [vmem:[%s174_s26 + $0x24] sm:$0xf] (%p50_p3)  ;;  %v194_v2 = vld [vmem:[%s174_s26 + $0x48] sm:$0xf] (%p50_p3) }
  0x12   : > { %191 = vst [vmem:[%s169_s27] sm:$0xf] (%p50_p3), %v190_v0  ;;  %193 = vst [vmem:[%s169_s27 + $0x4] sm:$0xf] (%p50_p3), %v192_v1  ;;  %v196_v3 = vld [vmem:[%s174_s26 + $0x6c] sm:$0xf] (%p50_p3) }
  0x13   : > { %195 = vst [vmem:[%s169_s27 + $0x8] sm:$0xf] (%p50_p3), %v194_v2  ;;  %197 = vst [vmem:[%s169_s27 + $0xc] sm:$0xf] (%p50_p3), %v196_v3 }
  0x15 PF: > { %p614_p6 = scmp.ge.s32.totalorder %s773_s16, 1  ;;  %p239_p7 = scmp.lt.s32.totalorder %s773_s16, 10 }
  0x17   : > { %p240_p8 = pnand %p614_p6, %p239_p7 }
  0x18   : > { %s246_s28 = sand.u32 (!%p240_p8), 1, %s757_s12   ;;  %s616_s29 = sshll.u32 (!%p240_p8), %s765_s14, 4 }
  0x19   : > { %243 = sbr.rel (%p240_p8) target bundleno = 304 (0x130), region = 69  ;;  %s843_s30 = sshll.u32 (!%p240_p8), %s246_s28, 4 }
  0x1a   : > { %p285_p9 = scmp.lt.s32.totalorder (!%p240_p8), %s616_s29, 143  ;;  %s248_s8 = scalar_lea.vmem (!%p240_p8), [#allocation3], %s843_s30 }
  0x1b   : > { %p618_p10 = scmp.ne.s32.totalorder (!%p240_p8), %s765_s14, 0 }
  0x20   : > { %s900_s29 = smov (!%p285_p9, %s616_s29), 143  ;;  %309 = sbr.rel (%p618_p10) target bundleno = 39 (0x27), region = 77 }
  0x21   : > { %s617_s4 = sshll.u32 %s900_s29, 2  ;;  %v775_v4 = vmov (!%p618_p10), 0.0  }
  0x22   : > { %s848_s7 = scalar_lea.vmem %s890_s1, %s617_s4  ;;  %310 = vst [vmem:[#allocation2] sm:$0xff] (!%p618_p10), %v775_v4  ;;  %311 = vst [vmem:[#allocation2 + $0x8] sm:$0xff] (!%p618_p10), %v775_v4 }
  0x23   : > { %312 = vst [vmem:[#allocation2 + $0x10] sm:$0xff] (!%p618_p10), %v775_v4  ;;  %313 = vst [vmem:[#allocation2 + $0x18] sm:$0xff] (!%p618_p10), %v775_v4 }
  0x27 PF: > { %v725_v5 = vld [vmem:[%s848_s7] sm:$0xff]   ;;  %v726_v6 = vld [vmem:[%s848_s7 + $0x8] sm:$0xff]   ;;  %v727_v7 = vld [vmem:[%s848_s7 + $0x10] sm:$0xff]   ;;  %p629_p11 = scmp.ne.s32.totalorder %s765_s14, 8 }
  0x28   : > { %664 = vmatprep.subr.bf16.mxu0 %v725_v5  ;;  %v728_v8 = vld [vmem:[%s848_s7 + $0x18] sm:$0xff]   ;;  %v733_v9 = vld [vmem:[%s248_s8] sm:$0xff]   ;;  %v730_v11 = vld [vmem:[%s848_s7 + $0x28] sm:$0xff]  }
  0x29   : > { %665 = vmatpush3.bf16.msra.mxu0 %v725_v5  ;;  %680 = vmatprep.mubr.bf16.mxu0 %v733_v9  ;;  %v729_v10 = vld [vmem:[%s848_s7 + $0x20] sm:$0xff]   ;;  %v731_v12 = vld [vmem:[%s848_s7 + $0x30] sm:$0xff]   ;;  %v732_v13 = vld [vmem:[%s848_s7 + $0x38] sm:$0xff]  }
  0x2a   : > { %666 = vmatprep.subr.bf16.mxu0 %v726_v6  ;;  %v734_v14 = vld [vmem:[%s248_s8 + $0x8] sm:$0xff]   ;;  %v316_v15 = vld [vmem:[#allocation2 + $0x10] sm:$0xff]  ;;  %v314_v16 = vld [vmem:[#allocation2] sm:$0xff] }
  0x2b   : > { %v317_v18 = vld [vmem:[#allocation2 + $0x18] sm:$0xff]  ;;  %v315_v21 = vld [vmem:[#allocation2 + $0x8] sm:$0xff]  ;;  %v630_v29 = vld [vmem:[%s891_s2] ss:$0 sm:$0xff] (!%p629_p11) }
  0x2d   : > { %667 = vmatpush3.bf16.msra.mxu0 %v726_v6 }
  0x2e   : > { %668 = vmatprep.subr.bf16.mxu0 %v727_v7 }
  0x31   : > { %669 = vmatpush3.bf16.msra.mxu0 %v727_v7 }
  0x32   : > { %670 = vmatprep.subr.bf16.mxu0 %v728_v8 }
  0x35   : > { %671 = vmatpush3.bf16.msra.mxu0 %v728_v8 }
  0x36   : > { %672 = vmatprep.subr.bf16.mxu0 %v729_v10 }
  0x39   : > { %673 = vmatpush3.bf16.msra.mxu0 %v729_v10 }
  0x3a   : > { %674 = vmatprep.subr.bf16.mxu0 %v730_v11 }
  0x3d   : > { %675 = vmatpush3.bf16.msra.mxu0 %v730_v11 }
  0x3e   : > { %676 = vmatprep.subr.bf16.mxu0 %v731_v12 }
  0x41   : > { %677 = vmatpush3.bf16.msra.mxu0 %v731_v12 }
  0x42   : > { %678 = vmatprep.subr.bf16.mxu0 %v732_v13 }
  0x45   : > { %679 = vmatpush3.bf16.msra.mxu0 %v732_v13 }
  0x48   : > { %681 = vmatmul.mubr.bf16.vlgmr.msra.gmra.mrb[0].mxu0 %v734_v14 }
 0x11b   : > { %v682_v17 = vpop.f32.mrb[0].mxu0  ;;  %458 = sbr.rel (%p629_p11) target bundleno = 304 (0x130), region = 81 }
 0x11c   : > { %v449_v19 = vadd.f32 %v682_v17, %v316_v15  ;;  %v432_v20 = vpop.f32.mrb[1].mxu0 }
 0x11d   : > { %v447_v22 = vadd.f32 %v432_v20, %v314_v16  ;;  %v683_v23 = vpop.f32.mrb[2].mxu0 }
 0x11e   : > { %453 = vst [vmem:[#allocation2 + $0x10] sm:$0xff] %v449_v19  ;;  %v450_v24 = vadd.f32 %v683_v23, %v317_v18  ;;  %v435_v25 = vpop.f32.mrb[3].mxu0 }
 0x11f   : > { %451 = vst [vmem:[#allocation2] sm:$0xff] %v447_v22  ;;  %v448_v26 = vadd.f32 %v435_v25, %v315_v21 }
 0x120   : > { %454 = vst [vmem:[#allocation2 + $0x18] sm:$0xff] %v450_v24 }
 0x121   : > { %452 = vst [vmem:[#allocation2 + $0x8] sm:$0xff] %v448_v26 }
 0x125   : > { %v461_v32 = vld [vmem:[#allocation2 + $0x10] sm:$0xff] }
 0x126   : > { %v459_v27 = vld [vmem:[#allocation2] sm:$0xff]  ;;  %v472_v34 = vadd.f32 %v630_v29, %v461_v32 }
 0x127   : > { %v470_v30 = vadd.f32 %v630_v29, %v459_v27  ;;  %v462_v33 = vld [vmem:[#allocation2 + $0x18] sm:$0xff] }
 0x128   : > { %v460_v28 = vld [vmem:[#allocation2 + $0x8] sm:$0xff]  ;;  %v473_v35 = vadd.f32 %v630_v29, %v462_v33  ;;  %v476_v38 = vmax.f32 %v472_v34, 0.0 }
 0x129   : > { %v471_v31 = vadd.f32 %v630_v29, %v460_v28  ;;  %v474_v36 = vmax.f32 %v470_v30, 0.0 }
 0x12a   : > { %v477_v39 = vmax.f32 %v473_v35, 0.0 }
 0x12b   : > { %v475_v37 = vmax.f32 %v471_v31, 0.0 }
 0x12c   : > { %v651_v41 = vpack.c.bf16 %v477_v39, %v476_v38 }
 0x12d   : > { %v646_v40 = vpack.c.bf16 %v475_v37, %v474_v36 }
 0x12e   : > { %653 = vst [vmem:[%s892_s3 + $0x8] sm:$0xff] %v651_v41  }
 0x12f   : > { %647 = vst [vmem:[%s892_s3] sm:$0xff] %v646_v40  }
 0x130 PF: > { %s13_s16 = sadd.s32 1, %s773_s16   ;;  %s893_s12 = smov %s761_s13 }
 0x131   : > { %p10_p12 = scmp.ge.s32.totalorder %s13_s16, 11   ;;  %s894_s13 = smov %s831_s20 }
 0x132   : > { %s895_s14 = smov %s769_s15  ;;  %s896_s15 = smov %s898_s17 }
 0x133   :  { %12 = sbr.rel (!%p10_p12) target bundleno = 3 (0x3), region = 122 }

// kernel: resnet_forward.19
= control target key start
LH: loop header
LB: loop body
LE: loop exit
PB: predicated region body
PF: predicated region fallthrough
CT: control target
= control target key end

     0   :  { %s901_s15 = smov 0   ;;  %s903_s16 = smov 0   ;;  %s1000_s0 = inlined_call_operand.vmem [shape: bf16[32,1152], index: 0, kind: input, shape index: {}]   ;;  %s1001_s1 = inlined_call_operand.vmem [shape: bf16[1152,128], index: 1, kind: input, shape index: {}]   ;;  %s1002_s2 = inlined_call_operand.vmem [shape: f32[1,128], index: 2, kind: input, shape index: {}]   ;;  %s1003_s3 = inlined_call_operand.vmem [shape: bf16[32,128], index: 3, kind: input, shape index: {}]   ;;  %s1004_s4 = inlined_call_operand.vmem [shape: bf16[32,128], index: 4, kind: output, shape index: {}]  }
   0x1   :  { %s905_s17 = smov 0   ;;  %s907_s18 = smov 0  }
   0x2   :  { %s909_s19 = smov 0  }
   0x3 LB: > { %s26_s20 = sadd.s32 1, %s869_s18  ;;  %p49_p1 = scmp.ne.s32.totalorder %s861_s16, %s857_s15  ;;  %s873_s19 = sphi %s909_s19, %s14_s19   ;;  %s869_s18 = sphi %s907_s18, %s1008_s18   ;;  %s865_s17 = sphi %s905_s17, %s1007_s17   ;;  %s861_s16 = sphi %s903_s16, %s1006_s16   ;;  %s857_s15 = sphi %s901_s15, %s1005_s15  }
   0x4   : > { %p27_p0 = scmp.ge.s32.totalorder %s26_s20, 9  ;;  %p50_p2 = scmp.eq.s32.totalorder %s873_s19, 0 }
   0x5   : > { %s42_s22 = sadd.s32 1, %s861_s16  ;;  %p702_p5 = scmp.ge.s32.totalorder %s873_s19, 9 }
   0x6   : > { %s1010_s20 = smov (%p27_p0, %s26_s20), 0  ;;  %p51_p3 = por %p50_p2, %p49_p1 }
   0x7   : > { %s38_s21 = ssub.s32 %s869_s18, %s1010_s20  ;;  %203 = sbr.rel (%p702_p5) target bundleno = 21 (0x15), region = 24 }
   0x8   : > { %p40_p4 = scmp.eq.s32.totalorder %s38_s21, 0 }
   0xa   : > { %s936_s23 = scalar_select %p40_p4, %s861_s16, %s42_s22  }
   0xe   : > { %206 = sbr.rel (!%p51_p3) target bundleno = 21 (0x15), region = 28  ;;  %s208_s24 = sand.u32 (%p51_p3), 1, %s861_s16  }
   0xf   : > { %s704_s25 = sshll.u32 (%p51_p3), %s869_s18, 2  ;;  %s703_s26 = sshll.u32 (%p51_p3), %s208_s24, 4 }
  0x10   : > { %s215_s29 = scalar_lea.vmem (%p51_p3), %s1000_s0, %s704_s25  ;;  %s210_s30 = scalar_lea.vmem (%p51_p3), [#allocation3], %s703_s26 }
  0x11   : > { %v231_v0 = vld [vmem:[%s215_s29] sm:$0xf] (%p51_p3)  ;;  %v233_v1 = vld [vmem:[%s215_s29 + $0x24] sm:$0xf] (%p51_p3)  ;;  %v235_v2 = vld [vmem:[%s215_s29 + $0x48] sm:$0xf] (%p51_p3) }
  0x12   : > { %232 = vst [vmem:[%s210_s30] sm:$0xf] (%p51_p3), %v231_v0  ;;  %234 = vst [vmem:[%s210_s30 + $0x4] sm:$0xf] (%p51_p3), %v233_v1  ;;  %v237_v3 = vld [vmem:[%s215_s29 + $0x6c] sm:$0xf] (%p51_p3) }
  0x13   : > { %236 = vst [vmem:[%s210_s30 + $0x8] sm:$0xf] (%p51_p3), %v235_v2  ;;  %238 = vst [vmem:[%s210_s30 + $0xc] sm:$0xf] (%p51_p3), %v237_v3 }
  0x15 PF: > { %p705_p6 = scmp.ge.s32.totalorder %s873_s19, 1  ;;  %p280_p7 = scmp.lt.s32.totalorder %s873_s19, 10 }
  0x17   : > { %p281_p8 = pnand %p705_p6, %p280_p7 }
  0x18   : > { %s287_s5 = sand.u32 (!%p281_p8), 1, %s857_s15   ;;  %s707_s6 = sshll.u32 (!%p281_p8), %s865_s17, 4 }
  0x19   : > { %284 = sbr.rel (%p281_p8) target bundleno = 306 (0x132), region = 73  ;;  %s948_s7 = sshll.u32 (!%p281_p8), %s287_s5, 4 }
  0x1a   : > { %p336_p9 = scmp.lt.s32.totalorder (!%p281_p8), %s707_s6, 143  ;;  %s289_s12 = scalar_lea.vmem (!%p281_p8), [#allocation3], %s948_s7 }
  0x1b   : > { %p709_p10 = scmp.ne.s32.totalorder (!%p281_p8), %s865_s17, 0 }
  0x20   : > { %s1012_s6 = smov (!%p336_p9, %s707_s6), 143  ;;  %369 = sbr.rel (%p709_p10) target bundleno = 39 (0x27), region = 81 }
  0x21   : > { %s708_s8 = sshll.u32 %s1012_s6, 2  ;;  %v875_v4 = vmov (!%p709_p10), 0.0  }
  0x22   : > { %s953_s11 = scalar_lea.vmem %s1001_s1, %s708_s8  ;;  %370 = vst [vmem:[#allocation2] sm:$0xff] (!%p709_p10), %v875_v4  ;;  %371 = vst [vmem:[#allocation2 + $0x8] sm:$0xff] (!%p709_p10), %v875_v4 }
  0x23   : > { %372 = vst [vmem:[#allocation2 + $0x10] sm:$0xff] (!%p709_p10), %v875_v4  ;;  %373 = vst [vmem:[#allocation2 + $0x18] sm:$0xff] (!%p709_p10), %v875_v4 }
  0x27 PF: > { %v825_v5 = vld [vmem:[%s953_s11] sm:$0xff]   ;;  %v826_v6 = vld [vmem:[%s953_s11 + $0x8] sm:$0xff]   ;;  %v827_v7 = vld [vmem:[%s953_s11 + $0x10] sm:$0xff]   ;;  %p720_p11 = scmp.ne.s32.totalorder %s865_s17, 8 }
  0x28   : > { %764 = vmatprep.subr.bf16.mxu0 %v825_v5  ;;  %v828_v8 = vld [vmem:[%s953_s11 + $0x18] sm:$0xff]   ;;  %v833_v9 = vld [vmem:[%s289_s12] sm:$0xff]   ;;  %v830_v11 = vld [vmem:[%s953_s11 + $0x28] sm:$0xff]  }
  0x29   : > { %765 = vmatpush3.bf16.msra.mxu0 %v825_v5  ;;  %780 = vmatprep.mubr.bf16.mxu0 %v833_v9  ;;  %v829_v10 = vld [vmem:[%s953_s11 + $0x20] sm:$0xff]   ;;  %v831_v12 = vld [vmem:[%s953_s11 + $0x30] sm:$0xff]   ;;  %v832_v13 = vld [vmem:[%s953_s11 + $0x38] sm:$0xff]  }
  0x2a   : > { %766 = vmatprep.subr.bf16.mxu0 %v826_v6  ;;  %v834_v14 = vld [vmem:[%s289_s12 + $0x8] sm:$0xff]   ;;  %v376_v15 = vld [vmem:[#allocation2 + $0x10] sm:$0xff]  ;;  %v374_v16 = vld [vmem:[#allocation2] sm:$0xff] }
  0x2b   : > { %v377_v18 = vld [vmem:[#allocation2 + $0x18] sm:$0xff]  ;;  %v375_v21 = vld [vmem:[#allocation2 + $0x8] sm:$0xff]  ;;  %v721_v29 = vld [vmem:[%s1002_s2] ss:$0 sm:$0xff] (!%p720_p11) }
  0x2c   : > { %v735_v32 = vld [vmem:[%s1003_s3] sm:$0xff] (!%p720_p11)   ;;  %v752_v39 = vld [vmem:[%s1003_s3 + $0x8] sm:$0xff] (!%p720_p11)  }
  0x2d   : > { %767 = vmatpush3.bf16.msra.mxu0 %v826_v6  ;;  %v736_v35 = vunpack.c.l.bf16 (!%p720_p11), %v735_v32  ;;  %v737_v36 = vunpack.c.h.bf16 (!%p720_p11), %v735_v32  ;;  %v740_v40 = vunpack.c.l.bf16 (!%p720_p11), %v752_v39  ;;  %v741_v41 = vunpack.c.h.bf16 (!%p720_p11), %v752_v39 }
  0x2e   : > { %768 = vmatprep.subr.bf16.mxu0 %v827_v7 }
  0x31   : > { %769 = vmatpush3.bf16.msra.mxu0 %v827_v7 }
  0x32   : > { %770 = vmatprep.subr.bf16.mxu0 %v828_v8 }
  0x35   : > { %771 = vmatpush3.bf16.msra.mxu0 %v828_v8 }
  0x36   : > { %772 = vmatprep.subr.bf16.mxu0 %v829_v10 }
  0x39   : > { %773 = vmatpush3.bf16.msra.mxu0 %v829_v10 }
  0x3a   : > { %774 = vmatprep.subr.bf16.mxu0 %v830_v11 }
  0x3d   : > { %775 = vmatpush3.bf16.msra.mxu0 %v830_v11 }
  0x3e   : > { %776 = vmatprep.subr.bf16.mxu0 %v831_v12 }
  0x41   : > { %777 = vmatpush3.bf16.msra.mxu0 %v831_v12 }
  0x42   : > { %778 = vmatprep.subr.bf16.mxu0 %v832_v13 }
  0x45   : > { %779 = vmatpush3.bf16.msra.mxu0 %v832_v13 }
  0x48   : > { %781 = vmatmul.mubr.bf16.vlgmr.msra.gmra.mrb[0].mxu0 %v834_v14 }
 0x11b   : > { %v782_v17 = vpop.f32.mrb[0].mxu0  ;;  %518 = sbr.rel (%p720_p11) target bundleno = 306 (0x132), region = 85 }
 0x11c   : > { %v509_v19 = vadd.f32 %v782_v17, %v376_v15  ;;  %v492_v20 = vpop.f32.mrb[1].mxu0 }
 0x11d   : > { %v507_v22 = vadd.f32 %v492_v20, %v374_v16  ;;  %v783_v23 = vpop.f32.mrb[2].mxu0 }
 0x11e   : > { %513 = vst [vmem:[#allocation2 + $0x10] sm:$0xff] %v509_v19  ;;  %v510_v24 = vadd.f32 %v783_v23, %v377_v18  ;;  %v495_v25 = vpop.f32.mrb[3].mxu0 }
 0x11f   : > { %511 = vst [vmem:[#allocation2] sm:$0xff] %v507_v22  ;;  %v508_v26 = vadd.f32 %v495_v25, %v375_v21 }
 0x120   : > { %514 = vst [vmem:[#allocation2 + $0x18] sm:$0xff] %v510_v24 }
 0x121   : > { %512 = vst [vmem:[#allocation2 + $0x8] sm:$0xff] %v508_v26 }
 0x125   : > { %v521_v33 = vld [vmem:[#allocation2 + $0x10] sm:$0xff] }
 0x126   : > { %v519_v27 = vld [vmem:[#allocation2] sm:$0xff]  ;;  %v532_v37 = vadd.f32 %v721_v29, %v521_v33 }
 0x127   : > { %v530_v30 = vadd.f32 %v721_v29, %v519_v27  ;;  %v522_v34 = vld [vmem:[#allocation2 + $0x18] sm:$0xff] }
 0x128   : > { %v520_v28 = vld [vmem:[#allocation2 + $0x8] sm:$0xff]  ;;  %v533_v38 = vadd.f32 %v721_v29, %v522_v34  ;;  %v544_v44 = vadd.f32 %v740_v40, %v532_v37 }
 0x129   : > { %v531_v31 = vadd.f32 %v721_v29, %v520_v28  ;;  %v542_v42 = vadd.f32 %v736_v35, %v530_v30 }
 0x12a   : > { %v545_v45 = vadd.f32 %v741_v41, %v533_v38  ;;  %v548_v48 = vmax.f32 %v544_v44, 0.0 }
 0x12b   : > { %v543_v43 = vadd.f32 %v737_v36, %v531_v31  ;;  %v546_v46 = vmax.f32 %v542_v42, 0.0 }
 0x12c   : > { %v549_v49 = vmax.f32 %v545_v45, 0.0 }
 0x12d   : > { %v547_v47 = vmax.f32 %v543_v43, 0.0 }
 0x12e   : > { %v750_v51 = vpack.c.bf16 %v549_v49, %v548_v48 }
 0x12f   : > { %v745_v50 = vpack.c.bf16 %v547_v47, %v546_v46 }
 0x130   : > { %753 = vst [vmem:[%s1004_s4 + $0x8] sm:$0xff] %v750_v51  }
 0x131   : > { %746 = vst [vmem:[%s1004_s4] sm:$0xff] %v745_v50  }
 0x132 PF: > { %s14_s19 = sadd.s32 1, %s873_s19   ;;  %s1005_s15 = smov %s861_s16 }
 0x133   : > { %p11_p12 = scmp.ge.s32.totalorder %s14_s19, 11   ;;  %s1006_s16 = smov %s936_s23 }
 0x134   : > { %s1007_s17 = smov %s869_s18  ;;  %s1008_s18 = smov %s1010_s20 }
 0x135   :  { %13 = sbr.rel (!%p11_p12) target bundleno = 3 (0x3), region = 129 }

// kernel: resnet_forward.20
= control target key start
LH: loop header
LB: loop body
LE: loop exit
PB: predicated region body
PF: predicated region fallthrough
CT: control target
= control target key end

     0   :  { %s622_s12 = smov 0   ;;  %s624_s13 = smov 0   ;;  %s671_s0 = inlined_call_operand.vmem [shape: bf16[8,1152], index: 0, kind: input, shape index: {}]   ;;  %s672_s1 = inlined_call_operand.vmem [shape: bf16[1152,128], index: 1, kind: input, shape index: {}]   ;;  %s673_s2 = inlined_call_operand.vmem [shape: f32[1,128], index: 2, kind: input, shape index: {}]   ;;  %s674_s3 = inlined_call_operand.vmem [shape: bf16[8,128], index: 3, kind: output, shape index: {}]  }
   0x1   :  { %s626_s14 = smov 0  }
   0x2 LB: > { %s25_s15 = sadd.s32 1, %s593_s13  ;;  %p493_p0 = scmp.ge.s32.totalorder %s597_s14, 1  ;;  %s597_s14 = sphi %s626_s14, %s13_s14   ;;  %s593_s13 = sphi %s624_s13, %s676_s13   ;;  %s589_s12 = sphi %s622_s12, %s675_s12  }
   0x3   : > { %p26_p1 = scmp.ge.s32.totalorder %s25_s15, 9  ;;  %p187_p2 = scmp.lt.s32.totalorder %s597_s14, 10 }
   0x5   : > { %s678_s15 = smov (%p26_p1, %s25_s15), 0  ;;  %p188_p3 = pnand %p493_p0, %p187_p2 }
   0x6   : > { %p229_p4 = scmp.lt.s32.totalorder (!%p188_p3), %s589_s12, 8  ;;  %s495_s16 = sshll.u32 (!%p188_p3), %s589_s12, 4 }
   0x7   : > { %191 = sbr.rel (%p188_p3) target bundleno = 284 (0x11c), region = 32  ;;  %p236_p5 = scmp.lt.s32.totalorder (!%p188_p3), %s495_s16, 143 }
   0x8   : > { %p497_p6 = scmp.ne.s32.totalorder (!%p188_p3), %s589_s12, 0 }
   0xe   : > { %s230_s17 = scalar_select %p229_p4, %s589_s12, 8 }
   0xf   : > { %s680_s16 = smov (!%p236_p5, %s495_s16), 143  ;;  %258 = sbr.rel (%p497_p6) target bundleno = 22 (0x16), region = 36 }
  0x10   : > { %s494_s18 = sshll.u32 %s230_s17, 2  ;;  %s496_s22 = sshll.u32 %s680_s16, 2  ;;  %v599_v0 = vmov (!%p497_p6), 0.0  }
  0x11   : > { %s648_s21 = scalar_lea.vmem %s671_s0, %s494_s18  ;;  %s242_s25 = scalar_lea.vmem %s672_s1, %s496_s22  ;;  %259 = vst [vmem:[#allocation2] sm:$0xff] (!%p497_p6), %v599_v0 }
  0x16 PF: > { %v567_v1 = vld [vmem:[%s242_s25] sm:$0xff]   ;;  %v600_v2 = vmov 0.0   ;;  %v568_v3 = vld [vmem:[%s242_s25 + $0x8] sm:$0xff]   ;;  %vm601_vm0 = vmmov 0   ;;  %v569_v4 = vld [vmem:[%s242_s25 + $0x10] sm:$0xff]   ;;  %p506_p7 = scmp.ne.s32.totalorder %s589_s12, 8 }
  0x17   : > { %520 = vmatprep.subr.bf16.mxu0 %v600_v2  ;;  %536 = vmatprep.mubr.msk.bf16.mxu0 %vm601_vm0, %v600_v2  ;;  %v570_v5 = vld [vmem:[%s242_s25 + $0x18] sm:$0xff]   ;;  %v571_v6 = vld [vmem:[%s242_s25 + $0x20] sm:$0xff]   ;;  %v572_v7 = vld [vmem:[%s242_s25 + $0x28] sm:$0xff]  }
  0x18   : > { %521 = vmatpush3.bf16.msra.mxu0 %v567_v1  ;;  %v573_v8 = vld [vmem:[%s242_s25 + $0x30] sm:$0xff]   ;;  %v574_v9 = vld [vmem:[%s242_s25 + $0x38] sm:$0xff]   ;;  %v261_v10 = vld [vmem:[%s648_s21] sm:$0xf] }
  0x19   : > { %522 = vmatprep.subr.bf16.mxu0 %v600_v2  ;;  %v260_v11 = vld [vmem:[#allocation2] sm:$0xff] }
  0x1a   : > { %v507_v18 = vld [vmem:[%s673_s2] ss:$0 sm:$0xff] (!%p506_p7) }
  0x1c   : > { %523 = vmatpush3.bf16.msra.mxu0 %v568_v3 }
  0x1d   : > { %524 = vmatprep.subr.bf16.mxu0 %v600_v2 }
  0x20   : > { %525 = vmatpush3.bf16.msra.mxu0 %v569_v4 }
  0x21   : > { %526 = vmatprep.subr.bf16.mxu0 %v600_v2 }
  0x24   : > { %527 = vmatpush3.bf16.msra.mxu0 %v570_v5 }
  0x25   : > { %528 = vmatprep.subr.bf16.mxu0 %v600_v2 }
  0x28   : > { %529 = vmatpush3.bf16.msra.mxu0 %v571_v6 }
  0x29   : > { %530 = vmatprep.subr.bf16.mxu0 %v600_v2 }
  0x2c   : > { %531 = vmatpush3.bf16.msra.mxu0 %v572_v7 }
  0x2d   : > { %532 = vmatprep.subr.bf16.mxu0 %v600_v2 }
  0x30   : > { %533 = vmatpush3.bf16.msra.mxu0 %v573_v8 }
  0x31   : > { %534 = vmatprep.subr.bf16.mxu0 %v600_v2 }
  0x34   : > { %535 = vmatpush3.bf16.msra.mxu0 %v574_v9 }
  0x37   : > { %537 = vmatmul.mubr.bf16.vlgmr.msra.gmra.mrb[0].mxu0 %v261_v10 }
 0x107   : > { %371 = sbr.rel (%p506_p7) target bundleno = 284 (0x11c), region = 40 }
 0x10a   : > { %v360_v12 = vpop.f32.mrb[0].mxu0 }
 0x10b   : > { %v366_v13 = vadd.f32 %v360_v12, %v260_v11  ;;  %v538_v14 = vpop.f32.mrb[1].mxu0 }
 0x10c   : > { %v363_v15 = vpop.f32.mrb[2].mxu0 }
 0x10d   : > { %367 = vst [vmem:[#allocation2] sm:$0xff] %v366_v13  ;;  %v539_v16 = vpop.f32.mrb[3].mxu0 }
 0x114   : > { %v372_v17 = vld [vmem:[#allocation2] sm:$0xff] }
 0x115   : > { %v380_v19 = vadd.f32 %v507_v18, %v372_v17 }
 0x117   : > { %v381_v20 = vmax.f32 %v380_v19, 0.0 }
 0x119   : > { %v382_v21 = vpack.c.bf16 %v381_v20, %v381_v20 }
 0x11b   : > { %383 = vst [vmem:[%s674_s3] sm:$0xf] %v382_v21 }
 0x11c PF: > { %s13_s14 = sadd.s32 1, %s597_s14   ;;  %s675_s12 = smov %s593_s13 }
 0x11d   : > { %p10_p8 = scmp.ge.s32.totalorder %s13_s14, 11   ;;  %s676_s13 = smov %s678_s15 }
 0x11f   :  { %12 = sbr.rel (!%p10_p8) target bundleno = 2 (0x2), region = 76 }

// kernel: resnet_forward.22
= control target key start
LH: loop header
LB: loop body
LE: loop exit
PB: predicated region body
PF: predicated region fallthrough
CT: control target
= control target key end

     0   :  { %s704_s15 = smov 0   ;;  %s706_s16 = smov 0   ;;  %s756_s0 = inlined_call_operand.vmem [shape: bf16[8,1152], index: 0, kind: input, shape index: {}]   ;;  %s757_s1 = inlined_call_operand.vmem [shape: bf16[1152,128], index: 1, kind: input, shape index: {}]   ;;  %s758_s2 = inlined_call_operand.vmem [shape: f32[1,128], index: 2, kind: input, shape index: {}]   ;;  %s759_s3 = inlined_call_operand.vmem [shape: bf16[8,128], index: 3, kind: input, shape index: {}]   ;;  %s760_s4 = inlined_call_operand.vmem [shape: bf16[8,128], index: 4, kind: output, shape index: {}]  }
   0x1   :  { %s708_s17 = smov 0  }
   0x2 LB: > { %s26_s18 = sadd.s32 1, %s670_s16  ;;  %p570_p0 = scmp.ge.s32.totalorder %s674_s17, 1  ;;  %s674_s17 = sphi %s708_s17, %s14_s17   ;;  %s670_s16 = sphi %s706_s16, %s762_s16   ;;  %s666_s15 = sphi %s704_s15, %s761_s15  }
   0x3   : > { %p27_p1 = scmp.ge.s32.totalorder %s26_s18, 9  ;;  %p226_p2 = scmp.lt.s32.totalorder %s674_s17, 10 }
   0x5   : > { %s764_s18 = smov (%p27_p1, %s26_s18), 0  ;;  %p227_p3 = pnand %p570_p0, %p226_p2 }
   0x6   : > { %p277_p4 = scmp.lt.s32.totalorder (!%p227_p3), %s666_s15, 8  ;;  %s572_s19 = sshll.u32 (!%p227_p3), %s666_s15, 4 }
   0x7   : > { %230 = sbr.rel (%p227_p3) target bundleno = 286 (0x11e), region = 36  ;;  %p284_p5 = scmp.lt.s32.totalorder (!%p227_p3), %s572_s19, 143 }
   0x8   : > { %p574_p6 = scmp.ne.s32.totalorder (!%p227_p3), %s666_s15, 0 }
   0xe   : > { %s278_s20 = scalar_select %p277_p4, %s666_s15, 8 }
   0xf   : > { %s766_s19 = smov (!%p284_p5, %s572_s19), 143  ;;  %313 = sbr.rel (%p574_p6) target bundleno = 22 (0x16), region = 40 }
  0x10   : > { %s571_s21 = sshll.u32 %s278_s20, 2  ;;  %s573_s25 = sshll.u32 %s766_s19, 2  ;;  %v676_v0 = vmov (!%p574_p6), 0.0  }
  0x11   : > { %s730_s24 = scalar_lea.vmem %s756_s0, %s571_s21  ;;  %s290_s28 = scalar_lea.vmem %s757_s1, %s573_s25  ;;  %314 = vst [vmem:[#allocation2] sm:$0xff] (!%p574_p6), %v676_v0 }
  0x16 PF: > { %v644_v1 = vld [vmem:[%s290_s28] sm:$0xff]   ;;  %v677_v2 = vmov 0.0   ;;  %v645_v3 = vld [vmem:[%s290_s28 + $0x8] sm:$0xff]   ;;  %vm678_vm0 = vmmov 0   ;;  %v646_v4 = vld [vmem:[%s290_s28 + $0x10] sm:$0xff]   ;;  %p583_p7 = scmp.ne.s32.totalorder %s666_s15, 8 }
  0x17   : > { %597 = vmatprep.subr.bf16.mxu0 %v677_v2  ;;  %613 = vmatprep.mubr.msk.bf16.mxu0 %vm678_vm0, %v677_v2  ;;  %v647_v5 = vld [vmem:[%s290_s28 + $0x18] sm:$0xff]   ;;  %v648_v6 = vld [vmem:[%s290_s28 + $0x20] sm:$0xff]   ;;  %v649_v7 = vld [vmem:[%s290_s28 + $0x28] sm:$0xff]  }
  0x18   : > { %598 = vmatpush3.bf16.msra.mxu0 %v644_v1  ;;  %v650_v8 = vld [vmem:[%s290_s28 + $0x30] sm:$0xff]   ;;  %v651_v9 = vld [vmem:[%s290_s28 + $0x38] sm:$0xff]   ;;  %v316_v10 = vld [vmem:[%s730_s24] sm:$0xf] }
  0x19   : > { %599 = vmatprep.subr.bf16.mxu0 %v677_v2  ;;  %v315_v11 = vld [vmem:[#allocation2] sm:$0xff] }
  0x1a   : > { %v584_v18 = vld [vmem:[%s758_s2] ss:$0 sm:$0xff] (!%p583_p7) }
  0x1b   : > { %v436_v19 = vld [vmem:[%s759_s3] sm:$0xf] (!%p583_p7) }
  0x1c   : > { %600 = vmatpush3.bf16.msra.mxu0 %v645_v3  ;;  %v437_v21 = vunpack.c.l.bf16 (!%p583_p7), %v436_v19 }
  0x1d   : > { %601 = vmatprep.subr.bf16.mxu0 %v677_v2 }
  0x20   : > { %602 = vmatpush3.bf16.msra.mxu0 %v646_v4 }
  0x21   : > { %603 = vmatprep.subr.bf16.mxu0 %v677_v2 }
  0x24   : > { %604 = vmatpush3.bf16.msra.mxu0 %v647_v5 }
  0x25   : > { %605 = vmatprep.subr.bf16.mxu0 %v677_v2 }
  0x28   : > { %606 = vmatpush3.bf16.msra.mxu0 %v648_v6 }
  0x29   : > { %607 = vmatprep.subr.bf16.mxu0 %v677_v2 }
  0x2c   : > { %608 = vmatpush3.bf16.msra.mxu0 %v649_v7 }
  0x2d   : > { %609 = vmatprep.subr.bf16.mxu0 %v677_v2 }
  0x30   : > { %610 = vmatpush3.bf16.msra.mxu0 %v650_v8 }
  0x31   : > { %611 = vmatprep.subr.bf16.mxu0 %v677_v2 }
  0x34   : > { %612 = vmatpush3.bf16.msra.mxu0 %v651_v9 }
  0x37   : > { %614 = vmatmul.mubr.bf16.vlgmr.msra.gmra.mrb[0].mxu0 %v316_v10 }
 0x107   : > { %426 = sbr.rel (%p583_p7) target bundleno = 286 (0x11e), region = 44 }
 0x10a   : > { %v415_v12 = vpop.f32.mrb[0].mxu0 }
 0x10b   : > { %v421_v13 = vadd.f32 %v415_v12, %v315_v11  ;;  %v615_v14 = vpop.f32.mrb[1].mxu0 }
 0x10c   : > { %v418_v15 = vpop.f32.mrb[2].mxu0 }
 0x10d   : > { %422 = vst [vmem:[#allocation2] sm:$0xff] %v421_v13  ;;  %v616_v16 = vpop.f32.mrb[3].mxu0 }
 0x114   : > { %v427_v17 = vld [vmem:[#allocation2] sm:$0xff] }
 0x115   : > { %v435_v20 = vadd.f32 %v584_v18, %v427_v17 }
 0x117   : > { %v438_v22 = vadd.f32 %v437_v21, %v435_v20 }
 0x119   : > { %v439_v23 = vmax.f32 %v438_v22, 0.0 }
 0x11b   : > { %v440_v24 = vpack.c.bf16 %v439_v23, %v439_v23 }
 0x11d   : > { %441 = vst [vmem:[%s760_s4] sm:$0xf] %v440_v24 }
 0x11e PF: > { %s14_s17 = sadd.s32 1, %s674_s17   ;;  %s761_s15 = smov %s670_s16 }
 0x11f   : > { %p11_p8 = scmp.ge.s32.totalorder %s14_s17, 11   ;;  %s762_s16 = smov %s764_s18 }
 0x121   :  { %13 = sbr.rel (!%p11_p8) target bundleno = 2 (0x2), region = 83 }

// kernel: resnet_forward.21
= control target key start
LH: loop header
LB: loop body
LE: loop exit
PB: predicated region body
PF: predicated region fallthrough
CT: control target
= control target key end

     0   :  { %v194_v0 = vmov 0.0   ;;  %vm195_vm0 = vmmov 0   ;;  %s249_s1 = inlined_call_operand.vmem [shape: bf16[128,128], index: 1, kind: input, shape index: {}]   ;;  %s250_s0 = inlined_call_operand.vmem [shape: bf16[8,128], index: 0, kind: input, shape index: {}]   ;;  %s251_s2 = inlined_call_operand.vmem [shape: f32[1,128], index: 2, kind: input, shape index: {}]   ;;  %s252_s3 = inlined_call_operand.vmem [shape: bf16[8,128], index: 3, kind: output, shape index: {}]  }
   0x1   :  { %164 = vmatprep.subr.bf16.mxu0 %v194_v0  ;;  %v186_v1 = vld [vmem:[%s249_s1] sm:$0xff]   ;;  %180 = vmatprep.mubr.msk.bf16.mxu0 %vm195_vm0, %v194_v0  ;;  %v187_v2 = vld [vmem:[%s249_s1 + $0x8] sm:$0xff]   ;;  %v188_v3 = vld [vmem:[%s249_s1 + $0x10] sm:$0xff]  }
   0x2   :  { %165 = vmatpush3.bf16.msra.mxu0 %v186_v1  ;;  %v189_v4 = vld [vmem:[%s249_s1 + $0x18] sm:$0xff]   ;;  %v190_v5 = vld [vmem:[%s249_s1 + $0x20] sm:$0xff]   ;;  %v191_v6 = vld [vmem:[%s249_s1 + $0x28] sm:$0xff]  }
   0x3   :  { %166 = vmatprep.subr.bf16.mxu0 %v194_v0  ;;  %v192_v7 = vld [vmem:[%s249_s1 + $0x30] sm:$0xff]   ;;  %v193_v8 = vld [vmem:[%s249_s1 + $0x38] sm:$0xff]   ;;  %v21_v9 = vld [vmem:[%s250_s0] sm:$0xf] }
   0x4   :  { %v154_v10 = vld [vmem:[%s251_s2] ss:$0 sm:$0xff] }
   0x6   :  { %167 = vmatpush3.bf16.msra.mxu0 %v187_v2 }
   0x7   :  { %168 = vmatprep.subr.bf16.mxu0 %v194_v0 }
   0xa   :  { %169 = vmatpush3.bf16.msra.mxu0 %v188_v3 }
   0xb   :  { %170 = vmatprep.subr.bf16.mxu0 %v194_v0 }
   0xe   :  { %171 = vmatpush3.bf16.msra.mxu0 %v189_v4 }
   0xf   :  { %172 = vmatprep.subr.bf16.mxu0 %v194_v0 }
  0x12   :  { %173 = vmatpush3.bf16.msra.mxu0 %v190_v5 }
  0x13   :  { %174 = vmatprep.subr.bf16.mxu0 %v194_v0 }
  0x16   :  { %175 = vmatpush3.bf16.msra.mxu0 %v191_v6 }
  0x17   :  { %176 = vmatprep.subr.bf16.mxu0 %v194_v0 }
  0x1a   :  { %177 = vmatpush3.bf16.msra.mxu0 %v192_v7 }
  0x1b   :  { %178 = vmatprep.subr.bf16.mxu0 %v194_v0 }
  0x1e   :  { %179 = vmatpush3.bf16.msra.mxu0 %v193_v8 }
  0x21   :  { %181 = vmatmul.mubr.bf16.vlgmr.msra.gmra.mrb[0].mxu0 %v21_v9 }
  0xf4   :  { %v120_v11 = vpop.f32.mrb[0].mxu0 }
  0xf5   :  { %v139_v12 = vadd.f32 %v154_v10, %v120_v11  ;;  %v182_v13 = vpop.f32.mrb[1].mxu0 }
  0xf6   :  { %v123_v14 = vpop.f32.mrb[2].mxu0 }
  0xf7   :  { %v140_v15 = vpack.c.bf16 %v139_v12, %v139_v12  ;;  %v183_v16 = vpop.f32.mrb[3].mxu0 }
  0xf9   :  { %141 = vst [vmem:[%s252_s3] sm:$0xf] %v140_v15 }

// kernel: resnet_forward.28
= control target key start
LH: loop header
LB: loop body
LE: loop exit
PB: predicated region body
PF: predicated region fallthrough
CT: control target
= control target key end

     0   :  { %s730_s15 = smov 0   ;;  %s732_s16 = smov 0   ;;  %s805_s0 = inlined_call_operand.vmem [shape: bf16[2,1,1,9,256], index: 0, kind: input, shape index: {}, may-alias: {0,4}]   ;;  %s806_s1 = inlined_call_operand.vmem [shape: bf16[2,1152], index: 1, kind: input, shape index: {}]   ;;  %s807_s2 = inlined_call_operand.vmem [shape: bf16[1152,256], index: 2, kind: input, shape index: {}]   ;;  %s808_s3 = inlined_call_operand.vmem [shape: f32[1,256], index: 3, kind: input, shape index: {}]   ;;  %s809_s4 = inlined_call_operand.vmem [shape: bf16[2,1,1,9,256], index: 4, kind: output, shape index: {}, may-alias: {0,4}]  }
   0x1   :  { %s734_s17 = smov 0  }
   0x2 LB: > { %s592_s0 = sadd.s32 4294967295, %s699_s17   ;;  %s27_s18 = sadd.s32 1, %s695_s16  ;;  %s699_s17 = sphi %s734_s17, %s15_s17   ;;  %s695_s16 = sphi %s732_s16, %s811_s16   ;;  %s691_s15 = sphi %s730_s15, %s810_s15  }
   0x3   : > { %p28_p0 = scmp.ge.s32.totalorder %s27_s18, 9  ;;  %p596_p1 = scmp.ge.s32.totalorder %s699_s17, 1 }
   0x4   : > { %p193_p2 = scmp.lt.s32.totalorder %s699_s17, 10 }
   0x5   : > { %s813_s18 = smov (%p28_p0, %s27_s18), 0 }
   0x6   : > { %p194_p3 = pnand %p596_p1, %p193_p2 }
   0x7   : > { %p230_p4 = scmp.lt.s32.totalorder (!%p194_p3), %s691_s15, 8  ;;  %s597_s19 = sshll.u32 (!%p194_p3), %s691_s15, 4 }
   0x8   : > { %197 = sbr.rel (%p194_p3) target bundleno = 305 (0x131), region = 32  ;;  %p237_p5 = scmp.lt.s32.totalorder (!%p194_p3), %s597_s19, 143 }
   0x9   : > { %p600_p6 = scmp.ne.s32.totalorder (!%p194_p3), %s691_s15, 0 }
   0xf   : > { %s754_s20 = scalar_select %p230_p4, %s691_s15, 8 }
  0x10   : > { %s815_s19 = smov (!%p237_p5, %s597_s19), 143  ;;  %257 = sbr.rel (%p600_p6) target bundleno = 23 (0x17), region = 36 }
  0x11   : > { %s234_s23 = scalar_lea.vmem %s806_s1, %s754_s20  ;;  %s624_s24 = sshll.u32 %s815_s19, 3  ;;  %v701_v0 = vmov (!%p600_p6), 0.0  }
  0x12   : > { %s763_s27 = scalar_lea.vmem %s807_s2, %s624_s24  ;;  %258 = vst [vmem:[#allocation2] sm:$0xf] (!%p600_p6), %v701_v0 }
  0x17 PF: > { %v653_v1 = vld [vmem:[%s763_s27 + $0x4] ss:$8 sps:$4 sm:$0xff]   ;;  %v655_v2 = vld [vmem:[%s763_s27] ss:$8 sps:$4 sm:$0xff]   ;;  %v702_v3 = vmov 0   ;;  %v404_v21 = vlaneseq  ;;  %p617_p7 = scmp.ne.s32.totalorder %s691_s15, 8 }
  0x18   : > { %389 = vmatprep.mubr.bf16.mxu0 %v702_v3  ;;  %357 = vmatprep.subr.bf16.mxu0 %v653_v1  ;;  %v656_v4 = vld [vmem:[%s763_s27 + $0x14] ss:$8 sps:$4 sm:$0xff]   ;;  %v658_v5 = vld [vmem:[%s763_s27 + $0x10] ss:$8 sps:$4 sm:$0xff]   ;;  %v659_v6 = vld [vmem:[%s763_s27 + $0x24] ss:$8 sps:$4 sm:$0xff]  }
  0x19   : > { %358 = vmatpush1.bf16.msra.mxu0 %v655_v2  ;;  %v661_v7 = vld [vmem:[%s763_s27 + $0x20] ss:$8 sps:$4 sm:$0xff]   ;;  %v662_v8 = vld [vmem:[%s763_s27 + $0x34] ss:$8 sps:$4 sm:$0xff]   ;;  %v664_v9 = vld [vmem:[%s763_s27 + $0x30] ss:$8 sps:$4 sm:$0xff]  }
  0x1a   : > { %359 = vmatprep.subr.bf16.mxu0 %v656_v4  ;;  %v665_v10 = vld [vmem:[%s763_s27 + $0x44] ss:$8 sps:$4 sm:$0xff]   ;;  %v667_v11 = vld [vmem:[%s763_s27 + $0x40] ss:$8 sps:$4 sm:$0xff]   ;;  %v668_v12 = vld [vmem:[%s763_s27 + $0x54] ss:$8 sps:$4 sm:$0xff]  }
  0x1b   : > { %v670_v13 = vld [vmem:[%s763_s27 + $0x50] ss:$8 sps:$4 sm:$0xff]   ;;  %v671_v14 = vld [vmem:[%s763_s27 + $0x64] ss:$8 sps:$4 sm:$0xff]   ;;  %v673_v15 = vld [vmem:[%s763_s27 + $0x60] ss:$8 sps:$4 sm:$0xff]  }
  0x1c   : > { %v674_v16 = vld [vmem:[%s763_s27 + $0x74] ss:$8 sps:$4 sm:$0xff]   ;;  %v676_v17 = vld [vmem:[%s763_s27 + $0x70] ss:$8 sps:$4 sm:$0xff]   ;;  %v260_v18 = vld [vmem:[%s234_s23] sm:$0x1] }
  0x1d   : > { %360 = vmatpush1.bf16.msra.mxu0 %v658_v5  ;;  %v703_v19 = vmov 1983009808   ;;  %v405_v23 = vshrl.u32 %v404_v21, 7  ;;  %v259_v29 = vld [vmem:[#allocation2] sm:$0xf] }
  0x1e   : > { %361 = vmatprep.subr.bf16.mxu0 %v659_v6  ;;  %v402_v20 = vunpack.c.l.s4 %v703_v19  ;;  %v416_v33 = vld [vmem:[%s808_s3] sm:$0x3] (!%p617_p7)  ;;  %v704_v41 = vmov (!%p617_p7), 1966171168  }
  0x1f   : > { %v420_v34 = vsub.s32 (!%p617_p7), 0, %v405_v23  ;;  %v424_v35 = vsub.s32 (!%p617_p7), 1, %v405_v23  ;;  %v454_v42 = vunpack.c.l.s4 (!%p617_p7), %v704_v41 }
  0x20   : > { %v403_v22 = vunpack.c.0.s8 %v402_v20 }
  0x21   : > { %362 = vmatpush1.bf16.msra.mxu0 %v661_v7  ;;  %v421_v36 = vrot.slane (!%p617_p7), %v416_v33, %v420_v34  ;;  %v425_v37 = vrot.slane (!%p617_p7), %v416_v33, %v424_v35  ;;  %v455_v45 = vunpack.c.0.s8 (!%p617_p7), %v454_v42 }
  0x22   : > { %363 = vmatprep.subr.bf16.mxu0 %v662_v8  ;;  %v406_v25 = vsub.s32 %v403_v22, %v405_v23 }
  0x23   : > { %v426_v38 = vcombine.low (!%p617_p7), %v421_v36, %v425_v37  ;;  %v458_v48 = vsub.s32 (!%p617_p7), %v455_v45, %v405_v23 }
  0x25   : > { %364 = vmatpush1.bf16.msra.mxu0 %v664_v9  ;;  %v433_v40 = vrot.slane (!%p617_p7), %v426_v38, %v406_v25 }
  0x26   : > { %365 = vmatprep.subr.bf16.mxu0 %v665_v10 }
  0x29   : > { %366 = vmatpush1.bf16.msra.mxu0 %v667_v11 }
  0x2a   : > { %367 = vmatprep.subr.bf16.mxu0 %v668_v12 }
  0x2d   : > { %368 = vmatpush1.bf16.msra.mxu0 %v670_v13 }
  0x2e   : > { %369 = vmatprep.subr.bf16.mxu0 %v671_v14 }
  0x31   : > { %370 = vmatpush1.bf16.msra.mxu0 %v673_v15 }
  0x32   : > { %371 = vmatprep.subr.bf16.mxu0 %v674_v16 }
  0x35   : > { %372 = vmatpush1.bf16.msra.mxu0 %v676_v17 }
  0x38   : > { %390 = vmatmul.mubr.bf16.vlgmr.msra.gmra.mrb[0].mxu0 %v260_v18 }
 0x10b   : > { %v391_v24 = vpop.f32.mrb[0].mxu0 }
 0x10c   : > { %v393_v26 = vpop.f32.mrb[1].mxu0 }
 0x10d   : > { %v400_v27 = vcombine.low %v391_v24, %v393_v26  ;;  %v395_v28 = vpop.f32.mrb[2].mxu0  ;;  %414 = sbr.rel (%p617_p7) target bundleno = 296 (0x128), region = 40 }
 0x10e   : > { %v396_v30 = vpop.f32.mrb[3].mxu0 }
 0x10f   : > { %v407_v31 = vrot.slane %v400_v27, %v406_v25 }
 0x111   : > { %v409_v32 = vadd.f32 %v407_v31, %v259_v29 }
 0x113   : > { %410 = vst [vmem:[#allocation2] sm:$0xf] %v409_v32 }
 0x11a   : > { %v415_v39 = vld [vmem:[#allocation2] sm:$0xf] }
 0x11b   : > { %v435_v43 = vadd.f32 %v433_v40, %v415_v39 }
 0x11d   : > { %v436_v44 = vmax.f32 %v435_v43, 0.0 }
 0x11f   : > { %v444_v46 = vrot.slane %v436_v44, %v406_v25 }
 0x121   : > { %v445_v47 = vcombine.high %v444_v46, %v444_v46 }
 0x123   : > { %v618_v49 = vpack.c.bf16 %v445_v47, %v444_v46 }
 0x125   : > { %v459_v50 = vrot.slane %v618_v49, %v458_v48 }
 0x127   : > { %619 = vst.sshfl [vmem:[#allocation3] sm:$0x5 pattern:$0x73625140] %v459_v50 }
 0x128 PF: > { %p620_p8 = scmp.ne.s32.totalorder %s592_s0, 8 }
 0x12a   : > { %471 = sbr.rel (%p620_p8) target bundleno = 305 (0x131), region = 44 }
 0x12e   : > { %v491_v51 = vld [vmem:[#allocation3] sm:$0x3] (!%p620_p8) }
 0x12f   : > { %621 = vst [vmem:[%s809_s4 + $0x8] sm:$0x3] (!%p620_p8), %v491_v51 }
 0x131 PF: > { %s15_s17 = sadd.s32 1, %s699_s17   ;;  %s810_s15 = smov %s695_s16 }
 0x132   : > { %p12_p9 = scmp.ge.s32.totalorder %s15_s17, 11   ;;  %s811_s16 = smov %s813_s18 }
 0x134   :  { %14 = sbr.rel (!%p12_p9) target bundleno = 2 (0x2), region = 108 }

// kernel: resnet_forward.23
= control target key start
LH: loop header
LB: loop body
LE: loop exit
PB: predicated region body
PF: predicated region fallthrough
CT: control target
= control target key end

     0   :  { %v278_v1 = vmov 0   ;;  %v279_v18 = vmov 0.0   ;;  %v280_v19 = vmov 1983009808   ;;  %v165_v21 = vlaneseq  ;;  %s359_s1 = inlined_call_operand.vmem [shape: bf16[128,256], index: 1, kind: input, shape index: {}]   ;;  %s360_s0 = inlined_call_operand.vmem [shape: bf16[2,128], index: 0, kind: input, shape index: {}]   ;;  %s361_s2 = inlined_call_operand.vmem [shape: f32[1,256], index: 2, kind: input, shape index: {}]   ;;  %s362_s3 = inlined_call_operand.vmem [shape: bf16[2,256], index: 3, kind: output, shape index: {}]  }
   0x1   :  { %v254_v0 = vld [vmem:[%s359_s1 + $0x4] ss:$8 sps:$4 sm:$0xff]   ;;  %150 = vmatprep.mubr.bf16.mxu0 %v278_v1  ;;  %v256_v2 = vld [vmem:[%s359_s1] ss:$8 sps:$4 sm:$0xff]   ;;  %v257_v3 = vld [vmem:[%s359_s1 + $0x14] ss:$8 sps:$4 sm:$0xff]   ;;  %v163_v20 = vunpack.c.l.s4 %v280_v19 }
   0x2   :  { %118 = vmatprep.subr.bf16.mxu0 %v254_v0  ;;  %v259_v4 = vld [vmem:[%s359_s1 + $0x10] ss:$8 sps:$4 sm:$0xff]   ;;  %v260_v5 = vld [vmem:[%s359_s1 + $0x24] ss:$8 sps:$4 sm:$0xff]   ;;  %v262_v6 = vld [vmem:[%s359_s1 + $0x20] ss:$8 sps:$4 sm:$0xff]  }
   0x3   :  { %119 = vmatpush1.bf16.msra.mxu0 %v256_v2  ;;  %v263_v7 = vld [vmem:[%s359_s1 + $0x34] ss:$8 sps:$4 sm:$0xff]   ;;  %v265_v8 = vld [vmem:[%s359_s1 + $0x30] ss:$8 sps:$4 sm:$0xff]   ;;  %v266_v9 = vld [vmem:[%s359_s1 + $0x44] ss:$8 sps:$4 sm:$0xff]   ;;  %v164_v22 = vunpack.c.0.s8 %v163_v20 }
   0x4   :  { %120 = vmatprep.subr.bf16.mxu0 %v257_v3  ;;  %v268_v10 = vld [vmem:[%s359_s1 + $0x40] ss:$8 sps:$4 sm:$0xff]   ;;  %v269_v11 = vld [vmem:[%s359_s1 + $0x54] ss:$8 sps:$4 sm:$0xff]   ;;  %v271_v12 = vld [vmem:[%s359_s1 + $0x50] ss:$8 sps:$4 sm:$0xff]  }
   0x5   :  { %v272_v13 = vld [vmem:[%s359_s1 + $0x64] ss:$8 sps:$4 sm:$0xff]   ;;  %v274_v14 = vld [vmem:[%s359_s1 + $0x60] ss:$8 sps:$4 sm:$0xff]   ;;  %v275_v15 = vld [vmem:[%s359_s1 + $0x74] ss:$8 sps:$4 sm:$0xff]  }
   0x6   :  { %v277_v16 = vld [vmem:[%s359_s1 + $0x70] ss:$8 sps:$4 sm:$0xff]   ;;  %v21_v17 = vld [vmem:[%s360_s0] sm:$0x1]  ;;  %19 = vst [vmem:[#allocation2] sm:$0xf] %v279_v18 }
   0x7   :  { %121 = vmatpush1.bf16.msra.mxu0 %v259_v4  ;;  %v166_v23 = vshrl.u32 %v165_v21, 7  ;;  %v176_v29 = vld [vmem:[%s361_s2] sm:$0x3]  ;;  %v281_v40 = vmov 1966171168  }
   0x8   :  { %122 = vmatprep.subr.bf16.mxu0 %v260_v5  ;;  %v213_v41 = vunpack.c.l.s4 %v281_v40 }
   0x9   :  { %v167_v25 = vsub.s32 %v164_v22, %v166_v23  ;;  %v180_v26 = vsub.s32 0, %v166_v23  ;;  %v184_v27 = vsub.s32 1, %v166_v23 }
   0xa   :  { %v214_v44 = vunpack.c.0.s8 %v213_v41 }
   0xb   :  { %123 = vmatpush1.bf16.msra.mxu0 %v262_v6  ;;  %v181_v35 = vrot.slane %v176_v29, %v180_v26  ;;  %v185_v36 = vrot.slane %v176_v29, %v184_v27 }
   0xc   :  { %124 = vmatprep.subr.bf16.mxu0 %v263_v7  ;;  %v217_v47 = vsub.s32 %v214_v44, %v166_v23 }
   0xd   :  { %v20_v32 = vld [vmem:[#allocation2] sm:$0xf]  ;;  %v186_v38 = vcombine.low %v181_v35, %v185_v36 }
   0xf   :  { %125 = vmatpush1.bf16.msra.mxu0 %v265_v8  ;;  %v193_v39 = vrot.slane %v186_v38, %v167_v25 }
  0x10   :  { %126 = vmatprep.subr.bf16.mxu0 %v266_v9 }
  0x13   :  { %127 = vmatpush1.bf16.msra.mxu0 %v268_v10 }
  0x14   :  { %128 = vmatprep.subr.bf16.mxu0 %v269_v11 }
  0x17   :  { %129 = vmatpush1.bf16.msra.mxu0 %v271_v12 }
  0x18   :  { %130 = vmatprep.subr.bf16.mxu0 %v272_v13 }
  0x1b   :  { %131 = vmatpush1.bf16.msra.mxu0 %v274_v14 }
  0x1c   :  { %132 = vmatprep.subr.bf16.mxu0 %v275_v15 }
  0x1f   :  { %133 = vmatpush1.bf16.msra.mxu0 %v277_v16 }
  0x22   :  { %151 = vmatmul.mubr.bf16.vlgmr.msra.gmra.mrb[0].mxu0 %v21_v17 }
  0xf5   :  { %v152_v24 = vpop.f32.mrb[0].mxu0 }
  0xf6   :  { %v154_v28 = vpop.f32.mrb[1].mxu0 }
  0xf7   :  { %v161_v30 = vcombine.low %v152_v24, %v154_v28  ;;  %v156_v31 = vpop.f32.mrb[2].mxu0 }
  0xf8   :  { %v157_v33 = vpop.f32.mrb[3].mxu0 }
  0xf9   :  { %v168_v34 = vrot.slane %v161_v30, %v167_v25 }
  0xfb   :  { %v170_v37 = vadd.f32 %v168_v34, %v20_v32 }
  0xfd   :  { %171 = vst [vmem:[#allocation2] sm:$0xf] %v170_v37 }
 0x104   :  { %v175_v42 = vld [vmem:[#allocation2] sm:$0xf] }
 0x105   :  { %v195_v43 = vadd.f32 %v193_v39, %v175_v42 }
 0x107   :  { %v203_v45 = vrot.slane %v195_v43, %v167_v25 }
 0x109   :  { %v204_v46 = vcombine.high %v203_v45, %v203_v45 }
 0x10b   :  { %v248_v48 = vpack.c.bf16 %v204_v46, %v203_v45 }
 0x10d   :  { %v218_v49 = vrot.slane %v248_v48, %v217_v47 }
 0x10f   :  { %249 = vst.sshfl [vmem:[%s362_s3] sm:$0x5 pattern:$0x73625140] %v218_v49 }

// kernel: resnet_forward.24
= control target key start
LH: loop header
LB: loop body
LE: loop exit
PB: predicated region body
PF: predicated region fallthrough
CT: control target
= control target key end

     0   :  { %s976_s15 = smov 0   ;;  %s978_s16 = smov 0   ;;  %s1077_s0 = inlined_call_operand.vmem [shape: bf16[2,2304], index: 0, kind: input, shape index: {}]   ;;  %s1078_s1 = inlined_call_operand.vmem [shape: bf16[2304,256], index: 1, kind: input, shape index: {}]   ;;  %s1079_s2 = inlined_call_operand.vmem [shape: f32[1,256], index: 2, kind: input, shape index: {}]   ;;  %s1080_s3 = inlined_call_operand.vmem [shape: bf16[2,256], index: 3, kind: input, shape index: {}]   ;;  %s1081_s4 = inlined_call_operand.vmem [shape: bf16[2,256], index: 4, kind: output, shape index: {}]  }
   0x1   :  { %s980_s17 = smov 0  }
   0x2 LB: > { %s26_s18 = sadd.s32 1, %s942_s16  ;;  %p802_p0 = scmp.ge.s32.totalorder %s946_s17, 1  ;;  %s946_s17 = sphi %s980_s17, %s14_s17   ;;  %s942_s16 = sphi %s978_s16, %s1083_s16   ;;  %s938_s15 = sphi %s976_s15, %s1082_s15  }
   0x3   : > { %p27_p1 = scmp.ge.s32.totalorder %s26_s18, 9  ;;  %p234_p2 = scmp.lt.s32.totalorder %s946_s17, 10 }
   0x5   : > { %s1085_s18 = smov (%p27_p1, %s26_s18), 0  ;;  %p235_p3 = pnand %p802_p0, %p234_p2 }
   0x6   : > { %s803_s19 = sshll.u32 (!%p235_p3), %s938_s15, 1  ;;  %s804_s20 = sshll.u32 (!%p235_p3), %s938_s15, 5 }
   0x7   : > { %238 = sbr.rel (%p235_p3) target bundleno = 330 (0x14a), region = 36  ;;  %p291_p4 = scmp.lt.s32.totalorder (!%p235_p3), %s803_s19, 17 }
   0x8   : > { %p299_p5 = scmp.lt.s32.totalorder (!%p235_p3), %s804_s20, 287  ;;  %p807_p6 = scmp.ne.s32.totalorder (!%p235_p3), %s938_s15, 0 }
   0xe   : > { %s1087_s19 = smov (!%p291_p4, %s803_s19), 17  ;;  %s1089_s20 = smov (!%p299_p5, %s804_s20), 287 }
   0xf   : > { %s295_s23 = scalar_lea.vmem %s1077_s0, %s1087_s19  ;;  %s848_s24 = sshll.u32 %s1089_s20, 3  ;;  %v948_v0 = vmov (!%p807_p6), 0.0  }
  0x10   : > { %s1007_s27 = scalar_lea.vmem %s1078_s1, %s848_s24  ;;  %335 = sbr.rel (%p807_p6) target bundleno = 23 (0x17), region = 40  ;;  %336 = vst [vmem:[#allocation2] sm:$0xf] (!%p807_p6), %v948_v0 }
  0x17 PF: > { %v876_v1 = vld [vmem:[%s1007_s27 + $0x4] ss:$8 sps:$4 sm:$0xff]   ;;  %v878_v2 = vld [vmem:[%s1007_s27] ss:$8 sps:$4 sm:$0xff]   ;;  %v879_v3 = vld [vmem:[%s1007_s27 + $0x14] ss:$8 sps:$4 sm:$0xff]   ;;  %v383_v12 = vlaneseq }
  0x18   : > { %556 = vmatprep.subr.bf16.mxu0 %v876_v1  ;;  %v881_v4 = vld [vmem:[%s1007_s27 + $0x10] ss:$8 sps:$4 sm:$0xff]   ;;  %v882_v5 = vld [vmem:[%s1007_s27 + $0x24] ss:$8 sps:$4 sm:$0xff]   ;;  %v884_v6 = vld [vmem:[%s1007_s27 + $0x20] ss:$8 sps:$4 sm:$0xff]  }
  0x19   : > { %557 = vmatpush1.bf16.msra.mxu0 %v878_v2  ;;  %v885_v7 = vld [vmem:[%s1007_s27 + $0x34] ss:$8 sps:$4 sm:$0xff]   ;;  %v887_v8 = vld [vmem:[%s1007_s27 + $0x30] ss:$8 sps:$4 sm:$0xff]   ;;  %v888_v9 = vld [vmem:[%s1007_s27 + $0x44] ss:$8 sps:$4 sm:$0xff]  }
  0x1a   : > { %558 = vmatprep.subr.bf16.mxu0 %v879_v3  ;;  %v949_v10 = vmov 1966171168   ;;  %v890_v13 = vld [vmem:[%s1007_s27 + $0x40] ss:$8 sps:$4 sm:$0xff]   ;;  %v891_v14 = vld [vmem:[%s1007_s27 + $0x54] ss:$8 sps:$4 sm:$0xff]  }
  0x1b   : > { %v381_v11 = vunpack.c.l.s4 %v949_v10  ;;  %v1021_v16 = vshrl.u32 %v383_v12, 7  ;;  %v893_v17 = vld [vmem:[%s1007_s27 + $0x50] ss:$8 sps:$4 sm:$0xff]   ;;  %v894_v18 = vld [vmem:[%s1007_s27 + $0x64] ss:$8 sps:$4 sm:$0xff]   ;;  %p841_p7 = scmp.ne.s32.totalorder %s938_s15, 8 }
  0x1c   : > { %v808_v20 = vld.sshfl [vmem:[%s295_s23] sm:$0x11 pattern:$0x75316420]  ;;  %v897_v23 = vld [vmem:[%s1007_s27 + $0x74] ss:$8 sps:$4 sm:$0xff]  }
  0x1d   : > { %559 = vmatpush1.bf16.msra.mxu0 %v881_v4  ;;  %v382_v15 = vunpack.c.0.s8 %v381_v11  ;;  %v379_v21 = vcombine.high %v808_v20, %v808_v20  ;;  %v896_v22 = vld [vmem:[%s1007_s27 + $0x60] ss:$8 sps:$4 sm:$0xff]   ;;  %v899_v25 = vld [vmem:[%s1007_s27 + $0x70] ss:$8 sps:$4 sm:$0xff]   ;;  %v900_v26 = vld [vmem:[%s1007_s27 + $0x84] ss:$8 sps:$4 sm:$0xff]  }
  0x1e   : > { %560 = vmatprep.subr.bf16.mxu0 %v882_v5  ;;  %v902_v27 = vld [vmem:[%s1007_s27 + $0x80] ss:$8 sps:$4 sm:$0xff]   ;;  %v903_v28 = vld [vmem:[%s1007_s27 + $0x94] ss:$8 sps:$4 sm:$0xff]   ;;  %v905_v29 = vld [vmem:[%s1007_s27 + $0x90] ss:$8 sps:$4 sm:$0xff]  }
  0x1f   : > { %v1026_v19 = vsub.s32 %v382_v15, %v1021_v16  ;;  %v906_v30 = vld [vmem:[%s1007_s27 + $0xa4] ss:$8 sps:$4 sm:$0xff]   ;;  %v908_v31 = vld [vmem:[%s1007_s27 + $0xa0] ss:$8 sps:$4 sm:$0xff]   ;;  %v909_v32 = vld [vmem:[%s1007_s27 + $0xb4] ss:$8 sps:$4 sm:$0xff]  }
  0x20   : > { %v911_v33 = vld [vmem:[%s1007_s27 + $0xb0] ss:$8 sps:$4 sm:$0xff]   ;;  %v912_v34 = vld [vmem:[%s1007_s27 + $0xc4] ss:$8 sps:$4 sm:$0xff]   ;;  %v914_v35 = vld [vmem:[%s1007_s27 + $0xc0] ss:$8 sps:$4 sm:$0xff]  }
  0x21   : > { %561 = vmatpush1.bf16.msra.mxu0 %v884_v6  ;;  %v393_v24 = vrot.slane %v379_v21, %v1026_v19  ;;  %v915_v36 = vld [vmem:[%s1007_s27 + $0xd4] ss:$8 sps:$4 sm:$0xff]   ;;  %v917_v37 = vld [vmem:[%s1007_s27 + $0xd0] ss:$8 sps:$4 sm:$0xff]   ;;  %v918_v38 = vld [vmem:[%s1007_s27 + $0xe4] ss:$8 sps:$4 sm:$0xff]   ;;  %v386_v42 = vrot.slane %v808_v20, %v1026_v19 }
  0x22   : > { %562 = vmatprep.subr.bf16.mxu0 %v885_v7  ;;  %v920_v39 = vld [vmem:[%s1007_s27 + $0xe0] ss:$8 sps:$4 sm:$0xff]   ;;  %v921_v40 = vld [vmem:[%s1007_s27 + $0xf4] ss:$8 sps:$4 sm:$0xff]   ;;  %v923_v41 = vld [vmem:[%s1007_s27 + $0xf0] ss:$8 sps:$4 sm:$0xff]  }
  0x23   : > { %588 = vmatprep.mubr.bf16.mxu0 %v393_v24  ;;  %v950_v43 = vmov 1983009808   ;;  %v337_v51 = vld [vmem:[#allocation2] sm:$0xf]  ;;  %v619_v56 = vsub.s32 (!%p841_p7), 0, %v1021_v16  ;;  %v623_v57 = vsub.s32 (!%p841_p7), 1, %v1021_v16 }
  0x24   : > { %v601_v44 = vunpack.c.l.s4 %v950_v43  ;;  %v615_v55 = vld [vmem:[%s1079_s2] sm:$0x3] (!%p841_p7) }
  0x25   : > { %563 = vmatpush1.bf16.msra.mxu0 %v887_v8  ;;  %v620_v58 = vrot.slane (!%p841_p7), %v615_v55, %v619_v56  ;;  %v624_v59 = vrot.slane (!%p841_p7), %v615_v55, %v623_v57  ;;  %v635_v60 = vld [vmem:[%s1080_s3] sm:$0x3] (!%p841_p7) }
  0x26   : > { %564 = vmatprep.subr.bf16.mxu0 %v888_v9  ;;  %v602_v45 = vunpack.c.0.s8 %v601_v44  ;;  %v636_v0 = vunpack.c.l.bf16 (!%p841_p7), %v635_v60 }
  0x27   : > { %v625_v61 = vcombine.low (!%p841_p7), %v620_v58, %v624_v59 }
  0x28   : > { %v605_v47 = vsub.s32 %v602_v45, %v1021_v16 }
  0x29   : > { %565 = vmatpush1.bf16.msra.mxu0 %v890_v13 }
  0x2a   : > { %566 = vmatprep.subr.bf16.mxu0 %v891_v14  ;;  %v632_v63 = vrot.slane (!%p841_p7), %v625_v61, %v605_v47 }
  0x2d   : > { %567 = vmatpush1.bf16.msra.mxu0 %v893_v17 }
  0x2e   : > { %568 = vmatprep.subr.bf16.mxu0 %v894_v18 }
  0x31   : > { %569 = vmatpush1.bf16.msra.mxu0 %v896_v22 }
  0x32   : > { %570 = vmatprep.subr.bf16.mxu0 %v897_v23 }
  0x35   : > { %571 = vmatpush1.bf16.msra.mxu0 %v899_v25 }
  0x36   : > { %572 = vmatprep.subr.bf16.mxu0 %v900_v26 }
  0x39   : > { %573 = vmatpush1.bf16.msra.mxu0 %v902_v27 }
  0x3a   : > { %574 = vmatprep.subr.bf16.mxu0 %v903_v28 }
  0x3d   : > { %575 = vmatpush1.bf16.msra.mxu0 %v905_v29 }
  0x3e   : > { %576 = vmatprep.subr.bf16.mxu0 %v906_v30 }
  0x41   : > { %577 = vmatpush1.bf16.msra.mxu0 %v908_v31 }
  0x42   : > { %578 = vmatprep.subr.bf16.mxu0 %v909_v32 }
  0x45   : > { %579 = vmatpush1.bf16.msra.mxu0 %v911_v33 }
  0x46   : > { %580 = vmatprep.subr.bf16.mxu0 %v912_v34 }
  0x49   : > { %581 = vmatpush1.bf16.msra.mxu0 %v914_v35 }
  0x4a   : > { %582 = vmatprep.subr.bf16.mxu0 %v915_v36 }
  0x4d   : > { %583 = vmatpush1.bf16.msra.mxu0 %v917_v37 }
  0x4e   : > { %584 = vmatprep.subr.bf16.mxu0 %v918_v38 }
  0x51   : > { %585 = vmatpush1.bf16.msra.mxu0 %v920_v39 }
  0x52   : > { %586 = vmatprep.subr.bf16.mxu0 %v921_v40 }
  0x55   : > { %587 = vmatpush1.bf16.msra.mxu0 %v923_v41 }
  0x58   : > { %589 = vmatmul.mubr.bf16.vlgmr.msra.gmra.mrb[0].mxu0 %v386_v42 }
 0x12b   : > { %v590_v46 = vpop.f32.mrb[0].mxu0 }
 0x12c   : > { %v592_v48 = vpop.f32.mrb[1].mxu0 }
 0x12d   : > { %v599_v49 = vcombine.low %v590_v46, %v592_v48  ;;  %v594_v50 = vpop.f32.mrb[2].mxu0  ;;  %613 = sbr.rel (%p841_p7) target bundleno = 330 (0x14a), region = 44 }
 0x12e   : > { %v595_v52 = vpop.f32.mrb[3].mxu0 }
 0x12f   : > { %v606_v53 = vrot.slane %v599_v49, %v605_v47 }
 0x131   : > { %v608_v54 = vadd.f32 %v606_v53, %v337_v51 }
 0x133   : > { %609 = vst [vmem:[#allocation2] sm:$0xf] %v608_v54 }
 0x13a   : > { %v614_v62 = vld [vmem:[#allocation2] sm:$0xf] }
 0x13b   : > { %v634_v1 = vadd.f32 %v632_v63, %v614_v62 }
 0x13d   : > { %v637_v2 = vadd.f32 %v636_v0, %v634_v1 }
 0x13f   : > { %v638_v3 = vmax.f32 %v637_v2, 0.0 }
 0x141   : > { %v646_v4 = vrot.slane %v638_v3, %v605_v47 }
 0x143   : > { %v647_v5 = vcombine.high %v646_v4, %v646_v4 }
 0x145   : > { %v842_v6 = vpack.c.bf16 %v647_v5, %v646_v4 }
 0x147   : > { %v661_v7 = vrot.slane %v842_v6, %v1026_v19 }
 0x149   : > { %843 = vst.sshfl [vmem:[%s1081_s4] sm:$0x5 pattern:$0x73625140] %v661_v7 }
 0x14a PF: > { %s14_s17 = sadd.s32 1, %s946_s17   ;;  %s1082_s15 = smov %s942_s16 }
 0x14b   : > { %p11_p8 = scmp.ge.s32.totalorder %s14_s17, 11   ;;  %s1083_s16 = smov %s1085_s18 }
 0x14d   :  { %13 = sbr.rel (!%p11_p8) target bundleno = 2 (0x2), region = 83 }

// kernel: resnet_forward.29
= control target key start
LH: loop header
LB: loop body
LE: loop exit
PB: predicated region body
PF: predicated region fallthrough
CT: control target
= control target key end

     0   :  { %s1166_s15 = smov 0   ;;  %s1168_s16 = smov 0   ;;  %s1440_s0 = inlined_call_operand.vmem [shape: bf16[2,1,1,9,512], index: 0, kind: input, shape index: {}, may-alias: {0,4}]   ;;  %s1441_s1 = inlined_call_operand.vmem [shape: bf16[2,2304], index: 1, kind: input, shape index: {}]   ;;  %s1442_s2 = inlined_call_operand.vmem [shape: bf16[2304,512], index: 2, kind: input, shape index: {}]   ;;  %s1443_s3 = inlined_call_operand.vmem [shape: f32[1,512], index: 3, kind: input, shape index: {}]   ;;  %s1444_s4 = inlined_call_operand.vmem [shape: bf16[2,1,1,9,512], index: 4, kind: output, shape index: {}, may-alias: {0,4}]  }
   0x1   :  { %s1170_s17 = smov 0   ;;  %s1172_s18 = smov 0  }
   0x2   :  { %s1174_s0 = smov 0   ;;  %s1176_s19 = smov 0  }
   0x3   :  { %s1178_s20 = smov 0   ;;  %s1180_s21 = smov 0  }
   0x4   :  { %s1182_s22 = smov 0  }
   0x5 LB: > { %s27_s23 = sadd.s32 1, %s1128_s20  ;;  %s30_s24 = sadd.s32 1, %s1132_s21  ;;  %s1136_s22 = sphi %s1182_s22, %s15_s22   ;;  %s1132_s21 = sphi %s1180_s21, %s1454_s21   ;;  %s1128_s20 = sphi %s1178_s20, %s1453_s20   ;;  %s1124_s19 = sphi %s1176_s19, %s1452_s19   ;;  %s1120_s0 = sphi %s1174_s0, %s1451_s0   ;;  %s1116_s18 = sphi %s1172_s18, %s1450_s18   ;;  %s1112_s17 = sphi %s1170_s17, %s1449_s17   ;;  %s1108_s16 = sphi %s1168_s16, %s1448_s16   ;;  %s1104_s15 = sphi %s1166_s15, %s1447_s15  }
   0x6   : > { %p28_p0 = scmp.ge.s32.totalorder %s27_s23, 9  ;;  %p78_p1 = scmp.ne.s32.totalorder %s1116_s18, %s1112_s17 }
   0x7   : > { %s886_s25 = sadd.s32 4294967295, %s1136_s22   ;;  %p79_p2 = scmp.eq.s32.totalorder %s1136_s22, 0 }
   0x8   : > { %s1456_s23 = smov (%p28_p0, %s27_s23), 0  ;;  %s1458_s24 = smov (!%p28_p0, %s30_s24), %s1132_s21 }
   0x9   : > { %p32_p3 = scmp.ge.s32.totalorder %s1458_s24, 2  ;;  %s66_s26 = ssub.s32 %s1128_s20, %s1456_s23 }
   0xa   : > { %p1222_p4 = por %p79_p2, %p78_p1  ;;  %p135_p5 = scmp.ne.s32.totalorder %s1108_s16, %s1104_s15 }
   0xb   : > { %s1460_s24 = smov (%p32_p3, %s1458_s24), 0  ;;  %s71_s28 = sadd.s32 1, %s1116_s18 }
   0xc   : > { %p136_p6 = scmp.eq.s32.totalorder %s886_s25, 17  ;;  %s67_s29 = ssub.s32 %s1132_s21, %s1460_s24 }
   0xd   : > { %s125_s30 = sadd.s32 1, %s1108_s16  ;;  %s68_s5 = sor.u32 %s67_s29, %s66_s26 }
   0xe   : > { %p123_p7 = scmp.eq.s32.totalorder %s67_s29, 0  ;;  %p69_p8 = scmp.eq.s32.totalorder %s68_s5, 0 }
   0xf   : > { %p1234_p9 = por %p136_p6, %p135_p5  ;;  %p889_p10 = scmp.ge.s32.totalorder %s1136_s22, 18 }
  0x10   : > { %s1239_s7 = scalar_select %p123_p7, %s1108_s16, %s125_s30  }
  0x11   : > { %s1242_s8 = scalar_select %p69_p8, %s1116_s18, %s71_s28  }
  0x12   : > { %158 = sbr.rel (%p889_p10) target bundleno = 48 (0x30), region = 16 }
  0x19   : > { %173 = sbr.rel (!%p1222_p4) target bundleno = 48 (0x30), region = 24  ;;  %s175_s9 = sand.u32 (%p1222_p4), 1, %s1116_s18  }
  0x1a   : > { %s892_s10 = sshll.u32 (%p1222_p4), %s1132_s21, 1  ;;  %s890_s11 = sshll.u32 (%p1222_p4), %s175_s9, 8 }
  0x1b   : > { %s942_s12 = sshll.u32 (%p1222_p4), %s1128_s20, 7  ;;  %s1258_s27 = scalar_lea.vmem (%p1222_p4), [#allocation3], %s890_s11 }
  0x1c   : > { %s181_s13 = sadd.s32 (%p1222_p4), %s942_s12, %s892_s10 }
  0x1d   : > { %s894_s14 = sshll.u32 (%p1222_p4), %s181_s13, 2 }
  0x1e   : > { %s1253_s28 = scalar_lea.vmem (%p1222_p4), %s1442_s2, %s894_s14 }
  0x1f   : > { %v273_v0 = vld [vmem:[%s1253_s28] sm:$0xff] (%p1222_p4)  ;;  %v275_v1 = vld [vmem:[%s1253_s28 + $0x10] sm:$0xff] (%p1222_p4) }
  0x20   : > { %v277_v2 = vld [vmem:[%s1253_s28 + $0x20] sm:$0xff]  ;;  %274 = vst [vmem:[%s1258_s27] sm:$0xff] %v273_v0  ;;  %276 = vst [vmem:[%s1258_s27 + $0x8] sm:$0xff] %v275_v1  ;;  %v279_v3 = vld [vmem:[%s1253_s28 + $0x30] sm:$0xff] }
  0x21   : > { %278 = vst [vmem:[%s1258_s27 + $0x10] sm:$0xff] %v277_v2  ;;  %v281_v4 = vld [vmem:[%s1253_s28 + $0x40] sm:$0xff]  ;;  %v283_v5 = vld [vmem:[%s1253_s28 + $0x50] sm:$0xff]  ;;  %280 = vst [vmem:[%s1258_s27 + $0x18] sm:$0xff] %v279_v3 }
  0x22   : > { %282 = vst [vmem:[%s1258_s27 + $0x20] sm:$0xff] %v281_v4  ;;  %284 = vst [vmem:[%s1258_s27 + $0x28] sm:$0xff] %v283_v5  ;;  %v285_v6 = vld [vmem:[%s1253_s28 + $0x60] sm:$0xff]  ;;  %v287_v7 = vld [vmem:[%s1253_s28 + $0x70] sm:$0xff] }
  0x23   : > { %v289_v8 = vld [vmem:[%s1253_s28 + $0x80] sm:$0xff]  ;;  %286 = vst [vmem:[%s1258_s27 + $0x30] sm:$0xff] %v285_v6  ;;  %288 = vst [vmem:[%s1258_s27 + $0x38] sm:$0xff] %v287_v7  ;;  %v291_v9 = vld [vmem:[%s1253_s28 + $0x90] sm:$0xff] }
  0x24   : > { %290 = vst [vmem:[%s1258_s27 + $0x40] sm:$0xff] %v289_v8  ;;  %v293_v10 = vld [vmem:[%s1253_s28 + $0xa0] sm:$0xff]  ;;  %v295_v11 = vld [vmem:[%s1253_s28 + $0xb0] sm:$0xff]  ;;  %292 = vst [vmem:[%s1258_s27 + $0x48] sm:$0xff] %v291_v9 }
  0x25   : > { %294 = vst [vmem:[%s1258_s27 + $0x50] sm:$0xff] %v293_v10  ;;  %296 = vst [vmem:[%s1258_s27 + $0x58] sm:$0xff] %v295_v11  ;;  %v297_v12 = vld [vmem:[%s1253_s28 + $0xc0] sm:$0xff]  ;;  %v299_v13 = vld [vmem:[%s1253_s28 + $0xd0] sm:$0xff] }
  0x26   : > { %v301_v14 = vld [vmem:[%s1253_s28 + $0xe0] sm:$0xff]  ;;  %298 = vst [vmem:[%s1258_s27 + $0x60] sm:$0xff] %v297_v12  ;;  %300 = vst [vmem:[%s1258_s27 + $0x68] sm:$0xff] %v299_v13  ;;  %v303_v15 = vld [vmem:[%s1253_s28 + $0xf0] sm:$0xff] }
  0x27   : > { %302 = vst [vmem:[%s1258_s27 + $0x70] sm:$0xff] %v301_v14  ;;  %v305_v16 = vld [vmem:[%s1253_s28 + $0x100] sm:$0xff]  ;;  %v307_v17 = vld [vmem:[%s1253_s28 + $0x110] sm:$0xff]  ;;  %304 = vst [vmem:[%s1258_s27 + $0x78] sm:$0xff] %v303_v15 }
  0x28   : > { %306 = vst [vmem:[%s1258_s27 + $0x80] sm:$0xff] %v305_v16  ;;  %308 = vst [vmem:[%s1258_s27 + $0x88] sm:$0xff] %v307_v17  ;;  %v309_v18 = vld [vmem:[%s1253_s28 + $0x120] sm:$0xff]  ;;  %v311_v19 = vld [vmem:[%s1253_s28 + $0x130] sm:$0xff] }
  0x29   : > { %v313_v20 = vld [vmem:[%s1253_s28 + $0x140] sm:$0xff]  ;;  %310 = vst [vmem:[%s1258_s27 + $0x90] sm:$0xff] %v309_v18  ;;  %312 = vst [vmem:[%s1258_s27 + $0x98] sm:$0xff] %v311_v19  ;;  %v315_v21 = vld [vmem:[%s1253_s28 + $0x150] sm:$0xff] }
  0x2a   : > { %314 = vst [vmem:[%s1258_s27 + $0xa0] sm:$0xff] %v313_v20  ;;  %v317_v22 = vld [vmem:[%s1253_s28 + $0x160] sm:$0xff]  ;;  %v319_v23 = vld [vmem:[%s1253_s28 + $0x170] sm:$0xff]  ;;  %316 = vst [vmem:[%s1258_s27 + $0xa8] sm:$0xff] %v315_v21 }
  0x2b   : > { %318 = vst [vmem:[%s1258_s27 + $0xb0] sm:$0xff] %v317_v22  ;;  %320 = vst [vmem:[%s1258_s27 + $0xb8] sm:$0xff] %v319_v23  ;;  %v321_v24 = vld [vmem:[%s1253_s28 + $0x180] sm:$0xff]  ;;  %v323_v25 = vld [vmem:[%s1253_s28 + $0x190] sm:$0xff] }
  0x2c   : > { %v325_v26 = vld [vmem:[%s1253_s28 + $0x1a0] sm:$0xff]  ;;  %322 = vst [vmem:[%s1258_s27 + $0xc0] sm:$0xff] %v321_v24  ;;  %324 = vst [vmem:[%s1258_s27 + $0xc8] sm:$0xff] %v323_v25  ;;  %v327_v27 = vld [vmem:[%s1253_s28 + $0x1b0] sm:$0xff] }
  0x2d   : > { %326 = vst [vmem:[%s1258_s27 + $0xd0] sm:$0xff] %v325_v26  ;;  %v329_v28 = vld [vmem:[%s1253_s28 + $0x1c0] sm:$0xff]  ;;  %v331_v29 = vld [vmem:[%s1253_s28 + $0x1d0] sm:$0xff]  ;;  %328 = vst [vmem:[%s1258_s27 + $0xd8] sm:$0xff] %v327_v27 }
  0x2e   : > { %330 = vst [vmem:[%s1258_s27 + $0xe0] sm:$0xff] %v329_v28  ;;  %332 = vst [vmem:[%s1258_s27 + $0xe8] sm:$0xff] %v331_v29  ;;  %v333_v30 = vld [vmem:[%s1253_s28 + $0x1e0] sm:$0xff]  ;;  %v335_v31 = vld [vmem:[%s1253_s28 + $0x1f0] sm:$0xff] }
  0x2f   : > { %334 = vst [vmem:[%s1258_s27 + $0xf0] sm:$0xff] %v333_v30  ;;  %336 = vst [vmem:[%s1258_s27 + $0xf8] sm:$0xff] %v335_v31 }
  0x30 PF: > { %p895_p11 = scmp.ge.s32.totalorder %s1136_s22, 1  ;;  %p349_p12 = scmp.lt.s32.totalorder %s1136_s22, 19 }
  0x32   : > { %p350_p13 = pnand %p895_p11, %p349_p12 }
  0x33   : > { %s356_s29 = sand.u32 (!%p350_p13), 1, %s1112_s17   ;;  %s387_s30 = sand.u32 (!%p350_p13), 1, %s1104_s15  }
  0x34   : > { %353 = sbr.rel (%p350_p13) target bundleno = 379 (0x17b), region = 66  ;;  %s896_s5 = sshll.u32 (!%p350_p13), %s356_s29, 8 }
  0x35   : > { %s1325_s9 = sshll.u32 (!%p350_p13), %s387_s30, 1  ;;  %s898_s10 = sshll.u32 (!%p350_p13), %s1120_s0, 1 }
  0x36   : > { %s1329_s11 = sshll.u32 (!%p350_p13), %s1124_s19, 1  ;;  %p393_p0 = scmp.lt.s32.totalorder (!%p350_p13), %s898_s10, 17 }
  0x37   : > { %p402_p1 = scmp.lt.s32.totalorder (!%p350_p13), %s1329_s11, 3  ;;  %s1345_s19 = scalar_lea.vmem (!%p350_p13), [#allocation3], %s896_s5 }
  0x38   : > { %s389_s28 = scalar_lea.vmem (!%p350_p13), [#allocation4], %s1325_s9  ;;  %p900_p2 = scmp.ne.s32.totalorder (!%p350_p13), %s1120_s0, 0 }
  0x3b   : > { %s1462_s10 = smov (!%p393_p0, %s898_s10), 17  ;;  %410 = sbr.rel (%p900_p2) target bundleno = 66 (0x42), region = 74 }
  0x3c   : > { %s1335_s12 = scalar_select %p402_p1, %s1329_s11, 3 }
  0x3d   : > { %s397_s15 = scalar_lea.vmem %s1441_s1, %s1462_s10  ;;  %v1138_v32 = vmov (!%p900_p2), 0.0  }
  0x3e   : > { %s404_s26 = scalar_lea.vmem %s1443_s3, %s1335_s12  ;;  %411 = vst [vmem:[#allocation2] sm:$0xf] (!%p900_p2), %v1138_v32 }
  0x42 PF: > { %v1018_v33 = vld [vmem:[%s1345_s19 + $0x4] ss:$8 sps:$4 sm:$0xff]   ;;  %v1020_v34 = vld [vmem:[%s1345_s19] ss:$8 sps:$4 sm:$0xff]   ;;  %v1021_v35 = vld [vmem:[%s1345_s19 + $0x14] ss:$8 sps:$4 sm:$0xff]   ;;  %v458_v44 = vlaneseq }
  0x43   : > { %631 = vmatprep.subr.bf16.mxu0 %v1018_v33  ;;  %v1023_v36 = vld [vmem:[%s1345_s19 + $0x10] ss:$8 sps:$4 sm:$0xff]   ;;  %v1024_v37 = vld [vmem:[%s1345_s19 + $0x24] ss:$8 sps:$4 sm:$0xff]   ;;  %v1026_v38 = vld [vmem:[%s1345_s19 + $0x20] ss:$8 sps:$4 sm:$0xff]  }
  0x44   : > { %632 = vmatpush1.bf16.msra.mxu0 %v1020_v34  ;;  %v1027_v39 = vld [vmem:[%s1345_s19 + $0x34] ss:$8 sps:$4 sm:$0xff]   ;;  %v1029_v40 = vld [vmem:[%s1345_s19 + $0x30] ss:$8 sps:$4 sm:$0xff]   ;;  %v1030_v41 = vld [vmem:[%s1345_s19 + $0x44] ss:$8 sps:$4 sm:$0xff]  }
  0x45   : > { %633 = vmatprep.subr.bf16.mxu0 %v1021_v35  ;;  %v1139_v42 = vmov 1966171168   ;;  %v1032_v45 = vld [vmem:[%s1345_s19 + $0x40] ss:$8 sps:$4 sm:$0xff]   ;;  %v1033_v46 = vld [vmem:[%s1345_s19 + $0x54] ss:$8 sps:$4 sm:$0xff]  }
  0x46   : > { %v456_v43 = vunpack.c.l.s4 %v1139_v42  ;;  %v1360_v48 = vshrl.u32 %v458_v44, 7  ;;  %v1035_v49 = vld [vmem:[%s1345_s19 + $0x50] ss:$8 sps:$4 sm:$0xff]   ;;  %v1036_v50 = vld [vmem:[%s1345_s19 + $0x64] ss:$8 sps:$4 sm:$0xff]   ;;  %p934_p3 = scmp.ne.s32.totalorder %s1120_s0, 8 }
  0x47   : > { %v901_v52 = vld.sshfl [vmem:[%s397_s15] sm:$0x11 pattern:$0x75316420]  ;;  %v1038_v54 = vld [vmem:[%s1345_s19 + $0x60] ss:$8 sps:$4 sm:$0xff]  }
  0x48   : > { %634 = vmatpush1.bf16.msra.mxu0 %v1023_v36  ;;  %v457_v47 = vunpack.c.0.s8 %v456_v43  ;;  %v454_v53 = vcombine.high %v901_v52, %v901_v52  ;;  %v1039_v55 = vld [vmem:[%s1345_s19 + $0x74] ss:$8 sps:$4 sm:$0xff]   ;;  %v1041_v57 = vld [vmem:[%s1345_s19 + $0x70] ss:$8 sps:$4 sm:$0xff]   ;;  %v1042_v58 = vld [vmem:[%s1345_s19 + $0x84] ss:$8 sps:$4 sm:$0xff]  }
  0x49   : > { %635 = vmatprep.subr.bf16.mxu0 %v1024_v37  ;;  %v1044_v59 = vld [vmem:[%s1345_s19 + $0x80] ss:$8 sps:$4 sm:$0xff]   ;;  %v1045_v60 = vld [vmem:[%s1345_s19 + $0x94] ss:$8 sps:$4 sm:$0xff]   ;;  %v1047_v61 = vld [vmem:[%s1345_s19 + $0x90] ss:$8 sps:$4 sm:$0xff]  }
  0x4a   : > { %v1365_v51 = vsub.s32 %v457_v47, %v1360_v48  ;;  %v1048_v62 = vld [vmem:[%s1345_s19 + $0xa4] ss:$8 sps:$4 sm:$0xff]   ;;  %v1050_v63 = vld [vmem:[%s1345_s19 + $0xa0] ss:$8 sps:$4 sm:$0xff]   ;;  %v1051_v0 = vld [vmem:[%s1345_s19 + $0xb4] ss:$8 sps:$4 sm:$0xff]  }
  0x4b   : > { %v1053_v1 = vld [vmem:[%s1345_s19 + $0xb0] ss:$8 sps:$4 sm:$0xff]   ;;  %v1054_v2 = vld [vmem:[%s1345_s19 + $0xc4] ss:$8 sps:$4 sm:$0xff]   ;;  %v1056_v3 = vld [vmem:[%s1345_s19 + $0xc0] ss:$8 sps:$4 sm:$0xff]  }
  0x4c   : > { %636 = vmatpush1.bf16.msra.mxu0 %v1026_v38  ;;  %v468_v56 = vrot.slane %v454_v53, %v1365_v51  ;;  %v1057_v4 = vld [vmem:[%s1345_s19 + $0xd4] ss:$8 sps:$4 sm:$0xff]   ;;  %v1059_v5 = vld [vmem:[%s1345_s19 + $0xd0] ss:$8 sps:$4 sm:$0xff]   ;;  %v1060_v6 = vld [vmem:[%s1345_s19 + $0xe4] ss:$8 sps:$4 sm:$0xff]   ;;  %v461_v10 = vrot.slane %v901_v52, %v1365_v51 }
  0x4d   : > { %637 = vmatprep.subr.bf16.mxu0 %v1027_v39  ;;  %v1062_v7 = vld [vmem:[%s1345_s19 + $0xe0] ss:$8 sps:$4 sm:$0xff]   ;;  %v1063_v8 = vld [vmem:[%s1345_s19 + $0xf4] ss:$8 sps:$4 sm:$0xff]   ;;  %v1065_v9 = vld [vmem:[%s1345_s19 + $0xf0] ss:$8 sps:$4 sm:$0xff]  }
  0x4e   : > { %663 = vmatprep.mubr.bf16.mxu0 %v468_v56  ;;  %v1140_v11 = vmov 1983009808   ;;  %v412_v19 = vld [vmem:[#allocation2] sm:$0xf]  ;;  %v694_v24 = vsub.s32 (!%p934_p3), 0, %v1360_v48  ;;  %v698_v25 = vsub.s32 (!%p934_p3), 1, %v1360_v48 }
  0x4f   : > { %v676_v12 = vunpack.c.l.s4 %v1140_v11  ;;  %v690_v23 = vld [vmem:[%s404_s26] sm:$0x3] (!%p934_p3) }
  0x50   : > { %638 = vmatpush1.bf16.msra.mxu0 %v1029_v40  ;;  %v695_v26 = vrot.slane (!%p934_p3), %v690_v23, %v694_v24  ;;  %v699_v27 = vrot.slane (!%p934_p3), %v690_v23, %v698_v25 }
  0x51   : > { %639 = vmatprep.subr.bf16.mxu0 %v1030_v41  ;;  %v677_v13 = vunpack.c.0.s8 %v676_v12 }
  0x52   : > { %v700_v28 = vcombine.low (!%p934_p3), %v695_v26, %v699_v27 }
  0x53   : > { %v680_v15 = vsub.s32 %v677_v13, %v1360_v48 }
  0x54   : > { %640 = vmatpush1.bf16.msra.mxu0 %v1032_v45 }
  0x55   : > { %641 = vmatprep.subr.bf16.mxu0 %v1033_v46  ;;  %v707_v30 = vrot.slane (!%p934_p3), %v700_v28, %v680_v15 }
  0x58   : > { %642 = vmatpush1.bf16.msra.mxu0 %v1035_v49 }
  0x59   : > { %643 = vmatprep.subr.bf16.mxu0 %v1036_v50 }
  0x5c   : > { %644 = vmatpush1.bf16.msra.mxu0 %v1038_v54 }
  0x5d   : > { %645 = vmatprep.subr.bf16.mxu0 %v1039_v55 }
  0x60   : > { %646 = vmatpush1.bf16.msra.mxu0 %v1041_v57 }
  0x61   : > { %647 = vmatprep.subr.bf16.mxu0 %v1042_v58 }
  0x64   : > { %648 = vmatpush1.bf16.msra.mxu0 %v1044_v59 }
  0x65   : > { %649 = vmatprep.subr.bf16.mxu0 %v1045_v60 }
  0x68   : > { %650 = vmatpush1.bf16.msra.mxu0 %v1047_v61 }
  0x69   : > { %651 = vmatprep.subr.bf16.mxu0 %v1048_v62 }
  0x6c   : > { %652 = vmatpush1.bf16.msra.mxu0 %v1050_v63 }
  0x6d   : > { %653 = vmatprep.subr.bf16.mxu0 %v1051_v0 }
  0x70   : > { %654 = vmatpush1.bf16.msra.mxu0 %v1053_v1 }
  0x71   : > { %655 = vmatprep.subr.bf16.mxu0 %v1054_v2 }
  0x74   : > { %656 = vmatpush1.bf16.msra.mxu0 %v1056_v3 }
  0x75   : > { %657 = vmatprep.subr.bf16.mxu0 %v1057_v4 }
  0x78   : > { %658 = vmatpush1.bf16.msra.mxu0 %v1059_v5 }
  0x79   : > { %659 = vmatprep.subr.bf16.mxu0 %v1060_v6 }
  0x7c   : > { %660 = vmatpush1.bf16.msra.mxu0 %v1062_v7 }
  0x7d   : > { %661 = vmatprep.subr.bf16.mxu0 %v1063_v8 }
  0x80   : > { %662 = vmatpush1.bf16.msra.mxu0 %v1065_v9 }
  0x83   : > { %664 = vmatmul.mubr.bf16.vlgmr.msra.gmra.mrb[0].mxu0 %v461_v10 }
 0x156   : > { %v665_v14 = vpop.f32.mrb[0].mxu0 }
 0x157   : > { %v667_v16 = vpop.f32.mrb[1].mxu0 }
 0x158   : > { %v674_v17 = vcombine.low %v665_v14, %v667_v16  ;;  %v669_v18 = vpop.f32.mrb[2].mxu0  ;;  %688 = sbr.rel (%p934_p3) target bundleno = 371 (0x173), region = 78 }
 0x159   : > { %v670_v20 = vpop.f32.mrb[3].mxu0 }
 0x15a   : > { %v681_v21 = vrot.slane %v674_v17, %v680_v15 }
 0x15c   : > { %v683_v22 = vadd.f32 %v681_v21, %v412_v19 }
 0x15e   : > { %684 = vst [vmem:[#allocation2] sm:$0xf] %v683_v22 }
 0x165   : > { %v689_v29 = vld [vmem:[#allocation2] sm:$0xf] }
 0x166   : > { %v709_v31 = vadd.f32 %v707_v30, %v689_v29 }
 0x168   : > { %v710_v32 = vmax.f32 %v709_v31, 0.0 }
 0x16a   : > { %v718_v33 = vrot.slane %v710_v32, %v680_v15 }
 0x16c   : > { %v719_v34 = vcombine.high %v718_v33, %v718_v33 }
 0x16e   : > { %v935_v35 = vpack.c.bf16 %v719_v34, %v718_v33 }
 0x170   : > { %v733_v36 = vrot.slane %v935_v35, %v1365_v51 }
 0x172   : > { %936 = vst.sshfl [vmem:[%s389_s28] sm:$0x5 pattern:$0x73625140] %v733_v36 }
 0x173 PF: > { %749 = sbr.rel (!%p1234_p9) target bundleno = 379 (0x17b), region = 82  ;;  %s827_s12 = scalar_lea.vmem (%p1234_p9), %s1444_s4, %s1329_s11 }
 0x179   : > { %v769_v37 = vld [vmem:[%s389_s28] sm:$0x3] (%p1234_p9) }
 0x17a   : > { %939 = vst [vmem:[%s827_s12 + $0x10] sm:$0x3] %v769_v37 }
 0x17b PF: > { %s15_s22 = sadd.s32 1, %s1136_s22   ;;  %s1447_s15 = smov %s1108_s16 }
 0x17c   : > { %p12_p4 = scmp.ge.s32.totalorder %s15_s22, 20   ;;  %s1448_s16 = smov %s1239_s7 }
 0x17d   : > { %s1449_s17 = smov %s1116_s18  ;;  %s1450_s18 = smov %s1242_s8 }
 0x17e   : > { %s1451_s0 = smov %s1128_s20  ;;  %s1452_s19 = smov %s1132_s21 }
 0x17f   : > { %s1453_s20 = smov %s1456_s23  ;;  %s1454_s21 = smov %s1460_s24 }
 0x180   :  { %14 = sbr.rel (!%p12_p4) target bundleno = 5 (0x5), region = 154 }

// kernel: resnet_forward.25
= control target key start
LH: loop header
LB: loop body
LE: loop exit
PB: predicated region body
PF: predicated region fallthrough
CT: control target
= control target key end

     0   :  { %s1069_s12 = smov 0   ;;  %s1071_s13 = smov 0   ;;  %s1258_s0 = inlined_call_operand.vmem [shape: bf16[2,256], index: 0, kind: input, shape index: {}]   ;;  %s1259_s1 = inlined_call_operand.vmem [shape: bf16[256,512], index: 1, kind: input, shape index: {}]   ;;  %s1260_s2 = inlined_call_operand.vmem [shape: f32[1,512], index: 2, kind: input, shape index: {}]   ;;  %s1261_s3 = inlined_call_operand.vmem [shape: bf16[2,512], index: 3, kind: output, shape index: {}]  }
   0x1   :  { %s1073_s14 = smov 0   ;;  %s1075_s15 = smov 0  }
   0x2   :  { %s1077_s16 = smov 0  }
   0x3 LB: > { %s28_s17 = sadd.s32 1, %s1040_s15  ;;  %p76_p1 = scmp.ne.s32.totalorder %s1032_s13, %s1028_s12  ;;  %s1044_s16 = sphi %s1077_s16, %s13_s16   ;;  %s1040_s15 = sphi %s1075_s15, %s1265_s15   ;;  %s1036_s14 = sphi %s1073_s14, %s1264_s14   ;;  %s1032_s13 = sphi %s1071_s13, %s1263_s13   ;;  %s1028_s12 = sphi %s1069_s12, %s1262_s12  }
   0x4   : > { %p30_p0 = scmp.ge.s32.totalorder %s28_s17, 2  ;;  %p77_p2 = scmp.eq.s32.totalorder %s1044_s16, 0 }
   0x5   : > { %s69_s19 = sadd.s32 1, %s1032_s13  ;;  %p869_p5 = scmp.ge.s32.totalorder %s1044_s16, 2 }
   0x6   : > { %s1267_s17 = smov (%p30_p0, %s28_s17), 0  ;;  %p78_p3 = por %p77_p2, %p76_p1 }
   0x7   : > { %s65_s18 = ssub.s32 %s1040_s15, %s1267_s17  ;;  %168 = sbr.rel (%p869_p5) target bundleno = 34 (0x22), region = 20 }
   0x8   : > { %p67_p4 = scmp.eq.s32.totalorder %s65_s18, 0 }
   0xa   : > { %s1104_s20 = scalar_select %p67_p4, %s1032_s13, %s69_s19  }
   0xe   : > { %171 = sbr.rel (!%p78_p3) target bundleno = 34 (0x22), region = 24  ;;  %s173_s21 = sand.u32 (%p78_p3), 1, %s1032_s13  }
   0xf   : > { %s914_s22 = sshll.u32 (%p78_p3), %s1040_s15, 3  ;;  %s870_s23 = sshll.u32 (%p78_p3), %s173_s21, 8 }
  0x10   : > { %s1112_s26 = scalar_lea.vmem (%p78_p3), %s1259_s1, %s914_s22  ;;  %s1117_s27 = scalar_lea.vmem (%p78_p3), [#allocation3], %s870_s23 }
  0x11   : > { %v271_v0 = vld [vmem:[%s1112_s26] sm:$0xff] (%p78_p3)  ;;  %v273_v1 = vld [vmem:[%s1112_s26 + $0x10] sm:$0xff] (%p78_p3) }
  0x12   : > { %v275_v2 = vld [vmem:[%s1112_s26 + $0x20] sm:$0xff] (%p78_p3)  ;;  %272 = vst [vmem:[%s1117_s27] sm:$0xff] (%p78_p3), %v271_v0  ;;  %274 = vst [vmem:[%s1117_s27 + $0x8] sm:$0xff] (%p78_p3), %v273_v1  ;;  %v277_v3 = vld [vmem:[%s1112_s26 + $0x30] sm:$0xff] (%p78_p3) }
  0x13   : > { %276 = vst [vmem:[%s1117_s27 + $0x10] sm:$0xff] (%p78_p3), %v275_v2  ;;  %v279_v4 = vld [vmem:[%s1112_s26 + $0x40] sm:$0xff] (%p78_p3)  ;;  %v281_v5 = vld [vmem:[%s1112_s26 + $0x50] sm:$0xff] (%p78_p3)  ;;  %278 = vst [vmem:[%s1117_s27 + $0x18] sm:$0xff] (%p78_p3), %v277_v3 }
  0x14   : > { %280 = vst [vmem:[%s1117_s27 + $0x20] sm:$0xff] (%p78_p3), %v279_v4  ;;  %282 = vst [vmem:[%s1117_s27 + $0x28] sm:$0xff] (%p78_p3), %v281_v5  ;;  %v283_v6 = vld [vmem:[%s1112_s26 + $0x60] sm:$0xff] (%p78_p3)  ;;  %v285_v7 = vld [vmem:[%s1112_s26 + $0x70] sm:$0xff] (%p78_p3) }
  0x15   : > { %v287_v8 = vld [vmem:[%s1112_s26 + $0x80] sm:$0xff]  ;;  %284 = vst [vmem:[%s1117_s27 + $0x30] sm:$0xff] %v283_v6  ;;  %286 = vst [vmem:[%s1117_s27 + $0x38] sm:$0xff] %v285_v7  ;;  %v289_v9 = vld [vmem:[%s1112_s26 + $0x90] sm:$0xff] }
  0x16   : > { %288 = vst [vmem:[%s1117_s27 + $0x40] sm:$0xff] %v287_v8  ;;  %v291_v10 = vld [vmem:[%s1112_s26 + $0xa0] sm:$0xff]  ;;  %v293_v11 = vld [vmem:[%s1112_s26 + $0xb0] sm:$0xff]  ;;  %290 = vst [vmem:[%s1117_s27 + $0x48] sm:$0xff] %v289_v9 }
  0x17   : > { %292 = vst [vmem:[%s1117_s27 + $0x50] sm:$0xff] %v291_v10  ;;  %294 = vst [vmem:[%s1117_s27 + $0x58] sm:$0xff] %v293_v11  ;;  %v295_v12 = vld [vmem:[%s1112_s26 + $0xc0] sm:$0xff]  ;;  %v297_v13 = vld [vmem:[%s1112_s26 + $0xd0] sm:$0xff] }
  0x18   : > { %v299_v14 = vld [vmem:[%s1112_s26 + $0xe0] sm:$0xff]  ;;  %296 = vst [vmem:[%s1117_s27 + $0x60] sm:$0xff] %v295_v12  ;;  %298 = vst [vmem:[%s1117_s27 + $0x68] sm:$0xff] %v297_v13  ;;  %v301_v15 = vld [vmem:[%s1112_s26 + $0xf0] sm:$0xff] }
  0x19   : > { %300 = vst [vmem:[%s1117_s27 + $0x70] sm:$0xff] %v299_v14  ;;  %v303_v16 = vld [vmem:[%s1112_s26 + $0x100] sm:$0xff]  ;;  %v305_v17 = vld [vmem:[%s1112_s26 + $0x110] sm:$0xff]  ;;  %302 = vst [vmem:[%s1117_s27 + $0x78] sm:$0xff] %v301_v15 }
  0x1a   : > { %304 = vst [vmem:[%s1117_s27 + $0x80] sm:$0xff] %v303_v16  ;;  %306 = vst [vmem:[%s1117_s27 + $0x88] sm:$0xff] %v305_v17  ;;  %v307_v18 = vld [vmem:[%s1112_s26 + $0x120] sm:$0xff]  ;;  %v309_v19 = vld [vmem:[%s1112_s26 + $0x130] sm:$0xff] }
  0x1b   : > { %v311_v20 = vld [vmem:[%s1112_s26 + $0x140] sm:$0xff]  ;;  %308 = vst [vmem:[%s1117_s27 + $0x90] sm:$0xff] %v307_v18  ;;  %310 = vst [vmem:[%s1117_s27 + $0x98] sm:$0xff] %v309_v19  ;;  %v313_v21 = vld [vmem:[%s1112_s26 + $0x150] sm:$0xff] }
  0x1c   : > { %312 = vst [vmem:[%s1117_s27 + $0xa0] sm:$0xff] %v311_v20  ;;  %v315_v22 = vld [vmem:[%s1112_s26 + $0x160] sm:$0xff]  ;;  %v317_v23 = vld [vmem:[%s1112_s26 + $0x170] sm:$0xff]  ;;  %314 = vst [vmem:[%s1117_s27 + $0xa8] sm:$0xff] %v313_v21 }
  0x1d   : > { %316 = vst [vmem:[%s1117_s27 + $0xb0] sm:$0xff] %v315_v22  ;;  %318 = vst [vmem:[%s1117_s27 + $0xb8] sm:$0xff] %v317_v23  ;;  %v319_v24 = vld [vmem:[%s1112_s26 + $0x180] sm:$0xff]  ;;  %v321_v25 = vld [vmem:[%s1112_s26 + $0x190] sm:$0xff] }
  0x1e   : > { %v323_v26 = vld [vmem:[%s1112_s26 + $0x1a0] sm:$0xff]  ;;  %320 = vst [vmem:[%s1117_s27 + $0xc0] sm:$0xff] %v319_v24  ;;  %322 = vst [vmem:[%s1117_s27 + $0xc8] sm:$0xff] %v321_v25  ;;  %v325_v27 = vld [vmem:[%s1112_s26 + $0x1b0] sm:$0xff] }
  0x1f   : > { %324 = vst [vmem:[%s1117_s27 + $0xd0] sm:$0xff] %v323_v26  ;;  %v327_v28 = vld [vmem:[%s1112_s26 + $0x1c0] sm:$0xff]  ;;  %v329_v29 = vld [vmem:[%s1112_s26 + $0x1d0] sm:$0xff]  ;;  %326 = vst [vmem:[%s1117_s27 + $0xd8] sm:$0xff] %v325_v27 }
  0x20   : > { %328 = vst [vmem:[%s1117_s27 + $0xe0] sm:$0xff] %v327_v28  ;;  %330 = vst [vmem:[%s1117_s27 + $0xe8] sm:$0xff] %v329_v29  ;;  %v331_v30 = vld [vmem:[%s1112_s26 + $0x1e0] sm:$0xff]  ;;  %v333_v31 = vld [vmem:[%s1112_s26 + $0x1f0] sm:$0xff] }
  0x21   : > { %332 = vst [vmem:[%s1117_s27 + $0xf0] sm:$0xff] %v331_v30  ;;  %334 = vst [vmem:[%s1117_s27 + $0xf8] sm:$0xff] %v333_v31 }
  0x22 PF: > { %p873_p6 = scmp.ge.s32.totalorder %s1044_s16, 1  ;;  %p347_p7 = scmp.lt.s32.totalorder %s1044_s16, 3 }
  0x24   : > { %p348_p8 = pnand %p873_p6, %p347_p7 }
  0x25   : > { %s354_s28 = sand.u32 (!%p348_p8), 1, %s1028_s12   ;;  %v1186_v32 = vld.sshfl [vmem:[%s1258_s0] sm:$0x11 pattern:$0x75316420] (!%p348_p8)  ;;  %v468_v33 = vlaneseq (!%p348_p8)  ;;  %v1047_v10 = vmov (!%p348_p8), 0.0  }
  0x26   : > { %351 = sbr.rel (%p348_p8) target bundleno = 343 (0x157), region = 66  ;;  %s874_s4 = sshll.u32 (!%p348_p8), %s354_s28, 8  ;;  %v1046_v34 = vmov (!%p348_p8), 1966171168   ;;  %v464_v39 = vcombine.high (!%p348_p8), %v1186_v32, %v1186_v32  ;;  %421 = vst [vmem:[#allocation2] sm:$0xf] (!%p348_p8), %v1047_v10 }
  0x27   : > { %v466_v35 = vunpack.c.l.s4 (!%p348_p8), %v1046_v34  ;;  %v1188_v36 = vshrl.u32 (!%p348_p8), %v468_v33, 7  ;;  %s1190_s5 = scalar_lea.vmem (!%p348_p8), [#allocation3], %s874_s4  ;;  %s875_s6 = sshll.u32 (!%p348_p8), %s1036_s14, 1  ;;  %v1048_v11 = vmov (!%p348_p8), 1983009808  }
  0x28   : > { %v958_v37 = vld [vmem:[%s1190_s5 + $0x4] ss:$8 sps:$4 sm:$0xff] (!%p348_p8)   ;;  %v960_v38 = vld [vmem:[%s1190_s5] ss:$8 sps:$4 sm:$0xff] (!%p348_p8)   ;;  %v961_v41 = vld [vmem:[%s1190_s5 + $0x14] ss:$8 sps:$4 sm:$0xff] (!%p348_p8)   ;;  %v686_v12 = vunpack.c.l.s4 (!%p348_p8), %v1048_v11 }
  0x29   : > { %v467_v40 = vunpack.c.0.s8 (!%p348_p8), %v466_v35  ;;  %641 = vmatprep.subr.bf16.mxu0 (!%p348_p8), %v958_v37  ;;  %v963_v42 = vld [vmem:[%s1190_s5 + $0x10] ss:$8 sps:$4 sm:$0xff] (!%p348_p8)   ;;  %v964_v44 = vld [vmem:[%s1190_s5 + $0x24] ss:$8 sps:$4 sm:$0xff] (!%p348_p8)   ;;  %v966_v46 = vld [vmem:[%s1190_s5 + $0x20] ss:$8 sps:$4 sm:$0xff] (!%p348_p8)  }
  0x2a   : > { %642 = vmatpush1.bf16.msra.mxu0 (!%p348_p8), %v960_v38  ;;  %v967_v47 = vld [vmem:[%s1190_s5 + $0x34] ss:$8 sps:$4 sm:$0xff] (!%p348_p8)   ;;  %v969_v48 = vld [vmem:[%s1190_s5 + $0x30] ss:$8 sps:$4 sm:$0xff] (!%p348_p8)   ;;  %v970_v49 = vld [vmem:[%s1190_s5 + $0x44] ss:$8 sps:$4 sm:$0xff] (!%p348_p8)   ;;  %v687_v13 = vunpack.c.0.s8 (!%p348_p8), %v686_v12 }
  0x2b   : > { %v1199_v43 = vsub.s32 (!%p348_p8), %v467_v40, %v1188_v36  ;;  %643 = vmatprep.subr.bf16.mxu0 (!%p348_p8), %v961_v41  ;;  %v972_v50 = vld [vmem:[%s1190_s5 + $0x40] ss:$8 sps:$4 sm:$0xff] (!%p348_p8)   ;;  %v973_v51 = vld [vmem:[%s1190_s5 + $0x54] ss:$8 sps:$4 sm:$0xff] (!%p348_p8)   ;;  %v975_v52 = vld [vmem:[%s1190_s5 + $0x50] ss:$8 sps:$4 sm:$0xff] (!%p348_p8)  }
  0x2c   : > { %v976_v53 = vld [vmem:[%s1190_s5 + $0x64] ss:$8 sps:$4 sm:$0xff] (!%p348_p8)   ;;  %v978_v54 = vld [vmem:[%s1190_s5 + $0x60] ss:$8 sps:$4 sm:$0xff] (!%p348_p8)   ;;  %v979_v55 = vld [vmem:[%s1190_s5 + $0x74] ss:$8 sps:$4 sm:$0xff] (!%p348_p8)   ;;  %v690_v15 = vsub.s32 (!%p348_p8), %v687_v13, %v1188_v36 }
  0x2d   : > { %v478_v45 = vrot.slane %v464_v39, %v1199_v43  ;;  %v981_v56 = vld [vmem:[%s1190_s5 + $0x70] ss:$8 sps:$4 sm:$0xff]   ;;  %v982_v57 = vld [vmem:[%s1190_s5 + $0x84] ss:$8 sps:$4 sm:$0xff]   ;;  %v984_v58 = vld [vmem:[%s1190_s5 + $0x80] ss:$8 sps:$4 sm:$0xff]   ;;  %v471_v9 = vrot.slane %v1186_v32, %v1199_v43 }
  0x2e   : > { %644 = vmatpush1.bf16.msra.mxu0 %v963_v42  ;;  %v985_v59 = vld [vmem:[%s1190_s5 + $0x94] ss:$8 sps:$4 sm:$0xff]   ;;  %v987_v60 = vld [vmem:[%s1190_s5 + $0x90] ss:$8 sps:$4 sm:$0xff]   ;;  %v988_v61 = vld [vmem:[%s1190_s5 + $0xa4] ss:$8 sps:$4 sm:$0xff]  }
  0x2f   : > { %673 = vmatprep.mubr.bf16.mxu0 %v478_v45  ;;  %645 = vmatprep.subr.bf16.mxu0 %v964_v44  ;;  %v990_v62 = vld [vmem:[%s1190_s5 + $0xa0] ss:$8 sps:$4 sm:$0xff]   ;;  %v991_v63 = vld [vmem:[%s1190_s5 + $0xb4] ss:$8 sps:$4 sm:$0xff]   ;;  %v993_v0 = vld [vmem:[%s1190_s5 + $0xb0] ss:$8 sps:$4 sm:$0xff]  }
  0x30   : > { %v994_v1 = vld [vmem:[%s1190_s5 + $0xc4] ss:$8 sps:$4 sm:$0xff]   ;;  %v996_v2 = vld [vmem:[%s1190_s5 + $0xc0] ss:$8 sps:$4 sm:$0xff]   ;;  %v997_v3 = vld [vmem:[%s1190_s5 + $0xd4] ss:$8 sps:$4 sm:$0xff]  }
  0x31   : > { %v999_v4 = vld [vmem:[%s1190_s5 + $0xd0] ss:$8 sps:$4 sm:$0xff]   ;;  %v1000_v5 = vld [vmem:[%s1190_s5 + $0xe4] ss:$8 sps:$4 sm:$0xff]   ;;  %v1002_v6 = vld [vmem:[%s1190_s5 + $0xe0] ss:$8 sps:$4 sm:$0xff]  }
  0x32   : > { %646 = vmatpush1.bf16.msra.mxu0 %v966_v46  ;;  %v1003_v7 = vld [vmem:[%s1190_s5 + $0xf4] ss:$8 sps:$4 sm:$0xff]   ;;  %v1005_v8 = vld [vmem:[%s1190_s5 + $0xf0] ss:$8 sps:$4 sm:$0xff]   ;;  %p404_p9 = scmp.lt.s32.totalorder %s875_s6, 3  ;;  %v703_v16 = vsub.s32 0, %v1188_v36 }
  0x33   : > { %647 = vmatprep.subr.bf16.mxu0 %v967_v47  ;;  %v707_v17 = vsub.s32 1, %v1188_v36  ;;  %v422_v22 = vld [vmem:[#allocation2] sm:$0xf] }
  0x34   : > { %s1269_s6 = smov (!%p404_p9, %s875_s6), 3 }
  0x35   : > { %s406_s9 = scalar_lea.vmem %s1260_s2, %s1269_s6  ;;  %s415_s12 = scalar_lea.vmem %s1261_s3, %s1269_s6 }
  0x36   : > { %648 = vmatpush1.bf16.msra.mxu0 %v969_v48  ;;  %v699_v19 = vld [vmem:[%s406_s9] sm:$0x3] }
  0x37   : > { %649 = vmatprep.subr.bf16.mxu0 %v970_v49  ;;  %v704_v25 = vrot.slane %v699_v19, %v703_v16  ;;  %v708_v26 = vrot.slane %v699_v19, %v707_v17 }
  0x39   : > { %v709_v28 = vcombine.low %v704_v25, %v708_v26 }
  0x3a   : > { %650 = vmatpush1.bf16.msra.mxu0 %v972_v50 }
  0x3b   : > { %651 = vmatprep.subr.bf16.mxu0 %v973_v51  ;;  %v716_v29 = vrot.slane %v709_v28, %v690_v15 }
  0x3e   : > { %652 = vmatpush1.bf16.msra.mxu0 %v975_v52 }
  0x3f   : > { %653 = vmatprep.subr.bf16.mxu0 %v976_v53 }
  0x42   : > { %654 = vmatpush1.bf16.msra.mxu0 %v978_v54 }
  0x43   : > { %655 = vmatprep.subr.bf16.mxu0 %v979_v55 }
  0x46   : > { %656 = vmatpush1.bf16.msra.mxu0 %v981_v56 }
  0x47   : > { %657 = vmatprep.subr.bf16.mxu0 %v982_v57 }
  0x4a   : > { %658 = vmatpush1.bf16.msra.mxu0 %v984_v58 }
  0x4b   : > { %659 = vmatprep.subr.bf16.mxu0 %v985_v59 }
  0x4e   : > { %660 = vmatpush1.bf16.msra.mxu0 %v987_v60 }
  0x4f   : > { %661 = vmatprep.subr.bf16.mxu0 %v988_v61 }
  0x52   : > { %662 = vmatpush1.bf16.msra.mxu0 %v990_v62 }
  0x53   : > { %663 = vmatprep.subr.bf16.mxu0 %v991_v63 }
  0x56   : > { %664 = vmatpush1.bf16.msra.mxu0 %v993_v0 }
  0x57   : > { %665 = vmatprep.subr.bf16.mxu0 %v994_v1 }
  0x5a   : > { %666 = vmatpush1.bf16.msra.mxu0 %v996_v2 }
  0x5b   : > { %667 = vmatprep.subr.bf16.mxu0 %v997_v3 }
  0x5e   : > { %668 = vmatpush1.bf16.msra.mxu0 %v999_v4 }
  0x5f   : > { %669 = vmatprep.subr.bf16.mxu0 %v1000_v5 }
  0x62   : > { %670 = vmatpush1.bf16.msra.mxu0 %v1002_v6 }
  0x63   : > { %671 = vmatprep.subr.bf16.mxu0 %v1003_v7 }
  0x66   : > { %672 = vmatpush1.bf16.msra.mxu0 %v1005_v8 }
  0x69   : > { %674 = vmatmul.mubr.bf16.vlgmr.msra.gmra.mrb[0].mxu0 %v471_v9 }
 0x13c   : > { %v675_v14 = vpop.f32.mrb[0].mxu0 }
 0x13d   : > { %v677_v18 = vpop.f32.mrb[1].mxu0 }
 0x13e   : > { %v684_v20 = vcombine.low %v675_v14, %v677_v18  ;;  %v679_v21 = vpop.f32.mrb[2].mxu0 }
 0x13f   : > { %v680_v23 = vpop.f32.mrb[3].mxu0 }
 0x140   : > { %v691_v24 = vrot.slane %v684_v20, %v690_v15 }
 0x142   : > { %v693_v27 = vadd.f32 %v691_v24, %v422_v22 }
 0x144   : > { %694 = vst [vmem:[#allocation2] sm:$0xf] %v693_v27 }
 0x14b   : > { %v698_v30 = vld [vmem:[#allocation2] sm:$0xf] }
 0x14c   : > { %v718_v31 = vadd.f32 %v716_v29, %v698_v30 }
 0x14e   : > { %v726_v32 = vrot.slane %v718_v31, %v690_v15 }
 0x150   : > { %v727_v33 = vcombine.high %v726_v32, %v726_v32 }
 0x152   : > { %v910_v34 = vpack.c.bf16 %v727_v33, %v726_v32 }
 0x154   : > { %v741_v35 = vrot.slane %v910_v34, %v1199_v43 }
 0x156   : > { %911 = vst.sshfl [vmem:[%s415_s12] sm:$0x5 pattern:$0x73625140] %v741_v35 }
 0x157 PF: > { %s13_s16 = sadd.s32 1, %s1044_s16   ;;  %s1262_s12 = smov %s1032_s13 }
 0x158   : > { %p10_p10 = scmp.ge.s32.totalorder %s13_s16, 4   ;;  %s1263_s13 = smov %s1104_s20 }
 0x159   : > { %s1264_s14 = smov %s1040_s15  ;;  %s1265_s15 = smov %s1267_s17 }
 0x15a   :  { %12 = sbr.rel (!%p10_p10) target bundleno = 3 (0x3), region = 119 }

// kernel: resnet_forward.26
= control target key start
LH: loop header
LB: loop body
LE: loop exit
PB: predicated region body
PF: predicated region fallthrough
CT: control target
= control target key end

     0   :  { %s1638_s15 = smov 0   ;;  %s1640_s16 = smov 0   ;;  %s1975_s0 = inlined_call_operand.vmem [shape: bf16[2,4608], index: 0, kind: input, shape index: {}]   ;;  %s1976_s1 = inlined_call_operand.vmem [shape: bf16[4608,512], index: 1, kind: input, shape index: {}]   ;;  %s1977_s2 = inlined_call_operand.vmem [shape: f32[1,512], index: 2, kind: input, shape index: {}]   ;;  %s1978_s3 = inlined_call_operand.vmem [shape: bf16[2,512], index: 3, kind: input, shape index: {}]   ;;  %s1979_s4 = inlined_call_operand.vmem [shape: bf16[2,512], index: 4, kind: output, shape index: {}]  }
   0x1   :  { %s1642_s17 = smov 0   ;;  %s1644_s18 = smov 0  }
   0x2   :  { %s1646_s19 = smov 0   ;;  %s1648_s20 = smov 0  }
   0x3   :  { %s1650_s21 = smov 0  }
   0x4 LB: > { %s26_s22 = sadd.s32 1, %s1600_s19  ;;  %s29_s23 = sadd.s32 1, %s1604_s20  ;;  %s1608_s21 = sphi %s1650_s21, %s14_s21   ;;  %s1604_s20 = sphi %s1648_s20, %s1985_s20   ;;  %s1600_s19 = sphi %s1646_s19, %s1984_s19   ;;  %s1596_s18 = sphi %s1644_s18, %s1983_s18   ;;  %s1592_s17 = sphi %s1642_s17, %s1982_s17   ;;  %s1588_s16 = sphi %s1640_s16, %s1981_s16   ;;  %s1584_s15 = sphi %s1638_s15, %s1980_s15  }
   0x5   : > { %p27_p0 = scmp.ge.s32.totalorder %s26_s22, 9  ;;  %p77_p1 = scmp.ne.s32.totalorder %s1588_s16, %s1584_s15 }
   0x6   : > { %p78_p2 = scmp.eq.s32.totalorder %s1608_s21, 0  ;;  %s70_s27 = sadd.s32 1, %s1588_s16 }
   0x7   : > { %s1987_s22 = smov (%p27_p0, %s26_s22), 0  ;;  %s1989_s23 = smov (!%p27_p0, %s29_s23), %s1604_s20 }
   0x8   : > { %p79_p3 = por %p78_p2, %p77_p1  ;;  %p31_p4 = scmp.ge.s32.totalorder %s1989_s23, 2 }
   0x9   : > { %s65_s24 = ssub.s32 %s1600_s19, %s1987_s22  ;;  %p1313_p6 = scmp.ge.s32.totalorder %s1608_s21, 18 }
   0xa   : > { %s1991_s23 = smov (%p31_p4, %s1989_s23), 0 }
   0xb   : > { %s66_s25 = ssub.s32 %s1604_s20, %s1991_s23  ;;  %185 = sbr.rel (%p1313_p6) target bundleno = 57 (0x39), region = 16 }
   0xc   : > { %s67_s26 = sor.u32 %s66_s25, %s65_s24 }
   0xd   : > { %p68_p5 = scmp.eq.s32.totalorder %s67_s26, 0 }
   0xf   : > { %s1689_s28 = scalar_select %p68_p5, %s1588_s16, %s70_s27  }
  0x12   : > { %200 = sbr.rel (!%p79_p3) target bundleno = 57 (0x39), region = 24  ;;  %s202_s29 = sand.u32 (%p79_p3), 1, %s1588_s16  }
  0x13   : > { %s1316_s30 = sshll.u32 (%p79_p3), %s1604_s20, 1  ;;  %s1314_s5 = sshll.u32 (%p79_p3), %s202_s29, 9 }
  0x14   : > { %s1396_s6 = sshll.u32 (%p79_p3), %s1600_s19, 8  ;;  %s1703_s12 = scalar_lea.vmem (%p79_p3), [#allocation3], %s1314_s5 }
  0x15   : > { %s208_s7 = sadd.s32 (%p79_p3), %s1396_s6, %s1316_s30 }
  0x16   : > { %s1318_s8 = sshll.u32 (%p79_p3), %s208_s7, 2 }
  0x17   : > { %s1698_s11 = scalar_lea.vmem (%p79_p3), %s1976_s1, %s1318_s8 }
  0x18   : > { %v364_v0 = vld [vmem:[%s1698_s11] sm:$0xff] (%p79_p3)  ;;  %v366_v1 = vld [vmem:[%s1698_s11 + $0x10] sm:$0xff] (%p79_p3) }
  0x19   : > { %v368_v2 = vld [vmem:[%s1698_s11 + $0x20] sm:$0xff]  ;;  %365 = vst [vmem:[%s1703_s12] sm:$0xff] %v364_v0  ;;  %367 = vst [vmem:[%s1703_s12 + $0x8] sm:$0xff] %v366_v1  ;;  %v370_v3 = vld [vmem:[%s1698_s11 + $0x30] sm:$0xff] }
  0x1a   : > { %369 = vst [vmem:[%s1703_s12 + $0x10] sm:$0xff] %v368_v2  ;;  %v372_v4 = vld [vmem:[%s1698_s11 + $0x40] sm:$0xff]  ;;  %v374_v5 = vld [vmem:[%s1698_s11 + $0x50] sm:$0xff]  ;;  %371 = vst [vmem:[%s1703_s12 + $0x18] sm:$0xff] %v370_v3 }
  0x1b   : > { %373 = vst [vmem:[%s1703_s12 + $0x20] sm:$0xff] %v372_v4  ;;  %375 = vst [vmem:[%s1703_s12 + $0x28] sm:$0xff] %v374_v5  ;;  %v376_v6 = vld [vmem:[%s1698_s11 + $0x60] sm:$0xff]  ;;  %v378_v7 = vld [vmem:[%s1698_s11 + $0x70] sm:$0xff] }
  0x1c   : > { %v380_v8 = vld [vmem:[%s1698_s11 + $0x80] sm:$0xff]  ;;  %377 = vst [vmem:[%s1703_s12 + $0x30] sm:$0xff] %v376_v6  ;;  %379 = vst [vmem:[%s1703_s12 + $0x38] sm:$0xff] %v378_v7  ;;  %v382_v9 = vld [vmem:[%s1698_s11 + $0x90] sm:$0xff] }
  0x1d   : > { %381 = vst [vmem:[%s1703_s12 + $0x40] sm:$0xff] %v380_v8  ;;  %v384_v10 = vld [vmem:[%s1698_s11 + $0xa0] sm:$0xff]  ;;  %v386_v11 = vld [vmem:[%s1698_s11 + $0xb0] sm:$0xff]  ;;  %383 = vst [vmem:[%s1703_s12 + $0x48] sm:$0xff] %v382_v9 }
  0x1e   : > { %385 = vst [vmem:[%s1703_s12 + $0x50] sm:$0xff] %v384_v10  ;;  %387 = vst [vmem:[%s1703_s12 + $0x58] sm:$0xff] %v386_v11  ;;  %v388_v12 = vld [vmem:[%s1698_s11 + $0xc0] sm:$0xff]  ;;  %v390_v13 = vld [vmem:[%s1698_s11 + $0xd0] sm:$0xff] }
  0x1f   : > { %v392_v14 = vld [vmem:[%s1698_s11 + $0xe0] sm:$0xff]  ;;  %389 = vst [vmem:[%s1703_s12 + $0x60] sm:$0xff] %v388_v12  ;;  %391 = vst [vmem:[%s1703_s12 + $0x68] sm:$0xff] %v390_v13  ;;  %v394_v15 = vld [vmem:[%s1698_s11 + $0xf0] sm:$0xff] }
  0x20   : > { %393 = vst [vmem:[%s1703_s12 + $0x70] sm:$0xff] %v392_v14  ;;  %v396_v16 = vld [vmem:[%s1698_s11 + $0x100] sm:$0xff]  ;;  %v398_v17 = vld [vmem:[%s1698_s11 + $0x110] sm:$0xff]  ;;  %395 = vst [vmem:[%s1703_s12 + $0x78] sm:$0xff] %v394_v15 }
  0x21   : > { %397 = vst [vmem:[%s1703_s12 + $0x80] sm:$0xff] %v396_v16  ;;  %399 = vst [vmem:[%s1703_s12 + $0x88] sm:$0xff] %v398_v17  ;;  %v400_v18 = vld [vmem:[%s1698_s11 + $0x120] sm:$0xff]  ;;  %v402_v19 = vld [vmem:[%s1698_s11 + $0x130] sm:$0xff] }
  0x22   : > { %v404_v20 = vld [vmem:[%s1698_s11 + $0x140] sm:$0xff]  ;;  %401 = vst [vmem:[%s1703_s12 + $0x90] sm:$0xff] %v400_v18  ;;  %403 = vst [vmem:[%s1703_s12 + $0x98] sm:$0xff] %v402_v19  ;;  %v406_v21 = vld [vmem:[%s1698_s11 + $0x150] sm:$0xff] }
  0x23   : > { %405 = vst [vmem:[%s1703_s12 + $0xa0] sm:$0xff] %v404_v20  ;;  %v408_v22 = vld [vmem:[%s1698_s11 + $0x160] sm:$0xff]  ;;  %v410_v23 = vld [vmem:[%s1698_s11 + $0x170] sm:$0xff]  ;;  %407 = vst [vmem:[%s1703_s12 + $0xa8] sm:$0xff] %v406_v21 }
  0x24   : > { %409 = vst [vmem:[%s1703_s12 + $0xb0] sm:$0xff] %v408_v22  ;;  %411 = vst [vmem:[%s1703_s12 + $0xb8] sm:$0xff] %v410_v23  ;;  %v412_v24 = vld [vmem:[%s1698_s11 + $0x180] sm:$0xff]  ;;  %v414_v25 = vld [vmem:[%s1698_s11 + $0x190] sm:$0xff] }
  0x25   : > { %v416_v26 = vld [vmem:[%s1698_s11 + $0x1a0] sm:$0xff]  ;;  %413 = vst [vmem:[%s1703_s12 + $0xc0] sm:$0xff] %v412_v24  ;;  %415 = vst [vmem:[%s1703_s12 + $0xc8] sm:$0xff] %v414_v25  ;;  %v418_v27 = vld [vmem:[%s1698_s11 + $0x1b0] sm:$0xff] }
  0x26   : > { %417 = vst [vmem:[%s1703_s12 + $0xd0] sm:$0xff] %v416_v26  ;;  %v420_v28 = vld [vmem:[%s1698_s11 + $0x1c0] sm:$0xff]  ;;  %v422_v29 = vld [vmem:[%s1698_s11 + $0x1d0] sm:$0xff]  ;;  %419 = vst [vmem:[%s1703_s12 + $0xd8] sm:$0xff] %v418_v27 }
  0x27   : > { %421 = vst [vmem:[%s1703_s12 + $0xe0] sm:$0xff] %v420_v28  ;;  %423 = vst [vmem:[%s1703_s12 + $0xe8] sm:$0xff] %v422_v29  ;;  %v424_v30 = vld [vmem:[%s1698_s11 + $0x1e0] sm:$0xff]  ;;  %v426_v31 = vld [vmem:[%s1698_s11 + $0x1f0] sm:$0xff] }
  0x28   : > { %v428_v32 = vld [vmem:[%s1698_s11 + $0x200] sm:$0xff]  ;;  %425 = vst [vmem:[%s1703_s12 + $0xf0] sm:$0xff] %v424_v30  ;;  %427 = vst [vmem:[%s1703_s12 + $0xf8] sm:$0xff] %v426_v31  ;;  %v430_v33 = vld [vmem:[%s1698_s11 + $0x210] sm:$0xff] }
  0x29   : > { %429 = vst [vmem:[%s1703_s12 + $0x100] sm:$0xff] %v428_v32  ;;  %v432_v34 = vld [vmem:[%s1698_s11 + $0x220] sm:$0xff]  ;;  %v434_v35 = vld [vmem:[%s1698_s11 + $0x230] sm:$0xff]  ;;  %431 = vst [vmem:[%s1703_s12 + $0x108] sm:$0xff] %v430_v33 }
  0x2a   : > { %433 = vst [vmem:[%s1703_s12 + $0x110] sm:$0xff] %v432_v34  ;;  %435 = vst [vmem:[%s1703_s12 + $0x118] sm:$0xff] %v434_v35  ;;  %v436_v36 = vld [vmem:[%s1698_s11 + $0x240] sm:$0xff]  ;;  %v438_v37 = vld [vmem:[%s1698_s11 + $0x250] sm:$0xff] }
  0x2b   : > { %v440_v38 = vld [vmem:[%s1698_s11 + $0x260] sm:$0xff]  ;;  %437 = vst [vmem:[%s1703_s12 + $0x120] sm:$0xff] %v436_v36  ;;  %439 = vst [vmem:[%s1703_s12 + $0x128] sm:$0xff] %v438_v37  ;;  %v442_v39 = vld [vmem:[%s1698_s11 + $0x270] sm:$0xff] }
  0x2c   : > { %441 = vst [vmem:[%s1703_s12 + $0x130] sm:$0xff] %v440_v38  ;;  %v444_v40 = vld [vmem:[%s1698_s11 + $0x280] sm:$0xff]  ;;  %v446_v41 = vld [vmem:[%s1698_s11 + $0x290] sm:$0xff]  ;;  %443 = vst [vmem:[%s1703_s12 + $0x138] sm:$0xff] %v442_v39 }
  0x2d   : > { %445 = vst [vmem:[%s1703_s12 + $0x140] sm:$0xff] %v444_v40  ;;  %447 = vst [vmem:[%s1703_s12 + $0x148] sm:$0xff] %v446_v41  ;;  %v448_v42 = vld [vmem:[%s1698_s11 + $0x2a0] sm:$0xff]  ;;  %v450_v43 = vld [vmem:[%s1698_s11 + $0x2b0] sm:$0xff] }
  0x2e   : > { %v452_v44 = vld [vmem:[%s1698_s11 + $0x2c0] sm:$0xff]  ;;  %449 = vst [vmem:[%s1703_s12 + $0x150] sm:$0xff] %v448_v42  ;;  %451 = vst [vmem:[%s1703_s12 + $0x158] sm:$0xff] %v450_v43  ;;  %v454_v45 = vld [vmem:[%s1698_s11 + $0x2d0] sm:$0xff] }
  0x2f   : > { %453 = vst [vmem:[%s1703_s12 + $0x160] sm:$0xff] %v452_v44  ;;  %v456_v46 = vld [vmem:[%s1698_s11 + $0x2e0] sm:$0xff]  ;;  %v458_v47 = vld [vmem:[%s1698_s11 + $0x2f0] sm:$0xff]  ;;  %455 = vst [vmem:[%s1703_s12 + $0x168] sm:$0xff] %v454_v45 }
  0x30   : > { %457 = vst [vmem:[%s1703_s12 + $0x170] sm:$0xff] %v456_v46  ;;  %459 = vst [vmem:[%s1703_s12 + $0x178] sm:$0xff] %v458_v47  ;;  %v460_v48 = vld [vmem:[%s1698_s11 + $0x300] sm:$0xff]  ;;  %v462_v49 = vld [vmem:[%s1698_s11 + $0x310] sm:$0xff] }
  0x31   : > { %v464_v50 = vld [vmem:[%s1698_s11 + $0x320] sm:$0xff]  ;;  %461 = vst [vmem:[%s1703_s12 + $0x180] sm:$0xff] %v460_v48  ;;  %463 = vst [vmem:[%s1703_s12 + $0x188] sm:$0xff] %v462_v49  ;;  %v466_v51 = vld [vmem:[%s1698_s11 + $0x330] sm:$0xff] }
  0x32   : > { %465 = vst [vmem:[%s1703_s12 + $0x190] sm:$0xff] %v464_v50  ;;  %v468_v52 = vld [vmem:[%s1698_s11 + $0x340] sm:$0xff]  ;;  %v470_v53 = vld [vmem:[%s1698_s11 + $0x350] sm:$0xff]  ;;  %467 = vst [vmem:[%s1703_s12 + $0x198] sm:$0xff] %v466_v51 }
  0x33   : > { %469 = vst [vmem:[%s1703_s12 + $0x1a0] sm:$0xff] %v468_v52  ;;  %471 = vst [vmem:[%s1703_s12 + $0x1a8] sm:$0xff] %v470_v53  ;;  %v472_v54 = vld [vmem:[%s1698_s11 + $0x360] sm:$0xff]  ;;  %v474_v55 = vld [vmem:[%s1698_s11 + $0x370] sm:$0xff] }
  0x34   : > { %v476_v56 = vld [vmem:[%s1698_s11 + $0x380] sm:$0xff]  ;;  %473 = vst [vmem:[%s1703_s12 + $0x1b0] sm:$0xff] %v472_v54  ;;  %475 = vst [vmem:[%s1703_s12 + $0x1b8] sm:$0xff] %v474_v55  ;;  %v478_v57 = vld [vmem:[%s1698_s11 + $0x390] sm:$0xff] }
  0x35   : > { %477 = vst [vmem:[%s1703_s12 + $0x1c0] sm:$0xff] %v476_v56  ;;  %v480_v58 = vld [vmem:[%s1698_s11 + $0x3a0] sm:$0xff]  ;;  %v482_v59 = vld [vmem:[%s1698_s11 + $0x3b0] sm:$0xff]  ;;  %479 = vst [vmem:[%s1703_s12 + $0x1c8] sm:$0xff] %v478_v57 }
  0x36   : > { %481 = vst [vmem:[%s1703_s12 + $0x1d0] sm:$0xff] %v480_v58  ;;  %483 = vst [vmem:[%s1703_s12 + $0x1d8] sm:$0xff] %v482_v59  ;;  %v484_v60 = vld [vmem:[%s1698_s11 + $0x3c0] sm:$0xff]  ;;  %v486_v61 = vld [vmem:[%s1698_s11 + $0x3d0] sm:$0xff] }
  0x37   : > { %v488_v62 = vld [vmem:[%s1698_s11 + $0x3e0] sm:$0xff]  ;;  %485 = vst [vmem:[%s1703_s12 + $0x1e0] sm:$0xff] %v484_v60  ;;  %487 = vst [vmem:[%s1703_s12 + $0x1e8] sm:$0xff] %v486_v61  ;;  %v490_v63 = vld [vmem:[%s1698_s11 + $0x3f0] sm:$0xff] }
  0x38   : > { %489 = vst [vmem:[%s1703_s12 + $0x1f0] sm:$0xff] %v488_v62  ;;  %491 = vst [vmem:[%s1703_s12 + $0x1f8] sm:$0xff] %v490_v63 }
  0x39 PF: > { %p1319_p7 = scmp.ge.s32.totalorder %s1608_s21, 1  ;;  %p516_p8 = scmp.lt.s32.totalorder %s1608_s21, 19 }
  0x3b   : > { %p517_p9 = pnand %p1319_p7, %p516_p8 }
  0x3c   : > { %s523_s13 = sand.u32 (!%p517_p9), 1, %s1584_s15   ;;  %s1321_s14 = sshll.u32 (!%p517_p9), %s1592_s17, 2 }
  0x3d   : > { %520 = sbr.rel (%p517_p9) target bundleno = 388 (0x184), region = 70  ;;  %s1320_s24 = sshll.u32 (!%p517_p9), %s523_s13, 9 }
  0x3e   : > { %p574_p10 = scmp.lt.s32.totalorder (!%p517_p9), %s1321_s14, 35  ;;  %s1322_s25 = sshll.u32 (!%p517_p9), %s1596_s18, 1 }
  0x3f   : > { %p583_p11 = scmp.lt.s32.totalorder (!%p517_p9), %s1322_s25, 3  ;;  %s1855_s11 = scalar_lea.vmem (!%p517_p9), [#allocation3], %s1320_s24 }
  0x40   : > { %p1325_p12 = scmp.ne.s32.totalorder (!%p517_p9), %s1592_s17, 0 }
  0x44   : > { %s1993_s14 = smov (!%p574_p10, %s1321_s14), 35  ;;  %s1995_s25 = smov (!%p583_p11, %s1322_s25), 3 }
  0x45   : > { %s578_s29 = scalar_lea.vmem %s1975_s0, %s1993_s14  ;;  %s585_s15 = scalar_lea.vmem %s1977_s2, %s1995_s25  ;;  %v1610_v0 = vmov (!%p1325_p12), 0.0  }
  0x46   : > { %s594_s18 = scalar_lea.vmem %s1978_s3, %s1995_s25  ;;  %s603_s10 = scalar_lea.vmem %s1979_s4, %s1995_s25  ;;  %609 = vst [vmem:[#allocation2] sm:$0xf] (!%p1325_p12), %v1610_v0 }
  0x47   : > { %608 = sbr.rel (%p1325_p12) target bundleno = 78 (0x4e), region = 78 }
  0x4e PF: > { %v1458_v1 = vld [vmem:[%s1855_s11 + $0x4] ss:$8 sps:$4 sm:$0xff]   ;;  %v1462_v3 = vld [vmem:[%s1855_s11] ss:$8 sps:$4 sm:$0xff]   ;;  %v1464_v5 = vld [vmem:[%s1855_s11 + $0x14] ss:$8 sps:$4 sm:$0xff]   ;;  %v688_v41 = vlaneseq }
  0x4f   : > { %v1460_v2 = vld [vmem:[%s1855_s11 + $0x104] ss:$8 sps:$4 sm:$0xff]   ;;  %1025 = vmatprep.subr.bf16.mxu1 %v1458_v1  ;;  %v1463_v4 = vld [vmem:[%s1855_s11 + $0x100] ss:$8 sps:$4 sm:$0xff]   ;;  %v1466_v6 = vld [vmem:[%s1855_s11 + $0x114] ss:$8 sps:$4 sm:$0xff]  }
  0x50   : > { %1066 = vmatprep.subr.bf16.mxu0 %v1460_v2  ;;  %1026 = vmatpush1.bf16.msra.mxu1 %v1462_v3  ;;  %v1468_v7 = vld [vmem:[%s1855_s11 + $0x10] ss:$8 sps:$4 sm:$0xff]   ;;  %v1470_v9 = vld [vmem:[%s1855_s11 + $0x24] ss:$8 sps:$4 sm:$0xff]   ;;  %v1474_v11 = vld [vmem:[%s1855_s11 + $0x20] ss:$8 sps:$4 sm:$0xff]  }
  0x51   : > { %1067 = vmatpush1.bf16.msra.mxu0 %v1463_v4  ;;  %1027 = vmatprep.subr.bf16.mxu1 %v1464_v5  ;;  %v1469_v8 = vld [vmem:[%s1855_s11 + $0x110] ss:$8 sps:$4 sm:$0xff]   ;;  %v1472_v10 = vld [vmem:[%s1855_s11 + $0x124] ss:$8 sps:$4 sm:$0xff]   ;;  %v1475_v12 = vld [vmem:[%s1855_s11 + $0x120] ss:$8 sps:$4 sm:$0xff]  }
  0x52   : > { %1068 = vmatprep.subr.bf16.mxu0 %v1466_v6  ;;  %v1476_v13 = vld [vmem:[%s1855_s11 + $0x34] ss:$8 sps:$4 sm:$0xff]   ;;  %v1480_v15 = vld [vmem:[%s1855_s11 + $0x30] ss:$8 sps:$4 sm:$0xff]   ;;  %v1482_v17 = vld [vmem:[%s1855_s11 + $0x44] ss:$8 sps:$4 sm:$0xff]  }
  0x53   : > { %v1478_v14 = vld [vmem:[%s1855_s11 + $0x134] ss:$8 sps:$4 sm:$0xff]   ;;  %v1481_v16 = vld [vmem:[%s1855_s11 + $0x130] ss:$8 sps:$4 sm:$0xff]   ;;  %v1484_v18 = vld [vmem:[%s1855_s11 + $0x144] ss:$8 sps:$4 sm:$0xff]  }
  0x54   : > { %1028 = vmatpush1.bf16.msra.mxu1 %v1468_v7  ;;  %v1486_v19 = vld [vmem:[%s1855_s11 + $0x40] ss:$8 sps:$4 sm:$0xff]   ;;  %v1488_v21 = vld [vmem:[%s1855_s11 + $0x54] ss:$8 sps:$4 sm:$0xff]   ;;  %v1492_v23 = vld [vmem:[%s1855_s11 + $0x50] ss:$8 sps:$4 sm:$0xff]  }
  0x55   : > { %1069 = vmatpush1.bf16.msra.mxu0 %v1469_v8  ;;  %1029 = vmatprep.subr.bf16.mxu1 %v1470_v9  ;;  %v1487_v20 = vld [vmem:[%s1855_s11 + $0x140] ss:$8 sps:$4 sm:$0xff]   ;;  %v1490_v22 = vld [vmem:[%s1855_s11 + $0x154] ss:$8 sps:$4 sm:$0xff]   ;;  %v1493_v24 = vld [vmem:[%s1855_s11 + $0x150] ss:$8 sps:$4 sm:$0xff]  }
  0x56   : > { %1070 = vmatprep.subr.bf16.mxu0 %v1472_v10  ;;  %v1494_v25 = vld [vmem:[%s1855_s11 + $0x64] ss:$8 sps:$4 sm:$0xff]   ;;  %v1498_v27 = vld [vmem:[%s1855_s11 + $0x60] ss:$8 sps:$4 sm:$0xff]   ;;  %v1500_v29 = vld [vmem:[%s1855_s11 + $0x74] ss:$8 sps:$4 sm:$0xff]  }
  0x57   : > { %v1496_v26 = vld [vmem:[%s1855_s11 + $0x164] ss:$8 sps:$4 sm:$0xff]   ;;  %v1499_v28 = vld [vmem:[%s1855_s11 + $0x160] ss:$8 sps:$4 sm:$0xff]   ;;  %v1502_v30 = vld [vmem:[%s1855_s11 + $0x174] ss:$8 sps:$4 sm:$0xff]  }
  0x58   : > { %1030 = vmatpush1.bf16.msra.mxu1 %v1474_v11  ;;  %v1504_v31 = vld [vmem:[%s1855_s11 + $0x70] ss:$8 sps:$4 sm:$0xff]   ;;  %v1506_v33 = vld [vmem:[%s1855_s11 + $0x84] ss:$8 sps:$4 sm:$0xff]   ;;  %v1510_v35 = vld [vmem:[%s1855_s11 + $0x80] ss:$8 sps:$4 sm:$0xff]  }
  0x59   : > { %1071 = vmatpush1.bf16.msra.mxu0 %v1475_v12  ;;  %1031 = vmatprep.subr.bf16.mxu1 %v1476_v13  ;;  %v1505_v32 = vld [vmem:[%s1855_s11 + $0x170] ss:$8 sps:$4 sm:$0xff]   ;;  %v1508_v34 = vld [vmem:[%s1855_s11 + $0x184] ss:$8 sps:$4 sm:$0xff]   ;;  %v1511_v36 = vld [vmem:[%s1855_s11 + $0x180] ss:$8 sps:$4 sm:$0xff]  }
  0x5a   : > { %1072 = vmatprep.subr.bf16.mxu0 %v1478_v14  ;;  %v1512_v37 = vld [vmem:[%s1855_s11 + $0x94] ss:$8 sps:$4 sm:$0xff]   ;;  %v1611_v39 = vmov 1966171168   ;;  %v1516_v42 = vld [vmem:[%s1855_s11 + $0x90] ss:$8 sps:$4 sm:$0xff]  }
  0x5b   : > { %v1514_v38 = vld [vmem:[%s1855_s11 + $0x194] ss:$8 sps:$4 sm:$0xff]   ;;  %v686_v40 = vunpack.c.l.s4 %v1611_v39  ;;  %v1517_v43 = vld [vmem:[%s1855_s11 + $0x190] ss:$8 sps:$4 sm:$0xff]   ;;  %v1518_v44 = vld [vmem:[%s1855_s11 + $0xa4] ss:$8 sps:$4 sm:$0xff]  }
  0x5c   : > { %1032 = vmatpush1.bf16.msra.mxu1 %v1480_v15  ;;  %v1520_v45 = vld [vmem:[%s1855_s11 + $0x1a4] ss:$8 sps:$4 sm:$0xff]   ;;  %v1900_v47 = vshrl.u32 %v688_v41, 7  ;;  %v1522_v48 = vld [vmem:[%s1855_s11 + $0xa0] ss:$8 sps:$4 sm:$0xff]   ;;  %p1391_p13 = scmp.ne.s32.totalorder %s1592_s17, 8 }
  0x5d   : > { %1073 = vmatpush1.bf16.msra.mxu0 %v1481_v16  ;;  %1033 = vmatprep.subr.bf16.mxu1 %v1482_v17  ;;  %v687_v46 = vunpack.c.0.s8 %v686_v40  ;;  %v1523_v49 = vld [vmem:[%s1855_s11 + $0x1a0] ss:$8 sps:$4 sm:$0xff]   ;;  %v1524_v50 = vld [vmem:[%s1855_s11 + $0xb4] ss:$8 sps:$4 sm:$0xff]   ;;  %v1528_v54 = vld [vmem:[%s1855_s11 + $0xb0] ss:$8 sps:$4 sm:$0xff]  }
  0x5e   : > { %1074 = vmatprep.subr.bf16.mxu0 %v1484_v18  ;;  %v1526_v51 = vld [vmem:[%s1855_s11 + $0x1b4] ss:$8 sps:$4 sm:$0xff]   ;;  %v1529_v55 = vld [vmem:[%s1855_s11 + $0x1b0] ss:$8 sps:$4 sm:$0xff]   ;;  %v1530_v57 = vld [vmem:[%s1855_s11 + $0xc4] ss:$8 sps:$4 sm:$0xff]  }
  0x5f   : > { %v1907_v52 = vsub.s32 %v687_v46, %v1900_v47  ;;  %v1326_v53 = vld.sshfl [vmem:[%s578_s29] sm:$0x33 pattern:$0x75316420]  ;;  %v1532_v58 = vld [vmem:[%s1855_s11 + $0x1c4] ss:$8 sps:$4 sm:$0xff]  }
  0x60   : > { %1034 = vmatpush1.bf16.msra.mxu1 %v1486_v19  ;;  %v684_v56 = vcombine.high %v1326_v53, %v1326_v53  ;;  %v1534_v60 = vld [vmem:[%s1855_s11 + $0xc0] ss:$8 sps:$4 sm:$0xff]   ;;  %v1536_v63 = vld [vmem:[%s1855_s11 + $0xd4] ss:$8 sps:$4 sm:$0xff]   ;;  %v1540_v1 = vld [vmem:[%s1855_s11 + $0xd0] ss:$8 sps:$4 sm:$0xff]  }
  0x61   : > { %1075 = vmatpush1.bf16.msra.mxu0 %v1487_v20  ;;  %1035 = vmatprep.subr.bf16.mxu1 %v1488_v21  ;;  %v1535_v61 = vld [vmem:[%s1855_s11 + $0x1c0] ss:$8 sps:$4 sm:$0xff]   ;;  %v1538_v0 = vld [vmem:[%s1855_s11 + $0x1d4] ss:$8 sps:$4 sm:$0xff]   ;;  %v1541_v2 = vld [vmem:[%s1855_s11 + $0x1d0] ss:$8 sps:$4 sm:$0xff]   ;;  %v691_v9 = vrot.slane %v1326_v53, %v1907_v52 }
  0x62   : > { %1076 = vmatprep.subr.bf16.mxu0 %v1490_v22  ;;  %v698_v59 = vrot.slane %v684_v56, %v1907_v52  ;;  %v1542_v3 = vld [vmem:[%s1855_s11 + $0xe4] ss:$8 sps:$4 sm:$0xff]   ;;  %v1546_v5 = vld [vmem:[%s1855_s11 + $0xe0] ss:$8 sps:$4 sm:$0xff]   ;;  %v1548_v7 = vld [vmem:[%s1855_s11 + $0xf4] ss:$8 sps:$4 sm:$0xff]  }
  0x63   : > { %v1544_v4 = vld [vmem:[%s1855_s11 + $0x1e4] ss:$8 sps:$4 sm:$0xff]   ;;  %v1547_v6 = vld [vmem:[%s1855_s11 + $0x1e0] ss:$8 sps:$4 sm:$0xff]   ;;  %v1550_v8 = vld [vmem:[%s1855_s11 + $0x1f4] ss:$8 sps:$4 sm:$0xff]   ;;  %v699_v12 = vcombine.high %v691_v9, %v691_v9 }
  0x64   : > { %1036 = vmatpush1.bf16.msra.mxu1 %v1492_v23  ;;  %v700_v62 = vcombine.high %v698_v59, %v698_v59  ;;  %1057 = vmatprep.mubr.bf16.mxu1 %v698_v59  ;;  %v1552_v10 = vld [vmem:[%s1855_s11 + $0xf0] ss:$8 sps:$4 sm:$0xff]   ;;  %v1612_v13 = vmov 1983009808  }
  0x65   : > { %1077 = vmatpush1.bf16.msra.mxu0 %v1493_v24  ;;  %1037 = vmatprep.subr.bf16.mxu1 %v1494_v25  ;;  %v1553_v11 = vld [vmem:[%s1855_s11 + $0x1f0] ss:$8 sps:$4 sm:$0xff]   ;;  %v1111_v14 = vunpack.c.l.s4 %v1612_v13 }
  0x66   : > { %1078 = vmatprep.subr.bf16.mxu0 %v1496_v26  ;;  %1098 = vmatprep.mubr.bf16.mxu0 %v700_v62 }
  0x67   : > { %v1112_v15 = vunpack.c.0.s8 %v1111_v14 }
  0x68   : > { %1038 = vmatpush1.bf16.msra.mxu1 %v1498_v27 }
  0x69   : > { %1079 = vmatpush1.bf16.msra.mxu0 %v1499_v28  ;;  %1039 = vmatprep.subr.bf16.mxu1 %v1500_v29  ;;  %v1115_v22 = vsub.s32 %v1112_v15, %v1900_v47  ;;  %v610_v28 = vld [vmem:[#allocation2] sm:$0xf] }
  0x6a   : > { %1080 = vmatprep.subr.bf16.mxu0 %v1502_v30 }
  0x6c   : > { %1040 = vmatpush1.bf16.msra.mxu1 %v1504_v31  ;;  %v1125_v31 = vld [vmem:[%s585_s15] sm:$0x3] (!%p1391_p13) }
  0x6d   : > { %1081 = vmatpush1.bf16.msra.mxu0 %v1505_v32  ;;  %1041 = vmatprep.subr.bf16.mxu1 %v1506_v33  ;;  %v1129_v32 = vsub.s32 (!%p1391_p13), 0, %v1900_v47  ;;  %v1133_v33 = vsub.s32 (!%p1391_p13), 1, %v1900_v47 }
  0x6e   : > { %1082 = vmatprep.subr.bf16.mxu0 %v1508_v34 }
  0x6f   : > { %v1130_v34 = vrot.slane (!%p1391_p13), %v1125_v31, %v1129_v32 }
  0x70   : > { %1042 = vmatpush1.bf16.msra.mxu1 %v1510_v35  ;;  %v1134_v35 = vrot.slane (!%p1391_p13), %v1125_v31, %v1133_v33 }
  0x71   : > { %1083 = vmatpush1.bf16.msra.mxu0 %v1511_v36  ;;  %1043 = vmatprep.subr.bf16.mxu1 %v1512_v37  ;;  %v1145_v36 = vld [vmem:[%s594_s18] sm:$0x3] (!%p1391_p13) }
  0x72   : > { %1084 = vmatprep.subr.bf16.mxu0 %v1514_v38  ;;  %v1135_v37 = vcombine.low (!%p1391_p13), %v1130_v34, %v1134_v35  ;;  %v1146_v40 = vunpack.c.l.bf16 (!%p1391_p13), %v1145_v36 }
  0x74   : > { %1044 = vmatpush1.bf16.msra.mxu1 %v1516_v42  ;;  %v1142_v39 = vrot.slane (!%p1391_p13), %v1135_v37, %v1115_v22 }
  0x75   : > { %1085 = vmatpush1.bf16.msra.mxu0 %v1517_v43  ;;  %1045 = vmatprep.subr.bf16.mxu1 %v1518_v44 }
  0x76   : > { %1086 = vmatprep.subr.bf16.mxu0 %v1520_v45 }
  0x78   : > { %1046 = vmatpush1.bf16.msra.mxu1 %v1522_v48 }
  0x79   : > { %1087 = vmatpush1.bf16.msra.mxu0 %v1523_v49  ;;  %1047 = vmatprep.subr.bf16.mxu1 %v1524_v50 }
  0x7a   : > { %1088 = vmatprep.subr.bf16.mxu0 %v1526_v51 }
  0x7c   : > { %1048 = vmatpush1.bf16.msra.mxu1 %v1528_v54 }
  0x7d   : > { %1089 = vmatpush1.bf16.msra.mxu0 %v1529_v55  ;;  %1049 = vmatprep.subr.bf16.mxu1 %v1530_v57 }
  0x7e   : > { %1090 = vmatprep.subr.bf16.mxu0 %v1532_v58 }
  0x80   : > { %1050 = vmatpush1.bf16.msra.mxu1 %v1534_v60 }
  0x81   : > { %1091 = vmatpush1.bf16.msra.mxu0 %v1535_v61  ;;  %1051 = vmatprep.subr.bf16.mxu1 %v1536_v63 }
  0x82   : > { %1092 = vmatprep.subr.bf16.mxu0 %v1538_v0 }
  0x84   : > { %1052 = vmatpush1.bf16.msra.mxu1 %v1540_v1 }
  0x85   : > { %1093 = vmatpush1.bf16.msra.mxu0 %v1541_v2  ;;  %1053 = vmatprep.subr.bf16.mxu1 %v1542_v3 }
  0x86   : > { %1094 = vmatprep.subr.bf16.mxu0 %v1544_v4 }
  0x88   : > { %1054 = vmatpush1.bf16.msra.mxu1 %v1546_v5 }
  0x89   : > { %1095 = vmatpush1.bf16.msra.mxu0 %v1547_v6  ;;  %1055 = vmatprep.subr.bf16.mxu1 %v1548_v7 }
  0x8a   : > { %1096 = vmatprep.subr.bf16.mxu0 %v1550_v8 }
  0x8c   : > { %1056 = vmatpush1.bf16.msra.mxu1 %v1552_v10 }
  0x8d   : > { %1097 = vmatpush1.bf16.msra.mxu0 %v1553_v11 }
  0x8f   : > { %1058 = vmatmul.mubr.bf16.vlgmr.msra.gmra.mrb[0].mxu1 %v691_v9 }
  0x90   : > { %1099 = vmatmul.mubr.bf16.vlgmr.msra.gmra.mrb[0].mxu0 %v699_v12 }
 0x162   : > { %v1059_v16 = vpop.f32.mrb[0].mxu1 }
 0x163   : > { %v1100_v17 = vpop.f32.mrb[0].mxu0  ;;  %v1061_v19 = vpop.f32.mrb[1].mxu1 }
 0x164   : > { %v1101_v18 = vadd.f32 %v1100_v17, %v1059_v16  ;;  %v1102_v20 = vpop.f32.mrb[1].mxu0  ;;  %v1063_v23 = vpop.f32.mrb[2].mxu1 }
 0x165   : > { %v1103_v21 = vadd.f32 %v1102_v20, %v1061_v19  ;;  %v1104_v24 = vpop.f32.mrb[2].mxu0  ;;  %v1064_v25 = vpop.f32.mrb[3].mxu1 }
 0x166   : > { %v1105_v26 = vpop.f32.mrb[3].mxu0 }
 0x167   : > { %v1109_v27 = vcombine.low %v1101_v18, %v1103_v21  ;;  %1123 = sbr.rel (%p1391_p13) target bundleno = 388 (0x184), region = 82 }
 0x169   : > { %v1116_v29 = vrot.slane %v1109_v27, %v1115_v22 }
 0x16b   : > { %v1118_v30 = vadd.f32 %v1116_v29, %v610_v28 }
 0x16d   : > { %1119 = vst [vmem:[#allocation2] sm:$0xf] %v1118_v30 }
 0x174   : > { %v1124_v38 = vld [vmem:[#allocation2] sm:$0xf] }
 0x175   : > { %v1144_v41 = vadd.f32 %v1142_v39, %v1124_v38 }
 0x177   : > { %v1147_v42 = vadd.f32 %v1146_v40, %v1144_v41 }
 0x179   : > { %v1148_v43 = vmax.f32 %v1147_v42, 0.0 }
 0x17b   : > { %v1156_v44 = vrot.slane %v1148_v43, %v1115_v22 }
 0x17d   : > { %v1157_v45 = vcombine.high %v1156_v44, %v1156_v44 }
 0x17f   : > { %v1392_v46 = vpack.c.bf16 %v1157_v45, %v1156_v44 }
 0x181   : > { %v1171_v48 = vrot.slane %v1392_v46, %v1907_v52 }
 0x183   : > { %1393 = vst.sshfl [vmem:[%s603_s10] sm:$0x5 pattern:$0x73625140] %v1171_v48 }
 0x184 PF: > { %s14_s21 = sadd.s32 1, %s1608_s21   ;;  %s1980_s15 = smov %s1588_s16 }
 0x185   : > { %p11_p0 = scmp.ge.s32.totalorder %s14_s21, 20   ;;  %s1981_s16 = smov %s1689_s28 }
 0x186   : > { %s1982_s17 = smov %s1600_s19  ;;  %s1983_s18 = smov %s1604_s20 }
 0x187   : > { %s1984_s19 = smov %s1987_s22  ;;  %s1985_s20 = smov %s1991_s23 }
 0x188   :  { %13 = sbr.rel (!%p11_p0) target bundleno = 4 (0x4), region = 126 }

// kernel: resnet_forward.27
= control target key start
LH: loop header
LB: loop body
LE: loop exit
PB: predicated region body
PF: predicated region fallthrough
CT: control target
= control target key end

     0   :  { %v94_v51 = vlaneseq  ;;  %s696_s0 = inlined_call_operand.vmem [shape: bf16[2,1,512], index: 0, kind: input, shape index: {}]   ;;  %s697_s1 = inlined_call_operand.vmem [shape: f32[512,10], index: 1, kind: input, shape index: {}]   ;;  %s698_s2 = inlined_call_operand.vmem [shape: f32[1,10], index: 2, kind: input, shape index: {}]   ;;  %s699_s3 = inlined_call_operand.hbm [shape: f32[2,10], index: 3, kind: output, shape index: {}]  }
   0x1   :  { %v37_v0 = vld [vmem:[%s697_s1 + $0x80] sm:$0xff]  ;;  %v38_v1 = vld [vmem:[%s697_s1 + $0x88] sm:$0xff]  ;;  %v39_v11 = vld [vmem:[%s697_s1 + $0x90] sm:$0xff] }
   0x2   :  { %v21_v2 = vld [vmem:[%s697_s1] sm:$0xff]  ;;  %v366_v3 = vpack.c.bf16 %v38_v1, %v37_v0  ;;  %v22_v4 = vld [vmem:[%s697_s1 + $0x8] sm:$0xff]  ;;  %v40_v13 = vld [vmem:[%s697_s1 + $0x98] sm:$0xff]  ;;  %v608_v0 = vshrl.u32 %v94_v51, 7 }
   0x3   :  { %v69_v5 = vld [vmem:[%s697_s1 + $0x180] sm:$0xff]  ;;  %v70_v6 = vld [vmem:[%s697_s1 + $0x188] sm:$0xff]  ;;  %v368_v7 = vpack.c.bf16 %v22_v4, %v21_v2  ;;  %v23_v14 = vld [vmem:[%s697_s1 + $0x10] sm:$0xff]  ;;  %v370_v16 = vpack.c.bf16 %v40_v13, %v39_v11 }
   0x4   :  { %v398_v8 = vpack.c.bf16 %v70_v6, %v69_v5  ;;  %v53_v9 = vld [vmem:[%s697_s1 + $0x100] sm:$0xff]  ;;  %v54_v10 = vld [vmem:[%s697_s1 + $0x108] sm:$0xff]  ;;  %367 = vmatprep.subr.bf16.mxu0 %v366_v3  ;;  %v24_v15 = vld [vmem:[%s697_s1 + $0x18] sm:$0xff] }
   0x5   :  { %v400_v12 = vpack.c.bf16 %v54_v10, %v53_v9  ;;  %369 = vmatpush3.bf16.msra.mxu0 %v368_v7  ;;  %v372_v17 = vpack.c.bf16 %v24_v15, %v23_v14  ;;  %v71_v18 = vld [vmem:[%s697_s1 + $0x190] sm:$0xff]  ;;  %v72_v19 = vld [vmem:[%s697_s1 + $0x198] sm:$0xff]  ;;  %v41_v23 = vld [vmem:[%s697_s1 + $0xa0] sm:$0xff] }
   0x6   :  { %399 = vmatprep.subr.bf16.mxu1 %v398_v8  ;;  %v55_v20 = vld [vmem:[%s697_s1 + $0x110] sm:$0xff]  ;;  %v402_v21 = vpack.c.bf16 %v72_v19, %v71_v18  ;;  %v56_v22 = vld [vmem:[%s697_s1 + $0x118] sm:$0xff]  ;;  %v42_v24 = vld [vmem:[%s697_s1 + $0xa8] sm:$0xff]  ;;  %371 = vmatprep.subr.bf16.mxu0 %v370_v16  ;;  %v100_v16 = vsub.s32 2, %v608_v0 }
   0x7   :  { %401 = vmatpush3.bf16.msra.mxu1 %v400_v12  ;;  %v404_v25 = vpack.c.bf16 %v56_v22, %v55_v20  ;;  %v374_v26 = vpack.c.bf16 %v42_v24, %v41_v23  ;;  %v25_v27 = vld [vmem:[%s697_s1 + $0x20] sm:$0xff]  ;;  %v26_v28 = vld [vmem:[%s697_s1 + $0x28] sm:$0xff]  ;;  %v43_v35 = vld [vmem:[%s697_s1 + $0xb0] sm:$0xff] }
   0x8   :  { %v73_v29 = vld [vmem:[%s697_s1 + $0x1a0] sm:$0xff]  ;;  %403 = vmatprep.subr.bf16.mxu1 %v402_v21  ;;  %v74_v30 = vld [vmem:[%s697_s1 + $0x1a8] sm:$0xff]  ;;  %v376_v33 = vpack.c.bf16 %v26_v28, %v25_v27  ;;  %v44_v36 = vld [vmem:[%s697_s1 + $0xb8] sm:$0xff]  ;;  %v108_v21 = vsub.s32 6, %v608_v0 }
   0x9   :  { %v57_v31 = vld [vmem:[%s697_s1 + $0x120] sm:$0xff]  ;;  %v58_v32 = vld [vmem:[%s697_s1 + $0x128] sm:$0xff]  ;;  %373 = vmatpush3.bf16.msra.mxu0 %v372_v17  ;;  %v406_v34 = vpack.c.bf16 %v74_v30, %v73_v29  ;;  %v27_v37 = vld [vmem:[%s697_s1 + $0x30] sm:$0xff]  ;;  %v378_v39 = vpack.c.bf16 %v44_v36, %v43_v35 }
   0xa   :  { %375 = vmatprep.subr.bf16.mxu0 %v374_v26  ;;  %v408_v38 = vpack.c.bf16 %v58_v32, %v57_v31  ;;  %v28_v40 = vld [vmem:[%s697_s1 + $0x38] sm:$0xff]  ;;  %v75_v41 = vld [vmem:[%s697_s1 + $0x1b0] sm:$0xff]  ;;  %v45_v46 = vld [vmem:[%s697_s1 + $0xc0] sm:$0xff] }
   0xb   :  { %405 = vmatpush3.bf16.msra.mxu1 %v404_v25  ;;  %v76_v42 = vld [vmem:[%s697_s1 + $0x1b8] sm:$0xff]  ;;  %v59_v44 = vld [vmem:[%s697_s1 + $0x130] sm:$0xff]  ;;  %v46_v47 = vld [vmem:[%s697_s1 + $0xc8] sm:$0xff]  ;;  %v380_v48 = vpack.c.bf16 %v28_v40, %v27_v37 }
   0xc   :  { %407 = vmatprep.subr.bf16.mxu1 %v406_v34  ;;  %v410_v43 = vpack.c.bf16 %v76_v42, %v75_v41  ;;  %v60_v45 = vld [vmem:[%s697_s1 + $0x138] sm:$0xff]  ;;  %v77_v49 = vld [vmem:[%s697_s1 + $0x1c0] sm:$0xff]  ;;  %v78_v50 = vld [vmem:[%s697_s1 + $0x1c8] sm:$0xff]  ;;  %v382_v53 = vpack.c.bf16 %v46_v47, %v45_v46 }
   0xd   :  { %377 = vmatpush3.bf16.msra.mxu0 %v376_v33  ;;  %v412_v52 = vpack.c.bf16 %v60_v45, %v59_v44  ;;  %v29_v54 = vld [vmem:[%s697_s1 + $0x40] sm:$0xff]  ;;  %v30_v55 = vld [vmem:[%s697_s1 + $0x48] sm:$0xff]  ;;  %v414_v57 = vpack.c.bf16 %v78_v50, %v77_v49  ;;  %v47_v59 = vld [vmem:[%s697_s1 + $0xd0] sm:$0xff] }
   0xe   :  { %379 = vmatprep.subr.bf16.mxu0 %v378_v39  ;;  %v61_v56 = vld [vmem:[%s697_s1 + $0x140] sm:$0xff]  ;;  %v62_v58 = vld [vmem:[%s697_s1 + $0x148] sm:$0xff]  ;;  %v48_v60 = vld [vmem:[%s697_s1 + $0xd8] sm:$0xff]  ;;  %v384_v63 = vpack.c.bf16 %v30_v55, %v29_v54 }
   0xf   :  { %409 = vmatpush3.bf16.msra.mxu1 %v408_v38  ;;  %v79_v61 = vld [vmem:[%s697_s1 + $0x1d0] sm:$0xff]  ;;  %v80_v62 = vld [vmem:[%s697_s1 + $0x1d8] sm:$0xff]  ;;  %v416_v1 = vpack.c.bf16 %v62_v58, %v61_v56  ;;  %v386_v2 = vpack.c.bf16 %v48_v60, %v47_v59  ;;  %v49_v8 = vld [vmem:[%s697_s1 + $0xe0] sm:$0xff] }
  0x10   :  { %411 = vmatprep.subr.bf16.mxu1 %v410_v43  ;;  %v31_v3 = vld [vmem:[%s697_s1 + $0x50] sm:$0xff]  ;;  %v32_v4 = vld [vmem:[%s697_s1 + $0x58] sm:$0xff]  ;;  %v418_v6 = vpack.c.bf16 %v80_v62, %v79_v61  ;;  %v50_v9 = vld [vmem:[%s697_s1 + $0xe8] sm:$0xff] }
  0x11   :  { %381 = vmatpush3.bf16.msra.mxu0 %v380_v48  ;;  %v63_v5 = vld [vmem:[%s697_s1 + $0x150] sm:$0xff]  ;;  %v64_v7 = vld [vmem:[%s697_s1 + $0x158] sm:$0xff]  ;;  %v81_v10 = vld [vmem:[%s697_s1 + $0x1e0] sm:$0xff]  ;;  %v388_v12 = vpack.c.bf16 %v32_v4, %v31_v3  ;;  %v390_v18 = vpack.c.bf16 %v50_v9, %v49_v8 }
  0x12   :  { %383 = vmatprep.subr.bf16.mxu0 %v382_v53  ;;  %v82_v11 = vld [vmem:[%s697_s1 + $0x1e8] sm:$0xff]  ;;  %v33_v13 = vld [vmem:[%s697_s1 + $0x60] sm:$0xff]  ;;  %v420_v17 = vpack.c.bf16 %v64_v7, %v63_v5 }
  0x13   :  { %413 = vmatpush3.bf16.msra.mxu1 %v412_v52  ;;  %v34_v14 = vld [vmem:[%s697_s1 + $0x68] sm:$0xff]  ;;  %v65_v15 = vld [vmem:[%s697_s1 + $0x160] sm:$0xff] }
  0x14   :  { %415 = vmatprep.subr.bf16.mxu1 %v414_v57  ;;  %v66_v19 = vld [vmem:[%s697_s1 + $0x168] sm:$0xff]  ;;  %v293_v20 = vld [vmem:[%s696_s0] sm:$0xff]  }
  0x15   :  { %385 = vmatpush3.bf16.msra.mxu0 %v384_v63 }
  0x16   :  { %387 = vmatprep.subr.bf16.mxu0 %v386_v2 }
  0x17   :  { %417 = vmatpush3.bf16.msra.mxu1 %v416_v1 }
  0x18   :  { %8 = vsyncpa [#allocation3], 0  ;;  %419 = vmatprep.subr.bf16.mxu1 %v418_v6  ;;  %v422_v22 = vpack.c.bf16 %v82_v11, %v81_v10  ;;  %v51_v23 = vld [vmem:[%s697_s1 + $0xf0] sm:$0xff]  ;;  %v52_v24 = vld [vmem:[%s697_s1 + $0xf8] sm:$0xff]  ;;  %v294_v25 = vunpack.c.l.bf16 %v293_v20  ;;  %v295_v26 = vunpack.c.h.bf16 %v293_v20  ;;  %vm126_vm0 = vcmask 1041409   ;;  %s455_s7 = smov [#allocation2]  }
  0x19   :  { %v83_v27 = vld [vmem:[%s697_s1 + $0x1f0] sm:$0xff]  ;;  %v84_v28 = vld [vmem:[%s697_s1 + $0x1f8] sm:$0xff]  ;;  %v96_v29 = vsub.s32 0, %v608_v0  ;;  %389 = vmatpush3.bf16.msra.mxu0 %v388_v12  ;;  %v392_v30 = vpack.c.bf16 %v34_v14, %v33_v13  ;;  %v424_v31 = vpack.c.bf16 %v66_v19, %v65_v15  ;;  %v394_v34 = vpack.c.bf16 %v52_v24, %v51_v23  ;;  %v291_v54 = vld [vmem:[%s698_s2] ss:$0 sm:$0xff]  ;;  %s283_s8 = sshll.u32 %s455_s7, 4  ;;  %s284_s8 = int_to_ptr.vmem [resolvable:$true] %s283_s8 }
  0x1a   :  { %v101_v32 = vrot.slane %v294_v25, %v100_v16  ;;  %v117_v33 = vrot.slane %v295_v26, %v100_v16  ;;  %391 = vmatprep.subr.bf16.mxu0 %v390_v18  ;;  %v35_v35 = vld [vmem:[%s697_s1 + $0x70] sm:$0xff]  ;;  %v36_v36 = vld [vmem:[%s697_s1 + $0x78] sm:$0xff]  ;;  %v109_v37 = vrot.slane %v294_v25, %v108_v21  ;;  %v125_v38 = vrot.slane %v295_v26, %v108_v21  ;;  %s431_s9 = scalar_lea.vmem %s284_s8, 32  ;;  %p436_p1 = scmp.lt.s32.totalorder %s284_s8, %s284_s8 }
  0x1b   :  { %421 = vmatpush3.bf16.msra.mxu1 %v420_v17  ;;  %v104_v39 = vsub.s32 4, %v608_v0  ;;  %v426_v40 = vpack.c.bf16 %v84_v28, %v83_v27  ;;  %v67_v41 = vld [vmem:[%s697_s1 + $0x170] sm:$0xff]  ;;  %v68_v42 = vld [vmem:[%s697_s1 + $0x178] sm:$0xff]  ;;  %v396_v45 = vpack.c.bf16 %v36_v36, %v35_v35  ;;  %v97_v46 = vrot.slane %v294_v25, %v96_v29  ;;  %p432_p0 = scmp.ne.s32.totalorder %s284_s8, %s431_s9  ;;  %p437_p2 = scmp.lt.s32.totalorder %s431_s9, %s431_s9 }
  0x1c   :  { %423 = vmatprep.subr.bf16.mxu1 %v422_v22  ;;  %v128_v43 = vsel %vm126_vm0, %v117_v33, %v101_v32  ;;  %v130_v44 = vsel %vm126_vm0, %v125_v38, %v109_v37  ;;  %v113_v47 = vrot.slane %v295_v26, %v96_v29  ;;  %v428_v48 = vpack.c.bf16 %v68_v42, %v67_v41 }
  0x1d   :  { %199 = vmatprep.mubr.f32.mxu0 %v128_v43  ;;  %393 = vmatpush3.bf16.msra.mxu0 %v392_v30  ;;  %v105_v49 = vrot.slane %v294_v25, %v104_v39  ;;  %v121_v50 = vrot.slane %v295_v26, %v104_v39  ;;  %vm275_vm1 = vcmask 74752   ;;  %p438_p3 = por %p437_p2, %p436_p1 }
  0x1e   :  { %269 = vmatprep.mubr.f32.mxu1 %v130_v44  ;;  %395 = vmatprep.subr.bf16.mxu0 %v394_v34  ;;  %v127_v51 = vsel %vm126_vm0, %v113_v47, %v97_v46 }
  0x1f   :  { %425 = vmatpush3.bf16.msra.mxu1 %v424_v31  ;;  %v129_v52 = vsel %vm126_vm0, %v121_v50, %v105_v49  ;;  %p439_p4 = pnand %p438_p3, %p432_p0 }
  0x20   :  { %427 = vmatprep.subr.bf16.mxu1 %v426_v40 }
  0x21   :  { %397 = vmatpush3.bf16.msra.mxu0 %v396_v45 }
  0x23   :  { %429 = vmatpush3.bf16.msra.mxu1 %v428_v48 }
  0x24   :  { %200 = vmatmul.mubr.f32.vlgmr.msra.gmra.mrb[0].mxu0 %v127_v51 }
  0x26   :  { %270 = vmatmul.mubr.f32.vlgmr.msra.gmra.mrb[0].mxu1 %v129_v52 }
  0xf7   :  { %v328_v53 = vpop.f32.mrb[0].mxu0 }
  0xf8   :  { %v329_v55 = vpop.f32.mrb[1].mxu0 }
  0xf9   :  { %v363_v56 = vpop.f32.mrb[0].mxu1  ;;  %v330_v57 = vadd.f32 %v329_v55, %v328_v53 }
  0xfa   :  { %v364_v58 = vpop.f32.mrb[1].mxu1 }
  0xfb   :  { %v365_v59 = vadd.f32 %v364_v58, %v363_v56  ;;  %v202_v60 = vadd.f32 %v330_v57, %v291_v54 }
  0xfd   :  { %v272_v61 = vadd.f32 %v365_v59, %v202_v60 }
  0xff   :  { %276 = vst.msk [vmem:[#allocation2] sm:$0x3] %vm275_vm1, %v272_v61 }
 0x100   :  { %442 = shalt.err (!%p439_p4)
}
 0x101   :  { %s443_s11 = scalar_lea.hbm %s699_s3, 32 }
 0x102   :  { %p444_p5 = scmp.ne.s32.totalorder %s699_s3, %s443_s11  ;;  %p447_p6 = scmp.lt.u32.totalorder %s443_s11, %s699_s3 }
 0x104   :  { %p449_p7 = pnand %p447_p6, %p444_p5 }
 0x106   :  { %452 = shalt.err (!%p449_p7)
}
 0x107   :  { %286 = dma.vmem_to_hbm [thread:$0]  %s284_s8, 32, %s699_s3, [#allocation3]  }
 0x108   :  { %453 = dma.done.wait [#allocation3], 32  }
 0x109   :  { %454 = vsyncadd [#allocation3], 4294967264 }
 0x10a   :  { %290 = vsyncpa [#allocation3], 1 }

</bundles_post_ra>
